<compile_context>
chip_gen: v6e
topology: v6e:2x2x1
jax: 0.10.0
libtpu: 0.0.40
codegen_flags: <defaults>
</compile_context>

<pallas_src>
import functools

import jax
import jax.numpy as jnp
from jax import lax
from jax.experimental import pallas as pl
from jax.experimental.pallas import tpu as pltpu


def _round_up(n, m):
    return ((n + m - 1) // m) * m


# ----------------------------- Pallas kernels -----------------------------

def _conv_front_kernel(xp_ref, w0_ref, w1_ref, op_ref, buf_ref, *, Wp, Lp, margin):
    # xp_ref : (1, Cin, Lp)    f32  spatially zero-padded input, flattened (H+2)*(W+2)
    # w0_ref : (Cout, Cin)     bf16 1x1 conv weight
    # w1_ref : (Cout, 9*Cout)  bf16 3x3 conv weight, tap-major ((kh,kw) outer, cin inner)
    # op_ref : (1, Cout, Lp)   f32  conv1 output on the padded frame
    # buf_ref: (Cout, 2*margin + Lp) f32 VMEM scratch
    x = xp_ref[0].astype(jnp.bfloat16)
    # conv0 (1x1, bias-free): commutes with zero padding.
    y0 = jnp.dot(w0_ref[...], x, preferred_element_type=jnp.float32)      # (Cout, Lp)

    # Stage conv0's output in a margin-padded scratch so each of the 9 conv taps is a
    # plain flat slice (flat offset (kh-1)*Wp + (kw-1)); padded-frame zeros provide the
    # conv boundary condition, margins only feed discarded (non-interior) lanes.
    buf_ref[...] = jnp.zeros(buf_ref.shape, buf_ref.dtype)
    buf_ref[:, margin:margin + Lp] = y0
    taps = jnp.concatenate(
        [buf_ref[:, margin + (kh - 1) * Wp + (kw - 1):
                   margin + (kh - 1) * Wp + (kw - 1) + Lp]
         for kh in range(3) for kw in range(3)],
        axis=0)                                                            # (9*Cout, Lp)

    # conv1 (3x3) as a single 288-deep MXU matmul.
    op_ref[0] = jnp.dot(w1_ref[...], taps.astype(jnp.bfloat16),
                        preferred_element_type=jnp.float32)


def _axial_attn_kernel(xT_ref, bh_ref, bw_ref, oT_ref, *, mp):
    # xT_ref : (1, L, C*H) f32  activation in the transposed raw-view layout (lane-dense)
    # bh_ref : (C*H, 2*mp + C*H) bf16  fused [q | k | gamma*v] kron-expanded 1x1 weights (H-attn)
    # bw_ref : same for the W-attention
    # oT_ref : (1, L, C*H) f32
    def one_attn(xT, b_ref):
        qkv = jnp.dot(xT.astype(jnp.bfloat16), b_ref[...],
                      preferred_element_type=jnp.float32)                  # (L, 2*mp + C*H)
        qT = qkv[:, :mp]            # (L, mp)   zero-padded cols contribute 0 to logits
        kT = qkv[:, mp:2 * mp]      # (L, mp)
        vT = qkv[:, 2 * mp:]        # (L, C*H)  value projection, pre-scaled by gamma
        s = lax.dot_general(qT.astype(jnp.bfloat16), kT.astype(jnp.bfloat16),
                            (((1,), (1,)), ((), ())),
                            preferred_element_type=jnp.float32)            # (L, L)
        s = s - jnp.max(s, axis=-1, keepdims=True)                         # stable softmax (f32)
        p = jnp.exp(s)
        p = p * pl.reciprocal(jnp.sum(p, axis=-1, keepdims=True), approx=True)
        out = jnp.dot(p.astype(jnp.bfloat16), vT.astype(jnp.bfloat16),
                      preferred_element_type=jnp.float32)                  # (L, C*H)
        return out + xT             # gamma already folded into the value weight

    y = one_attn(xT_ref[0], bh_ref)        # self_attn(mode='h')
    oT_ref[0] = one_attn(y, bw_ref)        # self_attn(mode='w')


# ----------------------------- wrappers -----------------------------------

def conv_front(x, w0, w1):
    """Fused conv0 (1x1, no bias) + conv1 (3x3, pad=1, no bias)."""
    B, Cin, H, W = x.shape
    Cout = w0.shape[0]
    Hp, Wp = H + 2, W + 2
    Lp = Hp * Wp
    margin = _round_up(Wp + 1, 128)

    xp = jnp.pad(x, ((0, 0), (0, 0), (1, 1), (1, 1))).reshape(B, Cin, Lp)
    w0b = w0.astype(jnp.bfloat16)
    w1b = jnp.transpose(w1, (0, 2, 3, 1)).reshape(Cout, 9 * Cout).astype(jnp.bfloat16)

    kern = functools.partial(_conv_front_kernel, Wp=Wp, Lp=Lp, margin=margin)
    y1p = pl.pallas_call(
        kern,
        out_shape=jax.ShapeDtypeStruct((B, Cout, Lp), jnp.float32),
        grid=(B,),
        in_specs=[pl.BlockSpec((1, Cin, Lp), lambda b: (b, 0, 0)),
                  pl.BlockSpec((Cout, Cin), lambda b: (0, 0)),
                  pl.BlockSpec((Cout, 9 * Cout), lambda b: (0, 0))],
        out_specs=pl.BlockSpec((1, Cout, Lp), lambda b: (b, 0, 0)),
        scratch_shapes=[pltpu.VMEM((Cout, 2 * margin + Lp), jnp.float32)],
        compiler_params=pltpu.CompilerParams(dimension_semantics=("parallel",)),
    )(xp, w0b, w1b)
    # Crop the padded frame back to the valid (H, W) interior.
    return y1p.reshape(B, Cout, Hp, Wp)[:, :, 1:H + 1, 1:W + 1]


def axial_attention_pair(y1, wq_h, wk_h, wv_h, gamma_h, wq_w, wk_w, wv_w, gamma_w):
    """self_attn(mode='h') followed by self_attn(mode='w'), fused in one pallas_call."""
    B, C, H, W = y1.shape
    if H != W:
        # TODO(synk): generic raw-view relayout for non-square maps (CaraNet is always square).
        raise NotImplementedError("fused axial attention assumes square feature maps (H == W)")
    CH = C * H
    C8 = C // 8
    Mp = _round_up(max(C8 * H, 8), 128)

    eye = jnp.eye(H, dtype=jnp.float32)

    def fused_qkv_weight(wq, wk, wv, gamma):
        # kron(w^T, I_H) applies a 1x1 conv directly in the (W, C*H) layout; gamma is
        # folded into the value block; q/k blocks are zero-padded to Mp lanes so the
        # in-kernel slices are 128-aligned and the extra columns contribute exactly 0.
        bq = jnp.pad(jnp.kron(wq.T, eye), ((0, 0), (0, Mp - C8 * H)))
        bk = jnp.pad(jnp.kron(wk.T, eye), ((0, 0), (0, Mp - C8 * H)))
        bv = gamma * jnp.kron(wv.T, eye)
        return jnp.concatenate([bq, bk, bv], axis=1).astype(jnp.bfloat16)  # (CH, 2*Mp+CH)

    bh = fused_qkv_weight(wq_h, wk_h, wv_h, gamma_h)
    bw = fused_qkv_weight(wq_w, wk_w, wv_w, gamma_w)

    # Transposed raw-view layout: xT[b, w, c*H + h] = y1[b, c, h, w]  (lane-dense, 512 lanes).
    xT = jnp.transpose(y1, (0, 3, 1, 2)).reshape(B, W, CH)

    kern = functools.partial(_axial_attn_kernel, mp=Mp)
    oT = pl.pallas_call(
        kern,
        out_shape=jax.ShapeDtypeStruct((B, W, CH), jnp.float32),
        grid=(B,),
        in_specs=[pl.BlockSpec((1, W, CH), lambda b: (b, 0, 0)),
                  pl.BlockSpec((CH, 2 * Mp + CH), lambda b: (0, 0)),
                  pl.BlockSpec((CH, 2 * Mp + CH), lambda b: (0, 0))],
        out_specs=pl.BlockSpec((1, W, CH), lambda b: (b, 0, 0)),
        compiler_params=pltpu.CompilerParams(dimension_semantics=("parallel",)),
    )(xT, bh, bw)

    # Back to NCHW: out[b, c, h, w] = oT[b, w, c*H + h].
    return jnp.transpose(oT.reshape(B, W, C, H), (0, 2, 3, 1))


@jax.jit
def aa_kernel_forward(x, params):
    y1 = conv_front(x, params['w_conv0'], params['w_conv1'])
    return axial_attention_pair(
        y1,
        params['wq_h'], params['wk_h'], params['wv_h'], params['gamma_h'],
        params['wq_w'], params['wk_w'], params['wv_w'], params['gamma_w'])


# ----------------------------- parameters ----------------------------------

def init_params(key, in_ch, out_ch):
    ks = jax.random.split(key, 8)

    def wconv(k, cout, cin, kh=1, kw=1):
        fan_in = cin * kh * kw
        shape = (cout, cin) if (kh == 1 and kw == 1) else (cout, cin, kh, kw)
        return jax.random.normal(k, shape, jnp.float32) / jnp.sqrt(jnp.float32(fan_in))

    c8 = out_ch // 8
    return dict(
        w_conv0=wconv(ks[0], out_ch, in_ch),            # Conv(in,out,1x1), bias=False
        w_conv1=wconv(ks[1], out_ch, out_ch, 3, 3),     # Conv(out,out,3x3,pad=1), bias=False
        wq_h=wconv(ks[2], c8, out_ch),
        wk_h=wconv(ks[3], c8, out_ch),
        wv_h=wconv(ks[4], out_ch, out_ch),
        wq_w=wconv(ks[5], c8, out_ch),
        wk_w=wconv(ks[6], c8, out_ch),
        wv_w=wconv(ks[7], out_ch, out_ch),
        # Faithful to PyTorch: self_attn.gamma = nn.Parameter(torch.zeros(1)).
        gamma_h=jnp.float32(0.0),
        gamma_w=jnp.float32(0.0),
    )


# ----------------------------- pure-JAX reference --------------------------

def ref_forward(x, p, *, cast=None, precision=lax.Precision.HIGHEST):
    """Reference AA_kernel.  `cast` (e.g. bf16 round-trip) is applied to every matmul
    operand so the kernel's bf16-operand / f32-accumulate numerics can be matched."""
    cast = (lambda a: a) if cast is None else cast
    f32 = jnp.float32

    def c1(t, w):
        return jnp.einsum('oc,bchw->bohw', cast(w), cast(t),
                          precision=precision, preferred_element_type=f32)

    def c3(t, w):
        return lax.conv_general_dilated(
            cast(t), cast(w), (1, 1), ((1, 1), (1, 1)),
            dimension_numbers=('NCHW', 'OIHW', 'NCHW'),
            precision=precision, preferred_element_type=f32)

    def attn(t, wq, wk, wv, gamma, mode):
        B, C, H, W = t.shape
        L = H if mode == 'h' else W
        q = jnp.transpose(c1(t, wq).reshape(B, -1, L), (0, 2, 1))
        k = c1(t, wk).reshape(B, -1, L)
        v = c1(t, wv).reshape(B, -1, L)
        s = jnp.einsum('blm,bmk->blk', cast(q), cast(k),
                       precision=precision, preferred_element_type=f32)
        a = jax.nn.softmax(s, axis=-1)
        o = jnp.einsum('bnj,blj->bnl', cast(v), cast(a),
                       precision=precision, preferred_element_type=f32)
        return gamma * o.reshape(B, C, H, W) + t

    t = c1(x, p['w_conv0'])
    t = c3(t, p['w_conv1'])
    t = attn(t, p['wq_h'], p['wk_h'], p['wv_h'], p['gamma_h'], 'h')
    t = attn(t, p['wq_w'], p['wk_w'], p['wv_w'], p['gamma_w'], 'w')
    return t


# ----------------------------- main -----------------------------------------

if __name__ == "__main__":
    B, Cin, Cout, H, W = 2, 16, 32, 16, 16
    key = jax.random.PRNGKey(0)
    kx, kp = jax.random.split(key)
    x = jax.random.normal(kx, (B, Cin, H, W), jnp.float32)   # NCHW, like the torch module
    params = init_params(kp, Cin, Cout)
    # PyTorch inits gamma to 0 (attention branch disabled); override for the test so the
    # softmax / attention path is actually exercised by the numerical checks.
    params['gamma_h'] = jnp.float32(0.5)
    params['gamma_w'] = jnp.float32(0.5)

    out = jax.block_until_ready(aa_kernel_forward(x, params))
    assert out.shape == (B, Cout, H, W), out.shape
    assert bool(jnp.all(jnp.isfinite(out)))

    # Tight check: reference with the same bf16-operand / f32-accumulate numerics.
    ref_bf16 = ref_forward(x, params, cast=lambda a: a.astype(jnp.bfloat16),
                           precision=lax.Precision.DEFAULT)
    err_bf16 = float(jnp.max(jnp.abs(out - ref_bf16)) / (jnp.max(jnp.abs(ref_bf16)) + 1e-6))
    assert err_bf16 < 1e-2, f"mismatch vs precision-matched reference: rel_err={err_bf16}"

    # Loose sanity bound vs the full-f32 HIGHEST-precision reference (total bf16 error).
    ref_f32 = ref_forward(x, params)
    err_f32 = float(jnp.max(jnp.abs(out - ref_f32)) / (jnp.max(jnp.abs(ref_f32)) + 1e-6))
    assert err_f32 < 1e-1, f"mismatch vs f32 reference: rel_err={err_f32}"

    print("KERNEL_OK")
</pallas_src>

<mosaic_0001>
module attributes {stable_mosaic.version = 11 : i64} {
  func.func @_conv_front_kernel(%arg0: i32, %arg1: memref<1x16x324xf32, #tpu.memory_space<vmem>>, %arg2: memref<32x16xbf16, #tpu.memory_space<vmem>>, %arg3: memref<32x288xbf16, #tpu.memory_space<vmem>>, %arg4: memref<1x32x324xf32, #tpu.memory_space<vmem>>, %arg5: memref<32x580xf32, #tpu.memory_space<vmem>>) attributes {dimension_semantics = [#tpu.dimension_semantics<parallel>], iteration_bounds = array<i64: 2>, scalar_prefetch = 0 : i64, scratch_operands = 1 : i64, tpu.core_type = #tpu.core_type<tc>, window_params = [{transform_indices = @transform_0, window_bounds = array<i64: 1, 16, 324>}, {pipeline_mode = #tpu.pipeline_mode<synchronous>, transform_indices = @transform_1, window_bounds = array<i64: 32, 16>}, {pipeline_mode = #tpu.pipeline_mode<synchronous>, transform_indices = @transform_2, window_bounds = array<i64: 32, 288>}, {transform_indices = @transform_3, window_bounds = array<i64: 1, 32, 324>}]} {
    %c0 = arith.constant 0 : index
    %c0_0 = arith.constant 0 : index
    %c0_1 = arith.constant 0 : index
    %0 = vector.load %arg1[%c0, %c0_0, %c0_1] : memref<1x16x324xf32, #tpu.memory_space<vmem>>, vector<1x16x324xf32>
    %1 = vector.shape_cast %0 : vector<1x16x324xf32> to vector<16x324xf32>
    %2 = arith.truncf %1 : vector<16x324xf32> to vector<16x324xbf16>
    %c0_2 = arith.constant 0 : index
    %c0_3 = arith.constant 0 : index
    %3 = vector.load %arg2[%c0_2, %c0_3] : memref<32x16xbf16, #tpu.memory_space<vmem>>, vector<32x16xbf16>
    %cst = arith.constant dense<0.000000e+00> : vector<32x324xf32>
    %4 = tpu.matmul %3, %2, %cst {dimension_numbers = #tpu.dot_dimension_numbers<[1], [0], [0], [1], [0, 0, 1, 1], [], []>} : vector<32x16xbf16>, vector<16x324xbf16>, vector<32x324xf32> -> vector<32x324xf32>
    %cst_4 = arith.constant 0.000000e+00 : f32
    %5 = vector.broadcast %cst_4 : f32 to vector<32x580xf32>
    %c0_5 = arith.constant 0 : index
    %c0_6 = arith.constant 0 : index
    %6 = vector.load %arg5[%c0_5, %c0_6] : memref<32x580xf32, #tpu.memory_space<vmem>>, vector<32x580xf32>
    tpu.vector_store %arg5[%c0_5, %c0_6], %5 {strides = array<i32>} : memref<32x580xf32, #tpu.memory_space<vmem>>, vector<32x580xf32>,
    %c0_7 = arith.constant 0 : index
    %c128 = arith.constant 128 : index
    %7 = vector.load %arg5[%c0_7, %c128] : memref<32x580xf32, #tpu.memory_space<vmem>>, vector<32x324xf32>
    tpu.vector_store %arg5[%c0_7, %c128], %4 {strides = array<i32>} : memref<32x580xf32, #tpu.memory_space<vmem>>, vector<32x324xf32>,
    %c0_8 = arith.constant 0 : index
    %c109 = arith.constant 109 : index
    %8 = vector.load %arg5[%c0_8, %c109] : memref<32x580xf32, #tpu.memory_space<vmem>>, vector<32x324xf32>
    %c0_9 = arith.constant 0 : index
    %c110 = arith.constant 110 : index
    %9 = vector.load %arg5[%c0_9, %c110] : memref<32x580xf32, #tpu.memory_space<vmem>>, vector<32x324xf32>
    %c0_10 = arith.constant 0 : index
    %c111 = arith.constant 111 : index
    %10 = vector.load %arg5[%c0_10, %c111] : memref<32x580xf32, #tpu.memory_space<vmem>>, vector<32x324xf32>
    %c0_11 = arith.constant 0 : index
    %c127 = arith.constant 127 : index
    %11 = vector.load %arg5[%c0_11, %c127] : memref<32x580xf32, #tpu.memory_space<vmem>>, vector<32x324xf32>
    %c0_12 = arith.constant 0 : index
    %c128_13 = arith.constant 128 : index
    %12 = vector.load %arg5[%c0_12, %c128_13] : memref<32x580xf32, #tpu.memory_space<vmem>>, vector<32x324xf32>
    %c0_14 = arith.constant 0 : index
    %c129 = arith.constant 129 : index
    %13 = vector.load %arg5[%c0_14, %c129] : memref<32x580xf32, #tpu.memory_space<vmem>>, vector<32x324xf32>
    %c0_15 = arith.constant 0 : index
    %c145 = arith.constant 145 : index
    %14 = vector.load %arg5[%c0_15, %c145] : memref<32x580xf32, #tpu.memory_space<vmem>>, vector<32x324xf32>
    %c0_16 = arith.constant 0 : index
    %c146 = arith.constant 146 : index
    %15 = vector.load %arg5[%c0_16, %c146] : memref<32x580xf32, #tpu.memory_space<vmem>>, vector<32x324xf32>
    %c0_17 = arith.constant 0 : index
    %c147 = arith.constant 147 : index
    %16 = vector.load %arg5[%c0_17, %c147] : memref<32x580xf32, #tpu.memory_space<vmem>>, vector<32x324xf32>
    %17 = tpu.concatenate %8, %9, %10, %11, %12, %13, %14, %15, %16 in 0 : vector<32x324xf32>, vector<32x324xf32>, vector<32x324xf32>, vector<32x324xf32>, vector<32x324xf32>, vector<32x324xf32>, vector<32x324xf32>, vector<32x324xf32>, vector<32x324xf32> -> vector<288x324xf32>
    %c0_18 = arith.constant 0 : index
    %c0_19 = arith.constant 0 : index
    %18 = vector.load %arg3[%c0_18, %c0_19] : memref<32x288xbf16, #tpu.memory_space<vmem>>, vector<32x288xbf16>
    %19 = arith.truncf %17 : vector<288x324xf32> to vector<288x324xbf16>
    %cst_20 = arith.constant dense<0.000000e+00> : vector<32x324xf32>
    %20 = tpu.matmul %18, %19, %cst_20 {dimension_numbers = #tpu.dot_dimension_numbers<[1], [0], [0], [1], [0, 0, 1, 1], [], []>} : vector<32x288xbf16>, vector<288x324xbf16>, vector<32x324xf32> -> vector<32x324xf32>
    %c0_21 = arith.constant 0 : index
    %c0_22 = arith.constant 0 : index
    %c0_23 = arith.constant 0 : index
    %21 = vector.load %arg4[%c0_21, %c0_22, %c0_23] : memref<1x32x324xf32, #tpu.memory_space<vmem>>, vector<1x32x324xf32>
    %22 = vector.shape_cast %21 : vector<1x32x324xf32> to vector<32x324xf32>
    %23 = vector.shape_cast %20 : vector<32x324xf32> to vector<1x32x324xf32>
    tpu.vector_store %arg4[%c0_21, %c0_22, %c0_23], %23 {strides = array<i32>} : memref<1x32x324xf32, #tpu.memory_space<vmem>>, vector<1x32x324xf32>,
    return
  }
  func.func @transform_0(%arg0: i32) -> (i32, i32, i32) {
    %c0_i32 = arith.constant 0 : i32
    %c0_i32_0 = arith.constant 0 : i32
    %c0_i32_1 = arith.constant 0 : i32
    return %arg0, %c0_i32, %c0_i32_0 : i32, i32, i32
  }
  func.func @transform_1(%arg0: i32) -> (i32, i32) {
    %c0_i32 = arith.constant 0 : i32
    %c0_i32_0 = arith.constant 0 : i32
    %c0_i32_1 = arith.constant 0 : i32
    return %c0_i32, %c0_i32_0 : i32, i32
  }
  func.func @transform_2(%arg0: i32) -> (i32, i32) {
    %c0_i32 = arith.constant 0 : i32
    %c0_i32_0 = arith.constant 0 : i32
    %c0_i32_1 = arith.constant 0 : i32
    return %c0_i32, %c0_i32_0 : i32, i32
  }
  func.func @transform_3(%arg0: i32) -> (i32, i32, i32) {
    %c0_i32 = arith.constant 0 : i32
    %c0_i32_0 = arith.constant 0 : i32
    %c0_i32_1 = arith.constant 0 : i32
    return %arg0, %c0_i32, %c0_i32_0 : i32, i32, i32
  }
}

module attributes {stable_mosaic.version = 11 : i64} {
  func.func @_axial_attn_kernel(%arg0: i32, %arg1: memref<1x16x512xf32, #tpu.memory_space<vmem>>, %arg2: memref<512x768xbf16, #tpu.memory_space<vmem>>, %arg3: memref<512x768xbf16, #tpu.memory_space<vmem>>, %arg4: memref<1x16x512xf32, #tpu.memory_space<vmem>>) attributes {dimension_semantics = [#tpu.dimension_semantics<parallel>], iteration_bounds = array<i64: 2>, scalar_prefetch = 0 : i64, scratch_operands = 0 : i64, tpu.core_type = #tpu.core_type<tc>, window_params = [{transform_indices = @transform_0, window_bounds = array<i64: 1, 16, 512>}, {pipeline_mode = #tpu.pipeline_mode<synchronous>, transform_indices = @transform_1, window_bounds = array<i64: 512, 768>}, {pipeline_mode = #tpu.pipeline_mode<synchronous>, transform_indices = @transform_2, window_bounds = array<i64: 512, 768>}, {transform_indices = @transform_3, window_bounds = array<i64: 1, 16, 512>}]} {
    %c0 = arith.constant 0 : index
    %c0_0 = arith.constant 0 : index
    %c0_1 = arith.constant 0 : index
    %0 = vector.load %arg1[%c0, %c0_0, %c0_1] : memref<1x16x512xf32, #tpu.memory_space<vmem>>, vector<1x16x512xf32>
    %1 = vector.shape_cast %0 : vector<1x16x512xf32> to vector<16x512xf32>
    %2 = arith.truncf %1 : vector<16x512xf32> to vector<16x512xbf16>
    %c0_2 = arith.constant 0 : index
    %c0_3 = arith.constant 0 : index
    %3 = vector.load %arg2[%c0_2, %c0_3] : memref<512x768xbf16, #tpu.memory_space<vmem>>, vector<512x768xbf16>
    %cst = arith.constant dense<0.000000e+00> : vector<16x768xf32>
    %4 = tpu.matmul %2, %3, %cst {dimension_numbers = #tpu.dot_dimension_numbers<[1], [0], [0], [1], [0, 0, 1, 1], [], []>} : vector<16x512xbf16>, vector<512x768xbf16>, vector<16x768xf32> -> vector<16x768xf32>
    %5 = vector.extract_strided_slice %4 {offsets = [0, 0], sizes = [16, 128], strides = [1, 1]} : vector<16x768xf32> to vector<16x128xf32>
    %6 = vector.extract_strided_slice %4 {offsets = [0, 128], sizes = [16, 128], strides = [1, 1]} : vector<16x768xf32> to vector<16x128xf32>
    %7 = vector.extract_strided_slice %4 {offsets = [0, 256], sizes = [16, 512], strides = [1, 1]} : vector<16x768xf32> to vector<16x512xf32>
    %8 = arith.truncf %5 : vector<16x128xf32> to vector<16x128xbf16>
    %9 = arith.truncf %6 : vector<16x128xf32> to vector<16x128xbf16>
    %cst_4 = arith.constant dense<0.000000e+00> : vector<16x16xf32>
    %10 = tpu.matmul %8, %9, %cst_4 {dimension_numbers = #tpu.dot_dimension_numbers<[1], [1], [0], [0], [0, 0, 1, 0], [], []>} : vector<16x128xbf16>, vector<16x128xbf16>, vector<16x16xf32> -> vector<16x16xf32>
    %cst_5 = arith.constant dense<0xFF800000> : vector<16xf32>
    %11 = vector.multi_reduction <maximumf>, %10, %cst_5 [1] : vector<16x16xf32> to vector<16xf32>
    %12 = vector.shape_cast %11 : vector<16xf32> to vector<16x1xf32>
    %13 = vector.broadcast %12 : vector<16x1xf32> to vector<16x16xf32>
    %14 = arith.subf %10, %13 : vector<16x16xf32>
    %15 = math.exp %14 : vector<16x16xf32>
    %cst_6 = arith.constant dense<0.000000e+00> : vector<16xf32>
    %16 = vector.multi_reduction <add>, %15, %cst_6 [1] : vector<16x16xf32> to vector<16xf32>
    %17 = vector.shape_cast %16 : vector<16xf32> to vector<16x1xf32>
    %18 = tpu.reciprocal %17 {approx = true} : vector<16x1xf32> -> vector<16x1xf32>
    %19 = vector.broadcast %18 : vector<16x1xf32> to vector<16x16xf32>
    %20 = arith.mulf %15, %19 : vector<16x16xf32>
    %21 = arith.truncf %20 : vector<16x16xf32> to vector<16x16xbf16>
    %22 = arith.truncf %7 : vector<16x512xf32> to vector<16x512xbf16>
    %cst_7 = arith.constant dense<0.000000e+00> : vector<16x512xf32>
    %23 = tpu.matmul %21, %22, %cst_7 {dimension_numbers = #tpu.dot_dimension_numbers<[1], [0], [0], [1], [0, 0, 1, 1], [], []>} : vector<16x16xbf16>, vector<16x512xbf16>, vector<16x512xf32> -> vector<16x512xf32>
    %24 = arith.addf %23, %1 : vector<16x512xf32>
    %25 = arith.truncf %24 : vector<16x512xf32> to vector<16x512xbf16>
    %c0_8 = arith.constant 0 : index
    %c0_9 = arith.constant 0 : index
    %26 = vector.load %arg3[%c0_8, %c0_9] : memref<512x768xbf16, #tpu.memory_space<vmem>>, vector<512x768xbf16>
    %cst_10 = arith.constant dense<0.000000e+00> : vector<16x768xf32>
    %27 = tpu.matmul %25, %26, %cst_10 {dimension_numbers = #tpu.dot_dimension_numbers<[1], [0], [0], [1], [0, 0, 1, 1], [], []>} : vector<16x512xbf16>, vector<512x768xbf16>, vector<16x768xf32> -> vector<16x768xf32>
    %28 = vector.extract_strided_slice %27 {offsets = [0, 0], sizes = [16, 128], strides = [1, 1]} : vector<16x768xf32> to vector<16x128xf32>
    %29 = vector.extract_strided_slice %27 {offsets = [0, 128], sizes = [16, 128], strides = [1, 1]} : vector<16x768xf32> to vector<16x128xf32>
    %30 = vector.extract_strided_slice %27 {offsets = [0, 256], sizes = [16, 512], strides = [1, 1]} : vector<16x768xf32> to vector<16x512xf32>
    %31 = arith.truncf %28 : vector<16x128xf32> to vector<16x128xbf16>
    %32 = arith.truncf %29 : vector<16x128xf32> to vector<16x128xbf16>
    %cst_11 = arith.constant dense<0.000000e+00> : vector<16x16xf32>
    %33 = tpu.matmul %31, %32, %cst_11 {dimension_numbers = #tpu.dot_dimension_numbers<[1], [1], [0], [0], [0, 0, 1, 0], [], []>} : vector<16x128xbf16>, vector<16x128xbf16>, vector<16x16xf32> -> vector<16x16xf32>
    %cst_12 = arith.constant dense<0xFF800000> : vector<16xf32>
    %34 = vector.multi_reduction <maximumf>, %33, %cst_12 [1] : vector<16x16xf32> to vector<16xf32>
    %35 = vector.shape_cast %34 : vector<16xf32> to vector<16x1xf32>
    %36 = vector.broadcast %35 : vector<16x1xf32> to vector<16x16xf32>
    %37 = arith.subf %33, %36 : vector<16x16xf32>
    %38 = math.exp %37 : vector<16x16xf32>
    %cst_13 = arith.constant dense<0.000000e+00> : vector<16xf32>
    %39 = vector.multi_reduction <add>, %38, %cst_13 [1] : vector<16x16xf32> to vector<16xf32>
    %40 = vector.shape_cast %39 : vector<16xf32> to vector<16x1xf32>
    %41 = tpu.reciprocal %40 {approx = true} : vector<16x1xf32> -> vector<16x1xf32>
    %42 = vector.broadcast %41 : vector<16x1xf32> to vector<16x16xf32>
    %43 = arith.mulf %38, %42 : vector<16x16xf32>
    %44 = arith.truncf %43 : vector<16x16xf32> to vector<16x16xbf16>
    %45 = arith.truncf %30 : vector<16x512xf32> to vector<16x512xbf16>
    %cst_14 = arith.constant dense<0.000000e+00> : vector<16x512xf32>
    %46 = tpu.matmul %44, %45, %cst_14 {dimension_numbers = #tpu.dot_dimension_numbers<[1], [0], [0], [1], [0, 0, 1, 1], [], []>} : vector<16x16xbf16>, vector<16x512xbf16>, vector<16x512xf32> -> vector<16x512xf32>
    %47 = arith.addf %46, %24 : vector<16x512xf32>
    %c0_15 = arith.constant 0 : index
    %c0_16 = arith.constant 0 : index
    %c0_17 = arith.constant 0 : index
    %48 = vector.load %arg4[%c0_15, %c0_16, %c0_17] : memref<1x16x512xf32, #tpu.memory_space<vmem>>, vector<1x16x512xf32>
    %49 = vector.shape_cast %48 : vector<1x16x512xf32> to vector<16x512xf32>
    %50 = vector.shape_cast %47 : vector<16x512xf32> to vector<1x16x512xf32>
    tpu.vector_store %arg4[%c0_15, %c0_16, %c0_17], %50 {strides = array<i32>} : memref<1x16x512xf32, #tpu.memory_space<vmem>>, vector<1x16x512xf32>,
    return
  }
  func.func @transform_0(%arg0: i32) -> (i32, i32, i32) {
    %c0_i32 = arith.constant 0 : i32
    %c0_i32_0 = arith.constant 0 : i32
    %c0_i32_1 = arith.constant 0 : i32
    return %arg0, %c0_i32, %c0_i32_0 : i32, i32, i32
  }
  func.func @transform_1(%arg0: i32) -> (i32, i32) {
    %c0_i32 = arith.constant 0 : i32
    %c0_i32_0 = arith.constant 0 : i32
    %c0_i32_1 = arith.constant 0 : i32
    return %c0_i32, %c0_i32_0 : i32, i32
  }
  func.func @transform_2(%arg0: i32) -> (i32, i32) {
    %c0_i32 = arith.constant 0 : i32
    %c0_i32_0 = arith.constant 0 : i32
    %c0_i32_1 = arith.constant 0 : i32
    return %c0_i32, %c0_i32_0 : i32, i32
  }
  func.func @transform_3(%arg0: i32) -> (i32, i32, i32) {
    %c0_i32 = arith.constant 0 : i32
    %c0_i32_0 = arith.constant 0 : i32
    %c0_i32_1 = arith.constant 0 : i32
    return %arg0, %c0_i32, %c0_i32_0 : i32, i32, i32
  }
}

</mosaic_0001>

<bundles_post_ra>
// kernel: aa_kernel_forward.2
= control target key start
LH: loop header
LB: loop body
LE: loop exit
PB: predicated region body
PF: predicated region fallthrough
CT: control target
= control target key end

     0   :  { %s1925_s12 = smov 0   ;;  %s2959_s0 = inlined_call_operand.vmem [shape: f32[2,16,324], index: 0, kind: input, shape index: {}]   ;;  %s2960_s1 = inlined_call_operand.vmem [shape: bf16[32,16], index: 1, kind: input, shape index: {}]   ;;  %s2961_s2 = inlined_call_operand.vmem [shape: bf16[32,288], index: 2, kind: input, shape index: {}]   ;;  %s2962_s3 = inlined_call_operand.vmem [shape: f32[2,32,324], index: 3, kind: output, shape index: {}]  }
   0x1 LB: > { %s1510_s13 = sadd.s32 4294967295, %s1891_s12   ;;  %p1514_p0 = scmp.ge.s32.totalorder %s1891_s12, 1  ;;  %s1891_s12 = sphi %s1925_s12, %s13_s12  }
   0x2   : > { %p137_p1 = scmp.lt.s32.totalorder %s1891_s12, 3 }
   0x4   : > { %p138_p2 = pnand %p1514_p0, %p137_p1 }
   0x6   : > { %141 = sbr.rel (%p138_p2) target bundleno = 881 (0x371), region = 32 }
   0xb   : > { %p161_p3 = scmp.lt.s32.totalorder %s1510_s13, 1  ;;  %v2963_v0 = vmov 0   ;;  %v1875_v1 = vld [vmem:[%s2960_s1] sm:$0xff]   ;;  %vm195_vm0 = vcmask 130048   ;;  %v1894_v2 = vmov 0.0   ;;  %s1895_s17 = smov 110  }
   0xc   : > { %234 = vmatprep.mubr.bf16.mxu0 %v2963_v0  ;;  %1572 = vmatprep.mubr.msk.bf16.mxu1 %vm195_vm0, %v1875_v1  ;;  %307 = vst [vmem:[#allocation2 + $0x18] sm:$0xff] %v1894_v2  ;;  %313 = vst [vmem:[#allocation2 + $0x40] sm:$0xff] %v1894_v2  ;;  %v1876_v12 = vld [vmem:[%s2960_s1 + $0x8] sm:$0xff]   ;;  %s1896_s23 = smov 127   ;;  %s1897_s24 = smov 126   ;;  %v1898_v13 = vmov 0.0|0.0  }
   0xd   : > { %s3127_s13 = smov (!%p161_p3, %s1510_s13), 1  ;;  %318 = vst [vmem:[#allocation2 + $0x68] sm:$0xff] %v1894_v2  ;;  %323 = vst [vmem:[#allocation2 + $0x90] sm:$0xff] %v1894_v2  ;;  %1606 = vrot.lane.b32.xlu1 %v1894_v2, %s1895_s17  ;;  %1626 = vrot.lane.b32.xlu0 %v1894_v2, %s1896_s23  ;;  %s1899_s25 = smov 19   ;;  %vm308_vm1 = vcmask 556032   ;;  %vm401_vm2 = vcmask 1039360  }
   0xe   : > { %s1584_s16 = smul.u32 48, %s3127_s13  ;;  %s1900_s26 = smov 90   ;;  %vm523_vm3 = vcmask 900096   ;;  %vm462_vm4 = vcmask 1031168   ;;  %vm772_vm5 = vcmask 736256   ;;  %vm674_vm6 = vcmask 752640  }
   0xf   : > { %s1901_s27 = smov 92   ;;  %s1902_s28 = smov 91   ;;  %vm576_vm7 = vcmask 891904   ;;  %vm723_vm8 = vcmask 744448   ;;  %vm625_vm9 = vcmask 883712   ;;  %vm1123_vm10 = vcmask 154624  }
  0x10   : > { %s165_s20 = scalar_lea.vmem %s2959_s0, %s1584_s16  ;;  %s1903_s29 = smov 108   ;;  %vm1232_vm11 = vcmask 261120  }
  0x11   : > { %v173_v3 = vld [vmem:[%s165_s20 + $0x8] sm:$0xff]  ;;  %v176_v4 = vld [vmem:[%s165_s20 + $0x20] sm:$0xff]  ;;  %v174_v5 = vld [vmem:[%s165_s20 + $0x10] sm:$0xff]  ;;  %1611 = vrot.lane.b32.xlu1 %v1894_v2, %s1895_s17  ;;  %s1904_s30 = smov 109   ;;  %s1585_s18 = smul.u32 96, %s3127_s13 }
  0x12   : > { %v179_v6 = vpack.c.bf16 %v176_v4, %v173_v3  ;;  %v177_v7 = vld [vmem:[%s165_s20 + $0x28] sm:$0xff]  ;;  %v172_v8 = vld [vmem:[%s165_s20] sm:$0xff]  ;;  %v175_v9 = vld [vmem:[%s165_s20 + $0x18] sm:$0xff]  ;;  %987 = vrot.lane.b32.xlu0 %v1898_v13, %s1899_s25 }
  0x13   : > { %v180_v10 = vpack.c.bf16 %v177_v7, %v174_v5  ;;  %v178_v11 = vpack.c.bf16 %v175_v9, %v172_v8  ;;  %s2938_s21 = scalar_lea.vmem %s2962_s3, %s1585_s18 }
  0x14   : > { %216 = vmatprep.subr.bf16.mxu0 %v179_v6 }
  0x15   : > { %1570 = vmatprep.subr.bf16.mxu1 %v180_v10  ;;  %217 = vmatpush1.bf16.msra.mxu0 %v178_v11 }
  0x16   : > { %1571 = vmatpush3.bf16.msra.mxu1 %v180_v10  ;;  %1616 = vrot.lane.b32.xlu1 %v1894_v2, %s1897_s24 }
  0x17   : > { %979 = vrot.lane.b32.xlu0 %v1898_v13, %s1899_s25 }
  0x18   : > { %1519 = vmatmul.mubr.msk.bf16.vlgmr.msra.gmra.mxu0 %vm195_vm0, %v1875_v1 }
  0x19   : > { %1573 = vmatmul.mubr.msk.bf16.vlgmr.msra.gmra.mxu1 %vm195_vm0, %v1876_v12  ;;  %244 = vmatprep.mubr.bf16.mxu0 %v2963_v0 }
  0x1a   : > { %1324 = vmatprep.mubr.bf16.mxu1 %v2963_v0  ;;  %1621 = vrot.lane.b32.xlu1 %v1894_v2, %s1897_s24 }
  0x1e   : > { %1631 = vrot.lane.b32.xlu1 %v1894_v2, %s1896_s23 }
  0x20   : > { %1520 = vmatmul.mubr.msk.bf16.gmra.mxu0 %vm195_vm0, %v1876_v12 }
  0x7f   : > { %v2048_v45 = vpop.permute.xlu1 %1606  ;;  %v2059_v48 = vpop.permute.xlu0 %1626 }
  0x83   : > { %v2055_v47 = vpop.permute.xlu1 %1611 }
  0x84   : > { %v2065_v50 = vpop.permute.xlu0 %987 }
  0x85   : > { %3024 = vst [vmem:[#allocation7_spill] sm:$0xff] %v2065_v50 }
  0x88   : > { %v2063_v49 = vpop.permute.xlu1 %1616 }
  0x89   : > { %v2074_v52 = vpop.permute.xlu0 %979 }
  0x8a   : > { %3025 = vst [vmem:[#allocation8_spill] sm:$0xff] %v2074_v52 }
  0x8c   : > { %v2068_v51 = vpop.permute.xlu1 %1621 }
  0x90   : > { %v1632_v53 = vpop.permute.xlu1 %1631 }
  0x91   : > { %v1633_v61 = vunpack.i.l.bf16 %v1632_v53  ;;  %v1634_v1 = vunpack.i.h.bf16 %v1632_v53 }
  0xd8   : > { %v236_v14 = vpop.f32.mrf.mxu0 }
  0xd9   : > { %v1574_v15 = vpop.f32.mrf.mxu1 }
  0xda   : > { %333 = vst.msk [vmem:[#allocation2 + $0x68] sm:$0xff] %vm308_vm1, %v1574_v15  ;;  %v238_v16 = vpop.f32.mrf.mxu0 }
  0xdb   : > { %v289_v17 = vpop.f32.mrf.mxu1  ;;  %v1645_v18 = vpack.i.bf16 %v238_v16, %v236_v14 }
  0xdc   : > { %327 = vst.msk [vmem:[#allocation2 + $0x18] sm:$0xff] %vm308_vm1, %v289_v17  ;;  %v240_v19 = vpop.f32.mrf.mxu0 }
  0xdd   : > { %v1575_v20 = vpop.f32.mrf.mxu1  ;;  %1646 = vrot.lane.b32.xlu1 %v1645_v18, %s1896_s23  ;;  %1636 = vrot.lane.b32.xlu0 %v1645_v18, %s1895_s17  ;;  %v1695_v38 = vpack.i.bf16 %v240_v19, %v236_v14  ;;  %v806_v39 = vpack.c.bf16 %v240_v19, %v236_v14 }
  0xde   : > { %336 = vst.msk [vmem:[#allocation2 + $0x90] sm:$0xff] %vm308_vm1, %v1575_v20  ;;  %v242_v21 = vpop.f32.mrf.mxu0 }
  0xdf   : > { %v292_v22 = vpop.f32.mrf.mxu1  ;;  %v807_v41 = vpack.c.bf16 %v242_v21, %v238_v16 }
  0xe0   : > { %330 = vst.msk [vmem:[#allocation2 + $0x40] sm:$0xff] %vm308_vm1, %v292_v22  ;;  %v1966_v23 = vpop.f32.mrf.mxu0 }
  0xe1   : > { %1641 = vrot.lane.b32.xlu0 %v1645_v18, %s1897_s24  ;;  %v1973_v26 = vld [vmem:[#allocation2 + $0x68] sm:$0xff] }
  0xe2   : > { %v1969_v24 = vpop.f32.mrf.mxu0  ;;  %3021 = vst [vmem:[#allocation4_spill] sm:$0xff] %v1973_v26 }
  0xe3   : > { %v1971_v25 = vld [vmem:[#allocation2 + $0x18] sm:$0xff]  ;;  %v1755_v40 = vpack.i.bf16 %v1969_v24, %v1966_v23  ;;  %v1775_v42 = vpack.i.bf16 %v1973_v26, %v1969_v24 }
  0xe4   : > { %3020 = vst [vmem:[#allocation3_spill] sm:$0xff] %v1971_v25  ;;  %v1975_v27 = vpop.f32.mrf.mxu0  ;;  %v1660_v28 = vpack.i.bf16 %v1971_v25, %v238_v16  ;;  %v1685_v36 = vpack.i.bf16 %v240_v19, %v1971_v25 }
  0xe5   : > { %1651 = vrot.lane.b32.xlu0 %v1645_v18, %s1900_s26  ;;  %v1979_v29 = vld [vmem:[#allocation2 + $0x90] sm:$0xff]  ;;  %v1983_v30 = vpack.i.bf16 %v1975_v27, %v1966_v23  ;;  %v810_v31 = vpack.c.bf16 %v1975_v27, %v1966_v23  ;;  %v1800_v43 = vpack.i.bf16 %v1975_v27, %v1973_v26 }
  0xe6   : > { %3022 = vst [vmem:[#allocation5_spill] sm:$0xff] %v1979_v29  ;;  %v1987_v32 = vpop.f32.mrf.mxu0  ;;  %1661 = vrot.lane.b32.xlu1 %v1660_v28, %s1901_s27 }
  0xe7   : > { %v1992_v34 = vld [vmem:[#allocation2 + $0x40] sm:$0xff]  ;;  %v1835_v44 = vpack.i.bf16 %v1979_v29, %v1987_v32  ;;  %v811_v46 = vpack.c.bf16 %v1987_v32, %v1969_v24 }
  0xe8   : > { %3023 = vst [vmem:[#allocation6_spill] sm:$0xff] %v1992_v34  ;;  %v1715_v37 = vpack.i.bf16 %v1992_v34, %v242_v21 }
  0xe9   : > { %1656 = vrot.lane.b32.xlu0 %v1660_v28, %s1902_s28 }
  0xea   : > { %1666 = vrot.lane.b32.xlu1 %v1660_v28, %s1903_s29 }
  0xed   : > { %1686 = vrot.lane.b32.xlu0 %v1685_v36, %s1896_s23 }
  0xee   : > { %1671 = vrot.lane.b32.xlu1 %v1660_v28, %s1904_s30 }
  0xf1   : > { %1716 = vrot.lane.b32.xlu0 %v1715_v37, %s1895_s17 }
  0xf2   : > { %1676 = vrot.lane.b32.xlu1 %v1685_v36, %s1895_s17 }
  0xf5   : > { %1721 = vrot.lane.b32.xlu0 %v1715_v37, %s1897_s24 }
  0xf6   : > { %1681 = vrot.lane.b32.xlu1 %v1685_v36, %s1897_s24 }
  0xf9   : > { %1731 = vrot.lane.b32.xlu0 %v1715_v37, %s1900_s26 }
  0xfa   : > { %1691 = vrot.lane.b32.xlu1 %v1685_v36, %s1900_s26 }
  0xfd   : > { %1741 = vrot.lane.b32.xlu0 %v1715_v37, %s1901_s27 }
  0xfe   : > { %1696 = vrot.lane.b32.xlu1 %v1695_v38, %s1902_s28 }
 0x101   : > { %1746 = vrot.lane.b32.xlu0 %v1715_v37, %s1903_s29 }
 0x102   : > { %1701 = vrot.lane.b32.xlu1 %v1695_v38, %s1901_s27 }
 0x105   : > { %1751 = vrot.lane.b32.xlu0 %v1715_v37, %s1904_s30 }
 0x106   : > { %1706 = vrot.lane.b32.xlu1 %v1695_v38, %s1903_s29 }
 0x109   : > { %981 = vrot.lane.b32.xlu0 %v806_v39, %s1899_s25 }
 0x10a   : > { %1711 = vrot.lane.b32.xlu1 %v1695_v38, %s1904_s30 }
 0x10d   : > { %1756 = vrot.lane.b32.xlu0 %v1755_v40, %s1895_s17 }
 0x10e   : > { %1726 = vrot.lane.b32.xlu1 %v1715_v37, %s1896_s23 }
 0x111   : > { %1761 = vrot.lane.b32.xlu0 %v1755_v40, %s1897_s24 }
 0x112   : > { %1736 = vrot.lane.b32.xlu1 %v1715_v37, %s1902_s28 }
 0x115   : > { %1766 = vrot.lane.b32.xlu0 %v1755_v40, %s1896_s23 }
 0x116   : > { %983 = vrot.lane.b32.xlu1 %v807_v41, %s1899_s25 }
 0x119   : > { %1776 = vrot.lane.b32.xlu0 %v1775_v42, %s1902_s28 }
 0x11a   : > { %1771 = vrot.lane.b32.xlu1 %v1755_v40, %s1900_s26 }
 0x11d   : > { %1781 = vrot.lane.b32.xlu0 %v1775_v42, %s1901_s27 }
 0x11e   : > { %1801 = vrot.lane.b32.xlu1 %v1800_v43, %s1897_s24 }
 0x121   : > { %1786 = vrot.lane.b32.xlu0 %v1775_v42, %s1903_s29 }
 0x122   : > { %1806 = vrot.lane.b32.xlu1 %v1800_v43, %s1896_s23 }
 0x125   : > { %1791 = vrot.lane.b32.xlu0 %v1775_v42, %s1904_s30 }
 0x126   : > { %1836 = vrot.lane.b32.xlu1 %v1835_v44, %s1895_s17 }
 0x129   : > { %1796 = vrot.lane.b32.xlu0 %v1800_v43, %s1895_s17 }
 0x12a   : > { %1851 = vrot.lane.b32.xlu1 %v1835_v44, %s1900_s26 }
 0x12d   : > { %1811 = vrot.lane.b32.xlu0 %v1800_v43, %s1900_s26 }
 0x12e   : > { %1856 = vrot.lane.b32.xlu1 %v1835_v44, %s1902_s28 }
 0x131   : > { %1816 = vrot.lane.b32.xlu0 %v1983_v30, %s1902_s28 }
 0x132   : > { %1861 = vrot.lane.b32.xlu1 %v1835_v44, %s1901_s27 }
 0x135   : > { %1821 = vrot.lane.b32.xlu0 %v1983_v30, %s1901_s27 }
 0x136   : > { %1866 = vrot.lane.b32.xlu1 %v1835_v44, %s1903_s29 }
 0x139   : > { %1826 = vrot.lane.b32.xlu0 %v1983_v30, %s1903_s29 }
 0x13a   : > { %1871 = vrot.lane.b32.xlu1 %v1835_v44, %s1904_s30 }
 0x13d   : > { %1831 = vrot.lane.b32.xlu0 %v1983_v30, %s1904_s30 }
 0x13e   : > { %991 = vrot.lane.b32.xlu1 %v811_v46, %s1899_s25 }
 0x141   : > { %1841 = vrot.lane.b32.xlu0 %v1835_v44, %s1897_s24 }
 0x145   : > { %1846 = vrot.lane.b32.xlu0 %v1835_v44, %s1896_s23 }
 0x149   : > { %989 = vrot.lane.b32.xlu0 %v810_v31, %s1899_s25 }
 0x14f   : > { %v2076_v54 = vpop.permute.xlu0 %1636  ;;  %v2080_v56 = vpop.permute.xlu1 %1646 }
 0x150   : > { %v1648_v62 = vunpack.i.l.bf16 %v2080_v56  ;;  %v1639_v8 = vunpack.i.h.bf16 %v2076_v54  ;;  %v2968_v9 = vunpack.i.l.bf16 %v2076_v54 }
 0x152   : > { %v402_v4 = vsel %vm401_vm2, %v1633_v61, %v1648_v62  ;;  %v2127_v22 = vsel %vm523_vm3, %v2968_v9, %v1639_v8 }
 0x153   : > { %v2078_v55 = vpop.permute.xlu0 %1641 }
 0x154   : > { %v1644_v15 = vunpack.i.h.bf16 %v2078_v55  ;;  %v2966_v16 = vunpack.i.l.bf16 %v2078_v55 }
 0x156   : > { %v2138_v30 = vsel %vm462_vm4, %v2966_v16, %v1644_v15 }
 0x157   : > { %v2082_v57 = vpop.permute.xlu0 %1651 }
 0x158   : > { %v2084_v58 = vpop.permute.xlu1 %1661  ;;  %v1654_v27 = vunpack.i.h.bf16 %v2082_v57  ;;  %v1653_v36 = vunpack.i.l.bf16 %v2082_v57 }
 0x159   : > { %3026 = vst [vmem:[#allocation9_spill] sm:$0xff] %v2084_v58  ;;  %v1664_v32 = vunpack.i.h.bf16 %v2084_v58  ;;  %v2964_v40 = vunpack.i.l.bf16 %v2084_v58 }
 0x15a   : > { %v773_v9 = vsel %vm772_vm5, %v1653_v36, %v1654_v27 }
 0x15b   : > { %v2086_v59 = vpop.permute.xlu0 %1656 }
 0x15c   : > { %v2088_v60 = vpop.permute.xlu1 %1666 }
 0x15f   : > { %v2091_v63 = vpop.permute.xlu0 %1686 }
 0x160   : > { %v2093_v2 = vpop.permute.xlu1 %1671  ;;  %v1689_v3 = vunpack.i.h.bf16 %v2091_v63 }
 0x161   : > { %v2970_v24 = vunpack.i.l.bf16 %v2093_v2 }
 0x162   : > { %v405_v5 = vsel %vm401_vm2, %v1634_v1, %v1689_v3 }
 0x163   : > { %v2102_v6 = vpop.permute.xlu0 %1716  ;;  %v813_v7 = vpack.c.bf16 %v405_v5, %v402_v4 }
 0x164   : > { %v2106_v10 = vpop.permute.xlu1 %1676  ;;  %v1719_v11 = vunpack.i.h.bf16 %v2102_v6  ;;  %v1718_v12 = vunpack.i.l.bf16 %v2102_v6 }
 0x165   : > { %v2969_v13 = vunpack.i.h.bf16 %v2106_v10  ;;  %v1678_v14 = vunpack.i.l.bf16 %v2106_v10  ;;  %995 = vrot.lane.b32.xlu0 %v813_v7, %s1899_s25 }
 0x167   : > { %v1722_v17 = vpop.permute.xlu0 %1721  ;;  %v2115_v18 = vpack.c.bf16 %v1719_v11, %v1678_v14  ;;  %v2120_v19 = vsel %vm523_vm3, %v2969_v13, %v1718_v12 }
 0x168   : > { %v2122_v20 = vpop.permute.xlu1 %1681  ;;  %v1723_v21 = vunpack.i.l.bf16 %v1722_v17 }
 0x169   : > { %v2967_v23 = vunpack.i.h.bf16 %v2122_v20  ;;  %v1683_v0 = vunpack.i.l.bf16 %v2122_v20 }
 0x16b   : > { %v2133_v28 = vpop.permute.xlu0 %1731  ;;  %v2143_v31 = vsel %vm462_vm4, %v2967_v23, %v1723_v21 }
 0x16c   : > { %v2147_v37 = vpop.permute.xlu1 %1691  ;;  %v1734_v38 = vunpack.i.h.bf16 %v2133_v28  ;;  %v1733_v39 = vunpack.i.l.bf16 %v2133_v28 }
 0x16d   : > { %v1694_v41 = vunpack.i.h.bf16 %v2147_v37  ;;  %v1693_v42 = vunpack.i.l.bf16 %v2147_v37 }
 0x16e   : > { %v2159_v44 = vsel %vm772_vm5, %v1733_v39, %v1734_v38 }
 0x16f   : > { %v2161_v46 = vpack.c.bf16 %v1734_v38, %v1693_v42  ;;  %v869_v53 = vpack.c.bf16 %v1694_v41, %v1653_v36  ;;  %v2167_v61 = vpop.permute.xlu0 %1741  ;;  %v2172_v1 = vsel %vm772_vm5, %v1654_v27, %v1693_v42  ;;  %v2184_v38 = vsel %vm674_vm6, %v2964_v40, %v1664_v32 }
 0x170   : > { %3028 = vst [vmem:[#allocation11_spill] sm:$0xff] %v2167_v61  ;;  %v2174_v4 = vpop.permute.xlu1 %1696  ;;  %v1744_v5 = vunpack.i.h.bf16 %v2167_v61  ;;  %v2965_v6 = vunpack.i.l.bf16 %v2167_v61  ;;  %v1724_v42 = vunpack.i.h.bf16 %v1722_v17  ;;  %v2971_v40 = vunpack.i.h.bf16 %v2093_v2 }
 0x171   : > { %3027 = vst [vmem:[#allocation10_spill] sm:$0xff] %v2161_v46  ;;  %3029 = vst [vmem:[#allocation12_spill] sm:$0xff] %v2174_v4  ;;  %1107 = vrot.lane.b32.xlu1 %v869_v53, %s1899_s25 }
 0x172   : > { %v856_v33 = vpack.c.bf16 %v1744_v5, %v1664_v32  ;;  %v2190_v35 = vsel %vm674_vm6, %v2965_v6, %v1744_v5  ;;  %v824_v17 = vpack.c.bf16 %v1724_v42, %v1683_v0  ;;  %v526_v5 = vsel %vm523_vm3, %v1639_v8, %v1678_v14 }
 0x173   : > { %v2192_v43 = vpop.permute.xlu0 %1746  ;;  %v529_v6 = vsel %vm523_vm3, %v1718_v12, %v1719_v11  ;;  %v465_v14 = vsel %vm462_vm4, %v1644_v15, %v1683_v0 }
 0x174   : > { %v2196_v53 = vpop.permute.xlu1 %1701  ;;  %1081 = vrot.lane.b32.xlu0 %v856_v33, %s1899_s25  ;;  %v2215_v33 = vsel %vm576_vm7, %v2970_v24, %v2971_v40  ;;  %v831_v11 = vpack.c.bf16 %v529_v6, %v526_v5  ;;  %v1649_v24 = vunpack.i.h.bf16 %v2080_v56  ;;  %v1658_v56 = vunpack.i.l.bf16 %v2086_v59 }
 0x175   : > { %3030 = vst [vmem:[#allocation13_spill] sm:$0xff] %v2196_v53  ;;  %3032 = vst [vmem:[#allocation15_spill] sm:$0xff] %v2215_v33 }
 0x177   : > { %v2201_v32 = vpop.permute.xlu0 %1751 }
 0x178   : > { %v2205_v16 = vpop.permute.xlu1 %1706  ;;  %v2973_v7 = vunpack.i.h.bf16 %v2201_v32  ;;  %v2972_v23 = vunpack.i.l.bf16 %v2201_v32  ;;  %1017 = vrot.lane.b32.xlu0 %v824_v17, %s1899_s25  ;;  %v468_v17 = vsel %vm462_vm4, %v1723_v21, %v1724_v42  ;;  %v403_v21 = vsel %vm401_vm2, %v1648_v62, %v1649_v24 }
 0x179   : > { %3031 = vst [vmem:[#allocation14_spill] sm:$0xff] %v2205_v16  ;;  %v823_v40 = vpack.c.bf16 %v468_v17, %v465_v14 }
 0x17a   : > { %v2222_v8 = vsel %vm576_vm7, %v2972_v23, %v2973_v7  ;;  %v2976_v23 = vunpack.i.l.bf16 %v2091_v63 }
 0x17b   : > { %3033 = vst [vmem:[#allocation16_spill] sm:$0xff] %v2222_v8  ;;  %v2224_v12 = vpop.permute.xlu0 %981 }
 0x17c   : > { %3034 = vst [vmem:[#allocation17_spill] sm:$0xff] %v2224_v12  ;;  %v2230_v13 = vpop.permute.xlu1 %1711  ;;  %1031 = vrot.lane.b32.xlu0 %v831_v11, %s1899_s25 }
 0x17d   : > { %3035 = vst [vmem:[#allocation18_spill] sm:$0xff] %v2230_v13 }
 0x17f   : > { %v2235_v7 = vpop.permute.xlu0 %1756 }
 0x180   : > { %v2237_v6 = vpop.permute.xlu1 %1726  ;;  %1015 = vrot.lane.b32.xlu0 %v823_v40, %s1899_s25  ;;  %v2254_v40 = vsel %vm401_vm2, %v1649_v24, %v2976_v23  ;;  %v1758_v29 = vunpack.i.l.bf16 %v2235_v7 }
 0x181   : > { %v2974_v0 = vunpack.i.h.bf16 %v2237_v6  ;;  %v1728_v15 = vunpack.i.l.bf16 %v2237_v6 }
 0x183   : > { %v2246_v5 = vpop.permute.xlu0 %1761  ;;  %v406_v11 = vsel %vm401_vm2, %v1689_v3, %v1728_v15  ;;  %v2259_v14 = vsel %vm401_vm2, %v1728_v15, %v2974_v0  ;;  %v2975_v3 = vunpack.i.h.bf16 %v2174_v4  ;;  %v775_v15 = vsel %vm772_vm5, %v1694_v41, %v1733_v39 }
 0x184   : > { %v2262_v62 = vpop.permute.xlu1 %1736  ;;  %v814_v17 = vpack.c.bf16 %v406_v11, %v403_v21  ;;  %v2978_v21 = vunpack.i.h.bf16 %v2086_v59  ;;  %v3036_v0 = vunpack.i.l.bf16 %v2174_v4  ;;  %v870_v41 = vpack.c.bf16 %v775_v15, %v773_v9 }
 0x185   : > { %v2977_v42 = vunpack.i.h.bf16 %v2262_v62  ;;  %v1738_v24 = vunpack.i.l.bf16 %v2262_v62 }
 0x186   : > { %997 = vrot.lane.b32.xlu0 %v814_v17, %s1899_s25  ;;  %v2286_v28 = vsel %vm723_vm8, %v3036_v0, %v1658_v56  ;;  %v725_v36 = vsel %vm723_vm8, %v1658_v56, %v2978_v21 }
 0x187   : > { %v2276_v11 = vpop.permute.xlu0 %1766  ;;  %3037 = vst [vmem:[#allocation19_spill] sm:$0xff] %v2286_v28  ;;  %v2291_v37 = vsel %vm723_vm8, %v2975_v3, %v1738_v24  ;;  %v727_v57 = vsel %vm723_vm8, %v1738_v24, %v2977_v42 }
 0x188   : > { %v2293_v39 = vpop.permute.xlu1 %983  ;;  %v863_v3 = vpack.c.bf16 %v727_v57, %v725_v36 }
 0x189   : > { %3038 = vst [vmem:[#allocation20_spill] sm:$0xff] %v2293_v39 }
 0x18a   : > { %1109 = vrot.lane.b32.xlu0 %v870_v41, %s1899_s25 }
 0x18b   : > { %v2301_v27 = vpop.permute.xlu0 %1776 }
 0x18c   : > { %v2306_v0 = vpop.permute.xlu1 %1771  ;;  %v2990_v39 = vunpack.i.h.bf16 %v2301_v27 }
 0x18d   : > { %v2989_v21 = vunpack.i.h.bf16 %v2306_v0 }
 0x18e   : > { %1095 = vrot.lane.b32.xlu0 %v863_v3, %s1899_s25 }
 0x18f   : > { %v2309_v9 = vpop.permute.xlu0 %1781 }
 0x190   : > { %v2311_v15 = vpop.permute.xlu1 %1801 }
 0x193   : > { %v2313_v17 = vpop.permute.xlu0 %1786 }
 0x194   : > { %3039 = vst [vmem:[#allocation21_spill] sm:$0xff] %v2313_v17  ;;  %v2315_v24 = vpop.permute.xlu1 %1806 }
 0x195   : > { %3040 = vst [vmem:[#allocation22_spill] sm:$0xff] %v2315_v24  ;;  %v1809_v13 = vunpack.i.h.bf16 %v2315_v24  ;;  %v1628_v24 = vunpack.i.l.bf16 %v2059_v48 }
 0x197   : > { %v2317_v41 = vpop.permute.xlu0 %1791 }
 0x198   : > { %3041 = vst [vmem:[#allocation23_spill] sm:$0xff] %v2317_v41  ;;  %v2319_v23 = vpop.permute.xlu1 %1836 }
 0x19b   : > { %v2321_v42 = vpop.permute.xlu0 %1796 }
 0x19c   : > { %3042 = vst [vmem:[#allocation24_spill] sm:$0xff] %v2321_v42  ;;  %v2323_v56 = vpop.permute.xlu1 %1851  ;;  %v1799_v26 = vunpack.i.h.bf16 %v2321_v42  ;;  %v3046_v53 = vunpack.i.l.bf16 %v2321_v42 }
 0x19d   : > { %v1854_v57 = vunpack.i.h.bf16 %v2323_v56  ;;  %v2986_v3 = vunpack.i.l.bf16 %v2323_v56 }
 0x19f   : > { %v2327_v36 = vpop.permute.xlu0 %1811  ;;  %v2338_v46 = vsel %vm772_vm5, %v2986_v3, %v1854_v57 }
 0x1a0   : > { %v2330_v52 = vpop.permute.xlu1 %1856  ;;  %v1813_v12 = vunpack.i.l.bf16 %v2327_v36  ;;  %3043 = vst [vmem:[#allocation25_spill] sm:$0xff] %v2338_v46  ;;  %v1618_v46 = vunpack.i.l.bf16 %v2063_v49 }
 0x1a1   : > { %v2991_v50 = vunpack.i.h.bf16 %v2330_v52 }
 0x1a2   : > { %v2343_v33 = vsel %vm772_vm5, %v2989_v21, %v1813_v12  ;;  %v2345_v8 = vpack.c.bf16 %v1854_v57, %v1813_v12  ;;  %v1609_v57 = vunpack.i.h.bf16 %v2048_v45 }
 0x1a3   : > { %3044 = vst [vmem:[#allocation26_spill] sm:$0xff] %v2343_v33  ;;  %v868_v16 = vpack.c.bf16 %v2991_v50, %v2990_v39  ;;  %v2355_v61 = vpop.permute.xlu0 %1816  ;;  %v1608_v39 = vunpack.i.l.bf16 %v2048_v45  ;;  %v1804_v50 = vunpack.i.h.bf16 %v2311_v15  ;;  %v1619_v45 = vunpack.i.h.bf16 %v2063_v49 }
 0x1a4   : > { %3045 = vst [vmem:[#allocation27_spill] sm:$0xff] %v2345_v8  ;;  %v2357_v58 = vpop.permute.xlu1 %1861  ;;  %v2997_v21 = vunpack.i.h.bf16 %v2355_v61  ;;  %v2998_v12 = vunpack.i.l.bf16 %v2355_v61  ;;  %v2999_v8 = vunpack.i.h.bf16 %v2319_v23 }
 0x1a5   : > { %1105 = vrot.lane.b32.xlu1 %v868_v16, %s1899_s25  ;;  %v533_v16 = vsel %vm523_vm3, %v1609_v57, %v1799_v26  ;;  %v3047_v57 = vunpack.i.h.bf16 %v2357_v58  ;;  %v472_v42 = vsel %vm462_vm4, %v1619_v45, %v1804_v50  ;;  %v3009_v45 = vunpack.i.l.bf16 %v2317_v41 }
 0x1a6   : > { %v865_v3 = vpack.c.bf16 %v2997_v21, %v2998_v12  ;;  %v836_v33 = vpack.c.bf16 %v2999_v8, %v3046_v53  ;;  %v1763_v21 = vunpack.i.l.bf16 %v2246_v5  ;;  %v3005_v12 = vunpack.i.h.bf16 %v2309_v9 }
 0x1a7   : > { %v2376_v25 = vpop.permute.xlu0 %1821  ;;  %v530_v53 = vsel %vm523_vm3, %v1608_v39, %v1758_v29  ;;  %v1768_v39 = vunpack.i.l.bf16 %v2276_v11 }
 0x1a8   : > { %v2379_v34 = vpop.permute.xlu1 %1866  ;;  %1099 = vrot.lane.b32.xlu0 %v865_v3, %s1899_s25  ;;  %v833_v8 = vpack.c.bf16 %v533_v16, %v530_v53  ;;  %v860_v3 = vpack.c.bf16 %v3047_v57, %v3005_v12  ;;  %v469_v49 = vsel %vm462_vm4, %v1618_v46, %v1763_v21  ;;  %v3014_v46 = vunpack.i.l.bf16 %v2319_v23 }
 0x1a9   : > { %1041 = vrot.lane.b32.xlu1 %v836_v33, %s1899_s25  ;;  %v1629_v33 = vunpack.i.h.bf16 %v2059_v48  ;;  %v825_v53 = vpack.c.bf16 %v472_v42, %v469_v49  ;;  %v408_v48 = vsel %vm401_vm2, %v1628_v24, %v1768_v39 }
 0x1aa   : > { %v534_v24 = vsel %vm523_vm3, %v1799_v26, %v3014_v46  ;;  %v1613_v46 = vunpack.i.l.bf16 %v2055_v47 }
 0x1ab   : > { %v2393_v4 = vpop.permute.xlu0 %1826  ;;  %v411_v12 = vsel %vm401_vm2, %v1629_v33, %v1809_v13 }
 0x1ac   : > { %1035 = vrot.lane.b32.xlu0 %v833_v8, %s1899_s25  ;;  %v2399_v16 = vpop.permute.xlu1 %1871  ;;  %v817_v49 = vpack.c.bf16 %v411_v12, %v408_v48  ;;  %v3050_v48 = vunpack.i.h.bf16 %v2235_v7  ;;  %v3051_v12 = vunpack.i.h.bf16 %v2106_v10  ;;  %v3053_v10 = vunpack.i.l.bf16 %v2076_v54 }
 0x1ad   : > { %1089 = vrot.lane.b32.xlu1 %v860_v3, %s1899_s25  ;;  %v3013_v8 = vunpack.i.l.bf16 %v2399_v16  ;;  %v1773_v54 = vunpack.i.l.bf16 %v2306_v0 }
 0x1af   : > { %v2404_v57 = vpop.permute.xlu0 %1831 }
 0x1b0   : > { %3048 = vst [vmem:[#allocation28_spill] sm:$0xff] %v2404_v57  ;;  %v3012_v17 = vunpack.i.h.bf16 %v2404_v57  ;;  %v3008_v28 = vunpack.i.l.bf16 %v2404_v57  ;;  %1019 = vrot.lane.b32.xlu0 %v825_v53, %s1899_s25  ;;  %v531_v53 = vsel %vm523_vm3, %v1758_v29, %v3050_v48  ;;  %v1624_v29 = vunpack.i.h.bf16 %v2068_v51 }
 0x1b2   : > { %v2420_v42 = vsel %vm576_vm7, %v3008_v28, %v3009_v45  ;;  %v2427_v33 = vsel %vm576_vm7, %v3012_v17, %v3013_v8  ;;  %v3018_v28 = vunpack.i.l.bf16 %v2311_v15  ;;  %v1614_v17 = vunpack.i.h.bf16 %v2055_v47 }
 0x1b3   : > { %3049 = vst [vmem:[#allocation29_spill] sm:$0xff] %v2420_v42  ;;  %v2431_v3 = vpop.permute.xlu0 %1841  ;;  %v834_v8 = vpack.c.bf16 %v534_v24, %v531_v53  ;;  %v1623_v47 = vunpack.i.l.bf16 %v2068_v51  ;;  %v1769_v53 = vunpack.i.h.bf16 %v2276_v11  ;;  %v3052_v24 = vunpack.i.h.bf16 %v2246_v5  ;;  %v3094_v11 = vld [vmem:[#allocation6_spill] sm:$0xff] }
 0x1b4   : > { %v1844_v45 = vunpack.i.h.bf16 %v2431_v3  ;;  %v3019_v41 = vunpack.i.l.bf16 %v2431_v3  ;;  %1003 = vrot.lane.b32.xlu0 %v817_v49, %s1899_s25  ;;  %v527_v42 = vsel %vm523_vm3, %v1614_v17, %v3051_v12  ;;  %v524_v17 = vsel %vm523_vm3, %v1613_v46, %v3053_v10 }
 0x1b5   : > { %v3054_v51 = vunpack.i.h.bf16 %v2122_v20  ;;  %v3056_v20 = vunpack.i.l.bf16 %v2323_v56  ;;  %v1749_v10 = vunpack.i.h.bf16 %v2192_v43 }
 0x1b6   : > { %v828_v26 = vpack.c.bf16 %v1844_v45, %v3018_v28  ;;  %v473_v49 = vsel %vm462_vm4, %v1804_v50, %v3019_v41  ;;  %v470_v50 = vsel %vm462_vm4, %v1763_v21, %v3052_v24  ;;  %v829_v28 = vpack.c.bf16 %v527_v42, %v524_v17 }
 0x1b7   : > { %v2450_v57 = vpop.permute.xlu0 %1846  ;;  %v826_v12 = vpack.c.bf16 %v473_v49, %v470_v50  ;;  %v1814_v41 = vunpack.i.h.bf16 %v2327_v36  ;;  %v409_v21 = vsel %vm401_vm2, %v1768_v39, %v1769_v53  ;;  %v3055_v36 = vunpack.i.l.bf16 %v2078_v55 }
 0x1b8   : > { %v1848_v48 = vunpack.i.l.bf16 %v2450_v57  ;;  %1037 = vrot.lane.b32.xlu0 %v834_v8, %s1899_s25  ;;  %1025 = vrot.lane.b32.xlu1 %v828_v26, %s1899_s25  ;;  %v466_v26 = vsel %vm462_vm4, %v1624_v29, %v3054_v51  ;;  %v3058_v39 = vunpack.i.h.bf16 %v2086_v59  ;;  %v3059_v55 = vunpack.i.h.bf16 %v2262_v62 }
 0x1b9   : > { %v463_v46 = vsel %vm462_vm4, %v1623_v47, %v3055_v36  ;;  %v779_v49 = vsel %vm772_vm5, %v1814_v41, %v3056_v20  ;;  %v1824_v47 = vunpack.i.h.bf16 %v2376_v25  ;;  %v1823_v50 = vunpack.i.l.bf16 %v2376_v25 }
 0x1ba   : > { %v412_v8 = vsel %vm401_vm2, %v1809_v13, %v1848_v48  ;;  %v821_v13 = vpack.c.bf16 %v466_v26, %v463_v46  ;;  %v864_v24 = vpack.c.bf16 %v3059_v55, %v3058_v39  ;;  %v3060_v59 = vpack.c.bf16 %v2120_v19, %v2127_v22 }
 0x1bb   : > { %v818_v42 = vpack.c.bf16 %v412_v8, %v409_v21  ;;  %v857_v17 = vpack.c.bf16 %v1824_v47, %v1823_v50  ;;  %v3061_v62 = vunpack.i.l.bf16 %v2091_v63  ;;  %v1829_v51 = vunpack.i.h.bf16 %v2393_v4  ;;  %v2566_v39 = vpop.permute.xlu0 %989 }
 0x1bc   : > { %1021 = vrot.lane.b32.xlu0 %v826_v12, %s1899_s25  ;;  %1027 = vrot.lane.b32.xlu1 %v829_v28, %s1899_s25  ;;  %v3057_v28 = vunpack.i.h.bf16 %v2306_v0  ;;  %v1669_v0 = vunpack.i.h.bf16 %v2088_v60  ;;  %v3062_v12 = vunpack.i.h.bf16 %v2237_v6  ;;  %v3063_v26 = vpack.c.bf16 %v2143_v31, %v2138_v30 }
 0x1bd   : > { %v1858_v63 = vunpack.i.l.bf16 %v2330_v52  ;;  %v3064_v22 = vpack.c.bf16 %v2259_v14, %v2254_v40  ;;  %v1778_v6 = vunpack.i.l.bf16 %v2301_v27  ;;  %v3065_v21 = vunpack.i.h.bf16 %v2093_v2 }
 0x1be   : > { %v777_v29 = vsel %vm772_vm5, %v1773_v54, %v3057_v28  ;;  %v848_v25 = vpack.c.bf16 %v1749_v10, %v1669_v0  ;;  %v816_v8 = vpack.c.bf16 %v3062_v12, %v3061_v62  ;;  %v3066_v30 = vunpack.i.h.bf16 %v2201_v32 }
 0x1bf   : > { %v874_v56 = vpack.c.bf16 %v779_v49, %v777_v29  ;;  %v3067_v36 = vunpack.i.h.bf16 %v2330_v52  ;;  %v3068_v40 = vpack.c.bf16 %v2159_v44, %v2172_v1  ;;  %v3069_v14 = vunpack.i.h.bf16 %v2301_v27 }
 0x1c0   : > { %1005 = vrot.lane.b32.xlu0 %v818_v42, %s1899_s25  ;;  %1011 = vrot.lane.b32.xlu1 %v821_v13, %s1899_s25  ;;  %v840_v31 = vpack.c.bf16 %v3066_v30, %v3065_v21  ;;  %v1863_v42 = vunpack.i.l.bf16 %v2357_v58  ;;  %v1783_v20 = vunpack.i.l.bf16 %v2309_v9  ;;  %v3070_v52 = vunpack.i.h.bf16 %v2357_v58 }
 0x1c1   : > { %v731_v46 = vsel %vm723_vm8, %v1858_v63, %v3067_v36  ;;  %v729_v13 = vsel %vm723_vm8, %v1778_v6, %v3069_v14  ;;  %v3071_v29 = vpack.c.bf16 %v2190_v35, %v2184_v38  ;;  %v3072_v44 = vunpack.i.h.bf16 %v2309_v9  ;;  %v3075_v38 = vld [vmem:[#allocation19_spill] sm:$0xff] }
 0x1c2   : > { %v867_v49 = vpack.c.bf16 %v731_v46, %v729_v13  ;;  %v682_v28 = vsel %vm674_vm6, %v1863_v42, %v3070_v52  ;;  %v3073_v55 = vunpack.i.l.bf16 %v2355_v61  ;;  %v1868_v35 = vunpack.i.l.bf16 %v2379_v34 }
 0x1c3   : > { %v680_v1 = vsel %vm674_vm6, %v1783_v20, %v3072_v44  ;;  %v3076_v9 = vpack.c.bf16 %v2291_v37, %v3075_v38  ;;  %v873_v12 = vpack.c.bf16 %v1814_v41, %v1773_v54  ;;  %v3082_v41 = vunpack.i.l.bf16 %v2319_v23 }
 0x1c4   : > { %1117 = vrot.lane.b32.xlu0 %v874_v56, %s1899_s25  ;;  %1097 = vrot.lane.b32.xlu1 %v864_v24, %s1899_s25  ;;  %v859_v27 = vpack.c.bf16 %v682_v28, %v680_v1  ;;  %v728_v58 = vsel %vm723_vm8, %v3073_v55, %v1778_v6  ;;  %v3074_v24 = vunpack.i.h.bf16 %v2355_v61  ;;  %v3081_v6 = vunpack.i.h.bf16 %v2319_v23  ;;  %v3089_v1 = vld [vmem:[#allocation22_spill] sm:$0xff] }
 0x1c5   : > { %v681_v36 = vsel %vm674_vm6, %v1824_v47, %v1863_v42  ;;  %v1874_v46 = vunpack.i.h.bf16 %v2399_v16  ;;  %v3087_v47 = vunpack.i.l.bf16 %v2399_v16  ;;  %v1849_v42 = vunpack.i.h.bf16 %v2450_v57 }
 0x1c6   : > { %v730_v56 = vsel %vm723_vm8, %v3074_v24, %v1858_v63  ;;  %v3080_v63 = vunpack.i.h.bf16 %v2235_v7  ;;  %v535_v54 = vsel %vm523_vm3, %v3082_v41, %v3081_v6  ;;  %v679_v7 = vsel %vm674_vm6, %v1823_v50, %v1783_v20 }
 0x1c7   : > { %v866_v61 = vpack.c.bf16 %v730_v56, %v728_v58  ;;  %v858_v13 = vpack.c.bf16 %v681_v36, %v679_v7  ;;  %v584_v50 = vsel %vm576_vm7, %v3087_v47, %v1874_v46  ;;  %v3088_v20 = vunpack.i.l.bf16 %v2431_v3  ;;  %v3102_v36 = vld [vmem:[#allocation29_spill] sm:$0xff] }
 0x1c8   : > { %1083 = vrot.lane.b32.xlu0 %v857_v17, %s1899_s25  ;;  %1033 = vrot.lane.b32.xlu1 %v2115_v18, %s1899_s25  ;;  %v1828_v18 = vunpack.i.l.bf16 %v2393_v4  ;;  %v1869_v17 = vunpack.i.h.bf16 %v2379_v34  ;;  %v3091_v24 = vunpack.i.l.bf16 %v2311_v15  ;;  %v3092_v56 = vunpack.i.h.bf16 %v2246_v5  ;;  %v3093_v4 = vld [vmem:[#allocation18_spill] sm:$0xff]  ;;  %v3105_v47 = vld [vmem:[#allocation9_spill] sm:$0xff] }
 0x1c9   : > { %v474_v44 = vsel %vm462_vm4, %v3088_v20, %v1844_v45  ;;  %v413_v15 = vsel %vm401_vm2, %v1848_v48, %v1849_v42  ;;  %v1714_v57 = vunpack.i.h.bf16 %v3093_v4  ;;  %v1713_v48 = vunpack.i.l.bf16 %v3093_v4  ;;  %v3107_v20 = vld [vmem:[#allocation11_spill] sm:$0xff] }
 0x1ca   : > { %v849_v19 = vpack.c.bf16 %v1829_v51, %v1828_v18  ;;  %v471_v38 = vsel %vm462_vm4, %v3092_v56, %v3091_v24  ;;  %v3100_v6 = vunpack.i.l.bf16 %v2093_v2  ;;  %v2717_v24 = vld [vmem:[%s2961_s2 + $0x4] ss:$12 sps:$4 sm:$0xff]  }
 0x1cb   : > { %v827_v45 = vpack.c.bf16 %v474_v44, %v471_v38  ;;  %v3108_v44 = vunpack.i.l.bf16 %v3107_v20  ;;  %v3111_v56 = vld [vmem:[#allocation5_spill] sm:$0xff]  ;;  %v3112_v38 = vld [vmem:[#allocation4_spill] sm:$0xff]  ;;  %1271 = vmatprep.mubr.bf16.mxu0 %v2717_v24 }
 0x1cc   : > { %1065 = vrot.lane.b32.xlu0 %v848_v25, %s1899_s25  ;;  %1029 = vrot.lane.b32.xlu1 %v3060_v59, %s1899_s25  ;;  %v3077_v25 = vld [vmem:[#allocation21_spill] sm:$0xff]  ;;  %v577_v41 = vsel %vm576_vm7, %v1713_v48, %v3100_v6 }
 0x1cd   : > { %v1789_v59 = vunpack.i.h.bf16 %v3077_v25  ;;  %v1788_v62 = vunpack.i.l.bf16 %v3077_v25 }
 0x1cf   : > { %v631_v37 = vsel %vm625_vm9, %v1788_v62, %v1789_v59  ;;  %v630_v25 = vsel %vm625_vm9, %v1828_v18, %v1788_v62  ;;  %v3095_v62 = vld [vmem:[#allocation3_spill] sm:$0xff] }
 0x1d0   : > { %1001 = vrot.lane.b32.xlu0 %v816_v8, %s1899_s25  ;;  %1013 = vrot.lane.b32.xlu1 %v3063_v26, %s1899_s25  ;;  %v633_v26 = vsel %vm625_vm9, %v1868_v35, %v1869_v17 }
 0x1d1   : > { %v851_v21 = vpack.c.bf16 %v633_v26, %v631_v37  ;;  %v1748_v37 = vunpack.i.l.bf16 %v2192_v43  ;;  %v3109_v43 = vld [vmem:[#allocation27_spill] sm:$0xff] }
 0x1d4   : > { %1067 = vrot.lane.b32.xlu0 %v849_v19, %s1899_s25  ;;  %999 = vrot.lane.b32.xlu1 %v3064_v22, %s1899_s25  ;;  %v3078_v19 = vld [vmem:[#allocation24_spill] sm:$0xff] }
 0x1d5   : > { %v3079_v34 = vunpack.i.l.bf16 %v3078_v19  ;;  %v3097_v19 = vld [vmem:[#allocation25_spill] sm:$0xff] }
 0x1d7   : > { %v2583_v8 = vpop.permute.xlu0 %995  ;;  %v532_v22 = vsel %vm523_vm3, %v3080_v63, %v3079_v34  ;;  %v3098_v34 = vld [vmem:[#allocation26_spill] sm:$0xff] }
 0x1d8   : > { %1049 = vrot.lane.b32.xlu0 %v840_v31, %s1899_s25  ;;  %1111 = vrot.lane.b32.xlu1 %v3068_v40, %s1899_s25  ;;  %v835_v31 = vpack.c.bf16 %v535_v54, %v532_v22  ;;  %v3083_v40 = vld [vmem:[#allocation23_spill] sm:$0xff]  ;;  %v3099_v63 = vpack.c.bf16 %v3097_v19, %v3098_v34  ;;  %v852_v22 = vpack.c.bf16 %v1869_v17, %v1789_v59  ;;  %v3101_v54 = vunpack.i.l.bf16 %v2201_v32 }
 0x1d9   : > { %v1794_v14 = vunpack.i.h.bf16 %v3083_v40  ;;  %v3090_v55 = vunpack.i.l.bf16 %v3083_v40  ;;  %v3103_v40 = vpack.c.bf16 %v2427_v33, %v3102_v36  ;;  %v1668_v17 = vunpack.i.l.bf16 %v2088_v60 }
 0x1db   : > { %v582_v58 = vsel %vm576_vm7, %v3090_v55, %v1794_v14  ;;  %v627_v33 = vsel %vm625_vm9, %v1668_v17, %v1669_v0  ;;  %v844_v0 = vpack.c.bf16 %v1874_v46, %v1794_v14 }
 0x1dc   : > { %1103 = vrot.lane.b32.xlu0 %v867_v49, %s1899_s25  ;;  %1079 = vrot.lane.b32.xlu1 %v3071_v29, %s1899_s25  ;;  %v3084_v49 = vld [vmem:[#allocation12_spill] sm:$0xff] }
 0x1dd   : > { %v3085_v52 = vunpack.i.l.bf16 %v3084_v49  ;;  %v3086_v28 = vunpack.i.h.bf16 %v3084_v49 }
 0x1df   : > { %v861_v29 = vpack.c.bf16 %v3086_v28, %v3085_v52  ;;  %v629_v28 = vsel %vm625_vm9, %v1748_v37, %v1749_v10 }
 0x1e0   : > { %1087 = vrot.lane.b32.xlu0 %v859_v27, %s1899_s25  ;;  %1093 = vrot.lane.b32.xlu1 %v3076_v9, %s1899_s25  ;;  %v1808_v27 = vunpack.i.l.bf16 %v3089_v1  ;;  %v843_v9 = vpack.c.bf16 %v584_v50, %v582_v58  ;;  %v3106_v50 = vunpack.i.l.bf16 %v3105_v47 }
 0x1e2   : > { %v410_v5 = vsel %vm401_vm2, %v1769_v53, %v1808_v27  ;;  %v3096_v53 = vpack.c.bf16 %v3094_v11, %v3095_v62  ;;  %v820_v32 = vpack.c.bf16 %v1849_v42, %v1808_v27  ;;  %v3110_v27 = vld [vmem:[#allocation14_spill] sm:$0xff]  ;;  %v3117_v62 = vld [vmem:[#allocation28_spill] sm:$0xff] }
 0x1e3   : > { %v819_v18 = vpack.c.bf16 %v413_v15, %v410_v5  ;;  %v1709_v55 = vunpack.i.h.bf16 %v3110_v27  ;;  %v1708_v58 = vunpack.i.l.bf16 %v3110_v27  ;;  %v3119_v19 = vunpack.i.h.bf16 %v3117_v62 }
 0x1e4   : > { %1101 = vrot.lane.b32.xlu0 %v866_v61, %s1899_s25  ;;  %1115 = vrot.lane.b32.xlu1 %v873_v12, %s1899_s25  ;;  %v632_v12 = vsel %vm625_vm9, %v1829_v51, %v1868_v35  ;;  %v2657_v51 = vpop.permute.xlu1 %991 }
 0x1e5   : > { %v850_v61 = vpack.c.bf16 %v632_v12, %v630_v25  ;;  %v626_v46 = vsel %vm625_vm9, %v1708_v58, %v1668_v17  ;;  %v628_v14 = vsel %vm625_vm9, %v1709_v55, %v1748_v37  ;;  %v3115_v25 = vld [vmem:[#allocation15_spill] sm:$0xff] }
 0x1e6   : > { %v2599_v30 = vpop.permute.xlu0 %1081 }
 0x1e8   : > { %1071 = vrot.lane.b32.xlu0 %v851_v21, %s1899_s25  ;;  %1039 = vrot.lane.b32.xlu1 %v835_v31, %s1899_s25  ;;  %v579_v21 = vsel %vm576_vm7, %v1714_v57, %v3101_v54  ;;  %v1108_v31 = vpop.permute.xlu1 %1107 }
 0x1e9   : > { %v838_v59 = vpack.c.bf16 %v579_v21, %v577_v41  ;;  %v3120_v21 = vld [vmem:[#allocation10_spill] sm:$0xff] }
 0x1ea   : > { %v2607_v23 = vpop.permute.xlu0 %1017 }
 0x1ec   : > { %1085 = vrot.lane.b32.xlu0 %v858_v13, %s1899_s25  ;;  %1091 = vrot.lane.b32.xlu1 %v861_v29, %s1899_s25  ;;  %v3104_v13 = vld [vmem:[#allocation13_spill] sm:$0xff]  ;;  %v847_v29 = vpack.c.bf16 %v629_v28, %v627_v33 }
 0x1ed   : > { %v1704_v49 = vunpack.i.h.bf16 %v3104_v13  ;;  %v1703_v52 = vunpack.i.l.bf16 %v3104_v13 }
 0x1ee   : > { %v2635_v3 = vpop.permute.xlu0 %1031 }
 0x1ef   : > { %v675_v42 = vsel %vm674_vm6, %v1703_v52, %v3106_v50  ;;  %v677_v1 = vsel %vm674_vm6, %v1704_v49, %v3108_v44  ;;  %v853_v60 = vpack.c.bf16 %v1704_v49, %v1703_v52 }
 0x1f0   : > { %1055 = vrot.lane.b32.xlu0 %v843_v9, %s1899_s25  ;;  %1023 = vrot.lane.b32.xlu1 %v827_v45, %s1899_s25  ;;  %v854_v10 = vpack.c.bf16 %v677_v1, %v675_v42  ;;  %v3113_v9 = vpack.c.bf16 %v3111_v56, %v3112_v38  ;;  %v3114_v45 = vld [vmem:[#allocation16_spill] sm:$0xff] }
 0x1f1   : > { %v3116_v12 = vpack.c.bf16 %v3114_v45, %v3115_v25 }
 0x1f2   : > { %v2651_v26 = vpop.permute.xlu0 %1015 }
 0x1f4   : > { %1069 = vrot.lane.b32.xlu0 %v850_v61, %s1899_s25  ;;  %1007 = vrot.lane.b32.xlu1 %v819_v18, %s1899_s25  ;;  %v846_v61 = vpack.c.bf16 %v628_v14, %v626_v46  ;;  %v845_v18 = vpack.c.bf16 %v1709_v55, %v1708_v58 }
 0x1f8   : > { %v2659_v35 = vpop.permute.xlu0 %997  ;;  %985 = vrot.lane.b32.xlu0 %v3096_v53, %s1899_s25  ;;  %1119 = vrot.lane.b32.xlu1 %v3099_v63, %s1899_s25  ;;  %v3118_v53 = vunpack.i.l.bf16 %v3117_v62 }
 0x1fa   : > { %v841_v34 = vpack.c.bf16 %v3119_v19, %v3118_v53 }
 0x1fc   : > { %v2676_v7 = vpop.permute.xlu0 %1109  ;;  %1053 = vrot.lane.b32.xlu0 %v3103_v40, %s1899_s25  ;;  %1073 = vrot.lane.b32.xlu1 %v852_v22, %s1899_s25  ;;  %v837_v22 = vpack.c.bf16 %v1714_v57, %v1713_v48 }
 0x1fd   : > { %v2686_v2 = vsel %vm1123_vm10, %v1108_v31, %v2676_v7 }
 0x200   : > { %1045 = vrot.lane.b32.xlu0 %v838_v59, %s1899_s25  ;;  %1009 = vrot.lane.b32.xlu1 %v820_v32, %s1899_s25  ;;  %v2724_v16 = vpop.permute.xlu0 %1095 }
 0x204   : > { %1121 = vrot.lane.b32.xlu0 %v3109_v43, %s1899_s25  ;;  %1063 = vrot.lane.b32.xlu1 %v847_v29, %s1899_s25 }
 0x208   : > { %1077 = vrot.lane.b32.xlu1 %v854_v10, %s1899_s25 }
 0x20c   : > { %1075 = vrot.lane.b32.xlu1 %v853_v60, %s1899_s25 }
 0x210   : > { %1057 = vrot.lane.b32.xlu1 %v844_v0, %s1899_s25 }
 0x214   : > { %993 = vrot.lane.b32.xlu1 %v3113_v9, %s1899_s25 }
 0x217   : > { %v2732_v15 = vpop.permute.xlu1 %1105 }
 0x218   : > { %1047 = vrot.lane.b32.xlu1 %v3116_v12, %s1899_s25 }
 0x21a   : > { %v2734_v5 = vpop.permute.xlu0 %1099 }
 0x21b   : > { %v2737_v11 = vpop.permute.xlu1 %1041 }
 0x21c   : > { %1061 = vrot.lane.b32.xlu1 %v846_v61, %s1899_s25 }
 0x21e   : > { %v1036_v4 = vpop.permute.xlu0 %1035 }
 0x21f   : > { %v2745_v37 = vpop.permute.xlu1 %1089 }
 0x220   : > { %1059 = vrot.lane.b32.xlu1 %v845_v18, %s1899_s25 }
 0x222   : > { %v1020_v63 = vpop.permute.xlu0 %1019 }
 0x224   : > { %1051 = vrot.lane.b32.xlu1 %v841_v34, %s1899_s25 }
 0x226   : > { %v1004_v6 = vpop.permute.xlu0 %1003 }
 0x228   : > { %1043 = vrot.lane.b32.xlu1 %v837_v22, %s1899_s25 }
 0x22a   : > { %v1038_v41 = vpop.permute.xlu0 %1037  ;;  %v2748_v54 = vpop.permute.xlu1 %1025 }
 0x22b   : > { %v1145_v0 = vsel %vm1123_vm10, %v1036_v4, %v1038_v41 }
 0x22c   : > { %1113 = vrot.lane.b32.xlu1 %v3120_v21, %s1899_s25  ;;  %v2820_v21 = vld [vmem:[%s2961_s2 + $0x8] ss:$12 sps:$4 sm:$0xff]  }
 0x22e   : > { %v1022_v31 = vpop.permute.xlu0 %1021  ;;  %v1028_v36 = vpop.permute.xlu1 %1027 }
 0x22f   : > { %v1139_v46 = vsel %vm1123_vm10, %v1020_v63, %v1022_v31 }
 0x232   : > { %v1006_v40 = vpop.permute.xlu0 %1005  ;;  %v1012_v17 = vpop.permute.xlu1 %1011 }
 0x233   : > { %v1133_v53 = vsel %vm1123_vm10, %v1004_v6, %v1006_v40  ;;  %v1130_v6 = vsel %vm1123_vm10, %v2583_v8, %v2659_v35 }
 0x236   : > { %v1118_v32 = vpop.permute.xlu0 %1117  ;;  %v2752_v59 = vpop.permute.xlu1 %1097 }
 0x23a   : > { %v2754_v13 = vpop.permute.xlu0 %1083  ;;  %v2756_v57 = vpop.permute.xlu1 %1033 }
 0x23e   : > { %v2758_v48 = vpop.permute.xlu0 %1065  ;;  %v1030_v49 = vpop.permute.xlu1 %1029 }
 0x23f   : > { %v1143_v27 = vsel %vm1123_vm10, %v1030_v49, %v2635_v3  ;;  %v1142_v56 = vsel %vm1123_vm10, %v1028_v36, %v1030_v49 }
 0x242   : > { %v2760_v52 = vpop.permute.xlu0 %1001  ;;  %v1014_v28 = vpop.permute.xlu1 %1013 }
 0x243   : > { %v1137_v45 = vsel %vm1123_vm10, %v1014_v28, %v2651_v26  ;;  %v1136_v12 = vsel %vm1123_vm10, %v1012_v17, %v1014_v28  ;;  %v3123_v17 = vld [vmem:[#allocation17_spill] sm:$0xff]  ;;  %v3124_v28 = vmov 0  }
 0x246   : > { %v2762_v33 = vpop.permute.xlu0 %1067  ;;  %v2764_v29 = vpop.permute.xlu1 %999 }
 0x247   : > { %v1131_v34 = vsel %vm1123_vm10, %v2659_v35, %v2764_v29  ;;  %v3121_v35 = vld [vmem:[#allocation7_spill] sm:$0xff] }
 0x248   : > { %v1127_v36 = vsel %vm1123_vm10, %v3121_v35, %v2566_v39 }
 0x24a   : > { %v2766_v47 = vpop.permute.xlu1 %1111  ;;  %v2768_v50 = vpop.permute.xlu0 %1049 }
 0x24b   : > { %v1173_v63 = vsel %vm1123_vm10, %v2676_v7, %v2766_v47  ;;  %v1128_v7 = vsel %vm1123_vm10, %v2566_v39, %v2657_v51 }
 0x24e   : > { %v2770_v42 = vpop.permute.xlu1 %1079  ;;  %v2772_v20 = vpop.permute.xlu0 %1103 }
 0x252   : > { %v2774_v44 = vpop.permute.xlu1 %1093  ;;  %v2776_v43 = vpop.permute.xlu0 %1087 }
 0x256   : > { %v1116_v1 = vpop.permute.xlu1 %1115  ;;  %v2782_v55 = vpop.permute.xlu0 %1101 }
 0x257   : > { %v1175_v19 = vsel %vm1123_vm10, %v1116_v1, %v1118_v32 }
 0x25a   : > { %v1040_v10 = vpop.permute.xlu1 %1039  ;;  %v2789_v14 = vpop.permute.xlu0 %1071 }
 0x25b   : > { %v1146_v60 = vsel %vm1123_vm10, %v1038_v41, %v1040_v10 }
 0x25c   : > { %1239 = vmatprep.subr.bf16.mxu0 %v1146_v60  ;;  %v2852_v60 = vld [vmem:[%s2961_s2 + $0x20] ss:$12 sps:$4 sm:$0xff]  }
 0x25d   : > { %1240 = vmatpush1.bf16.msra.mxu0 %v1145_v0  ;;  %v1165_v0 = vsel %vm1123_vm10, %v2776_v43, %v2745_v37  ;;  %v1167_v37 = vsel %vm1123_vm10, %v2774_v44, %v2724_v16 }
 0x25e   : > { %1241 = vmatprep.subr.bf16.mxu0 %v1143_v27  ;;  %v2784_v58 = vpop.permute.xlu1 %1091  ;;  %v2798_v18 = vpop.permute.xlu0 %1085 }
 0x261   : > { %1242 = vmatpush1.bf16.msra.mxu0 %v1142_v56 }
 0x262   : > { %v1024_v38 = vpop.permute.xlu1 %1023  ;;  %v2815_v41 = vpop.permute.xlu0 %1055 }
 0x263   : > { %v1140_v9 = vsel %vm1123_vm10, %v1022_v31, %v1024_v38  ;;  %v1171_v31 = vsel %vm1123_vm10, %v2772_v20, %v2732_v15 }
 0x264   : > { %1243 = vmatprep.subr.bf16.mxu0 %v1140_v9  ;;  %v1132_v9 = vsel %vm1123_vm10, %v2764_v29, %v2760_v52 }
 0x265   : > { %1244 = vmatpush1.bf16.msra.mxu0 %v1139_v46 }
 0x266   : > { %1245 = vmatprep.subr.bf16.mxu0 %v1137_v45  ;;  %v2793_v25 = vpop.permute.xlu1 %1007  ;;  %v1070_v49 = vpop.permute.xlu0 %1069 }
 0x267   : > { %v1134_v61 = vsel %vm1123_vm10, %v1006_v40, %v2793_v25  ;;  %v1147_v40 = vsel %vm1123_vm10, %v1040_v10, %v2737_v11  ;;  %v3125_v11 = vld [vmem:[#allocation8_spill] sm:$0xff]  ;;  %v1144_v10 = vsel %vm1123_vm10, %v2635_v3, %v2756_v57  ;;  %v1169_v3 = vsel %vm1123_vm10, %v2734_v5, %v2782_v55 }
 0x268   : > { %v1124_v1 = vsel %vm1123_vm10, %v3125_v11, %v3123_v17  ;;  %v1141_v57 = vsel %vm1123_vm10, %v1024_v38, %v2748_v54  ;;  %v1138_v54 = vsel %vm1123_vm10, %v2651_v26, %v2607_v23  ;;  %v1163_v23 = vsel %vm1123_vm10, %v2754_v13, %v2798_v18 }
 0x269   : > { %1246 = vmatpush1.bf16.msra.mxu0 %v1136_v12  ;;  %v1158_v45 = vsel %vm1123_vm10, %v1070_v49, %v2789_v14 }
 0x26a   : > { %1247 = vmatprep.subr.bf16.mxu0 %v1134_v61  ;;  %v2800_v4 = vpop.permute.xlu1 %1119  ;;  %v986_v56 = vpop.permute.xlu0 %985 }
 0x26b   : > { %v1176_v62 = vsel %vm1123_vm10, %v1118_v32, %v2800_v4  ;;  %v1168_v32 = vsel %vm1123_vm10, %v2724_v16, %v2752_v59  ;;  %v1170_v59 = vsel %vm1123_vm10, %v2782_v55, %v2772_v20  ;;  %v1162_v20 = vsel %vm1123_vm10, %v2770_v42, %v2599_v30 }
 0x26c   : > { %1304 = vmatprep.subr.bf16.mxu1 %v1176_v62  ;;  %v1166_v55 = vsel %vm1123_vm10, %v2784_v58, %v2774_v44  ;;  %v1164_v16 = vsel %vm1123_vm10, %v2798_v18, %v2776_v43 }
 0x26d   : > { %1248 = vmatpush1.bf16.msra.mxu0 %v1133_v53  ;;  %1305 = vmatpush1.bf16.msra.mxu1 %v1175_v19 }
 0x26e   : > { %1249 = vmatprep.subr.bf16.mxu0 %v1131_v34  ;;  %1306 = vmatprep.subr.bf16.mxu1 %v1173_v63  ;;  %v1074_v22 = vpop.permute.xlu1 %1073  ;;  %v1054_v38 = vpop.permute.xlu0 %1053 }
 0x26f   : > { %v1159_v30 = vsel %vm1123_vm10, %v2789_v14, %v1074_v22  ;;  %v1152_v19 = vsel %vm1123_vm10, %v1054_v38, %v2815_v41  ;;  %v1884_v22 = vld [vmem:[%s2961_s2 + $0x18] ss:$12 sps:$4 sm:$0xff]  }
 0x271   : > { %1250 = vmatpush1.bf16.msra.mxu0 %v1130_v6  ;;  %1307 = vmatpush1.bf16.msra.mxu1 %v2686_v2  ;;  %v3122_v2 = vld [vmem:[#allocation20_spill] sm:$0xff] }
 0x272   : > { %1251 = vmatprep.subr.bf16.mxu0 %v1128_v7  ;;  %1538 = vmatprep.subr.bf16.mxu1 %v1171_v31  ;;  %v1010_v8 = vpop.permute.xlu1 %1009  ;;  %v1125_v15 = vsel %vm1123_vm10, %v3123_v17, %v3122_v2  ;;  %v1046_v46 = vpop.permute.xlu0 %1045  ;;  %v1126_v18 = vsel %vm1123_vm10, %v3122_v2, %v986_v56 }
 0x273   : > { %v1135_v26 = vsel %vm1123_vm10, %v2793_v25, %v1010_v8  ;;  %v1157_v25 = vsel %vm1123_vm10, %v2762_v33, %v1070_v49  ;;  %v1879_v33 = vld [vmem:[%s2961_s2] ss:$12 sps:$4 sm:$0xff]  }
 0x274   : > { %1529 = vmatmul.mubr.msk.bf16.vlgmr.msra.gmra.mxu1 %vm1232_vm11, %v2820_v21 }
 0x275   : > { %1252 = vmatpush1.bf16.msra.mxu0 %v1127_v36  ;;  %1539 = vmatpush3.bf16.msra.mxu1 %v1147_v40 }
 0x276   : > { %1253 = vmatprep.subr.bf16.mxu0 %v1125_v15  ;;  %1540 = vmatprep.subr.bf16.mxu1 %v1168_v32  ;;  %v1064_v39 = vpop.permute.xlu1 %1063  ;;  %v1122_v12 = vpop.permute.xlu0 %1121 }
 0x277   : > { %1334 = vmatprep.mubr.bf16.mxu1 %v3124_v28  ;;  %v1156_v43 = vsel %vm1123_vm10, %v1064_v39, %v2758_v48 }
 0x279   : > { %1254 = vmatpush1.bf16.msra.mxu0 %v1124_v1  ;;  %1541 = vmatpush3.bf16.msra.mxu1 %v1144_v10 }
 0x27a   : > { %1255 = vmatprep.subr.bf16.mxu0 %v1170_v59  ;;  %1542 = vmatprep.subr.bf16.mxu1 %v1165_v0  ;;  %v1078_v27 = vpop.permute.xlu1 %1077 }
 0x27b   : > { %v1161_v44 = vsel %vm1123_vm10, %v1078_v27, %v2770_v42 }
 0x27c   : > { %1530 = vmatmul.mubr.msk.bf16.gmra.mxu1 %vm1232_vm11, %v2852_v60 }
 0x27d   : > { %1256 = vmatpush2.bf16.msra.mxu0 %v1169_v3  ;;  %1543 = vmatpush3.bf16.msra.mxu1 %v1141_v57 }
 0x27e   : > { %1257 = vmatprep.subr.bf16.mxu0 %v1167_v37  ;;  %1544 = vmatprep.subr.bf16.mxu1 %v1162_v20  ;;  %v1076_v5 = vpop.permute.xlu1 %1075 }
 0x27f   : > { %1377 = vmatprep.mubr.bf16.mxu1 %v2717_v24  ;;  %v1160_v13 = vsel %vm1123_vm10, %v1076_v5, %v1078_v27 }
 0x281   : > { %1258 = vmatpush2.bf16.msra.mxu0 %v1166_v55  ;;  %1545 = vmatpush3.bf16.msra.mxu1 %v1138_v54 }
 0x282   : > { %1259 = vmatprep.subr.bf16.mxu0 %v1164_v16  ;;  %1546 = vmatprep.subr.bf16.mxu1 %v1159_v30  ;;  %v1058_v24 = vpop.permute.xlu1 %1057 }
 0x283   : > { %v1153_v42 = vsel %vm1123_vm10, %v2815_v41, %v1058_v24 }
 0x285   : > { %1260 = vmatpush2.bf16.msra.mxu0 %v1163_v23  ;;  %1547 = vmatpush3.bf16.msra.mxu1 %v1135_v26 }
 0x286   : > { %1261 = vmatprep.subr.bf16.mxu0 %v1161_v44  ;;  %1548 = vmatprep.subr.bf16.mxu1 %v1156_v43  ;;  %v994_v58 = vpop.permute.xlu1 %993 }
 0x287   : > { %v1129_v52 = vsel %vm1123_vm10, %v2657_v51, %v994_v58  ;;  %v1177_v51 = vsel %vm1123_vm10, %v2800_v4, %v1122_v12 }
 0x289   : > { %1262 = vmatpush2.bf16.msra.mxu0 %v1160_v13  ;;  %1549 = vmatpush3.bf16.msra.mxu1 %v1132_v9 }
 0x28a   : > { %1263 = vmatprep.subr.bf16.mxu0 %v1158_v45  ;;  %1550 = vmatprep.subr.bf16.mxu1 %v1153_v42  ;;  %v1048_v48 = vpop.permute.xlu1 %1047 }
 0x28b   : > { %v1150_v29 = vsel %vm1123_vm10, %v1048_v48, %v2768_v50  ;;  %v1882_v50 = vld [vmem:[%s2961_s2 + $0x1c] ss:$12 sps:$4 sm:$0xff]   ;;  %v1149_v4 = vsel %vm1123_vm10, %v1046_v46, %v1048_v48 }
 0x28d   : > { %1264 = vmatpush2.bf16.msra.mxu0 %v1157_v25  ;;  %1551 = vmatpush3.bf16.msra.mxu1 %v1129_v52 }
 0x28e   : > { %1552 = vmatprep.subr.bf16.mxu1 %v1150_v29  ;;  %v1062_v14 = vpop.permute.xlu1 %1061 }
 0x28f   : > { %v1155_v61 = vsel %vm1123_vm10, %v1062_v14, %v1064_v39 }
 0x290   : > { %1265 = vmatprep.subr.bf16.mxu0 %v1155_v61 }
 0x291   : > { %1553 = vmatpush3.bf16.msra.mxu1 %v1126_v18 }
 0x292   : > { %1576 = vmatprep.subr.bf16.mxu1 %v1177_v51  ;;  %v1060_v62 = vpop.permute.xlu1 %1059 }
 0x293   : > { %v1154_v53 = vsel %vm1123_vm10, %v1060_v62, %v1062_v14 }
 0x294   : > { %1266 = vmatpush2.bf16.msra.mxu0 %v1154_v53  ;;  %1378 = vmatmul.mubr.bf16.vlgmr.msra.gmra.mxu1 %v1879_v33 }
 0x295   : > { %1267 = vmatprep.subr.bf16.mxu0 %v1152_v19  ;;  %1577 = vmatpush3.bf16.msra.mxu1 %v1177_v51 }
 0x296   : > { %v1052_v34 = vpop.permute.xlu1 %1051  ;;  %1385 = vmatprep.mubr.bf16.mxu1 %v1882_v50 }
 0x297   : > { %v1151_v63 = vsel %vm1123_vm10, %v1052_v34, %v1054_v38 }
 0x298   : > { %1268 = vmatpush2.bf16.msra.mxu0 %v1151_v63 }
 0x299   : > { %1269 = vmatprep.subr.bf16.mxu0 %v1149_v4 }
 0x29a   : > { %v1044_v6 = vpop.permute.xlu1 %1043 }
 0x29b   : > { %v1148_v7 = vsel %vm1123_vm10, %v1044_v6, %v1046_v46 }
 0x29c   : > { %1270 = vmatpush2.bf16.msra.mxu0 %v1148_v7  ;;  %1386 = vmatmul.mubr.bf16.gmra.mxu1 %v1884_v22 }
 0x29d   : > { %1580 = vmatprep.mubr.msk.bf16.mxu1 %vm1232_vm11, %v2820_v21 }
 0x29e   : > { %v1114_v41 = vpop.permute.xlu1 %1113 }
 0x29f   : > { %1272 = vmatmul.mubr.bf16.vlgmr.msra.gmra.mxu0 %v1879_v33  ;;  %v1174_v31 = vsel %vm1123_vm10, %v2766_v47, %v1114_v41 }
 0x2a0   : > { %1578 = vmatprep.subr.bf16.mxu1 %v1174_v31  ;;  %1281 = vmatprep.mubr.bf16.mxu0 %v1882_v50 }
 0x2a1   : > { %1579 = vmatpush3.bf16.msra.mxu1 %v1174_v31 }
 0x2a4   : > { %1581 = vmatmul.mubr.msk.bf16.vlgmr.msra.gmra.mxu1 %vm1232_vm11, %v2852_v60 }
 0x2a7   : > { %1282 = vmatmul.mubr.bf16.gmra.mxu0 %v1884_v22 }
 0x334   : > { %v1326_v8 = vpop.f32.mrf.mxu1 }
 0x336   : > { %v1328_v35 = vpop.f32.mrf.mxu1 }
 0x338   : > { %v1330_v36 = vpop.f32.mrf.mxu1 }
 0x33a   : > { %v1332_v40 = vpop.f32.mrf.mxu1 }
 0x33c   : > { %v1336_v2 = vpop.f32.mrf.mxu1 }
 0x33e   : > { %v1338_v17 = vpop.f32.mrf.mxu1 }
 0x340   : > { %v1340_v21 = vpop.f32.mrf.mxu1 }
 0x342   : > { %v1342_v15 = vpop.f32.mrf.mxu1 }
 0x354   : > { %v1554_v32 = vpop.f32.mrf.mxu1 }
 0x356   : > { %v1555_v49 = vpop.f32.mrf.mxu1 }
 0x357   : > { %v1556_v20 = vadd.f32 %v1555_v49, %v1554_v32 }
 0x358   : > { %v1557_v39 = vpop.f32.mrf.mxu1 }
 0x35a   : > { %v1558_v47 = vpop.f32.mrf.mxu1 }
 0x35b   : > { %v1559_v44 = vadd.f32 %v1558_v47, %v1557_v39 }
 0x35c   : > { %v1560_v28 = vpop.f32.mrf.mxu1 }
 0x35e   : > { %v1561_v11 = vpop.f32.mrf.mxu1 }
 0x35f   : > { %v1273_v1 = vpop.f32.mrf.mxu0  ;;  %v1562_v3 = vadd.f32 %v1561_v11, %v1560_v28 }
 0x360   : > { %v1327_v10 = vadd.f32 %v1326_v8, %v1273_v1  ;;  %v1563_v60 = vpop.f32.mrf.mxu1 }
 0x361   : > { %v1275_v59 = vpop.f32.mrf.mxu0 }
 0x362   : > { %1443 = vst [vmem:[%s2938_s21] sm:$0xff] %v1327_v10  ;;  %v1329_v0 = vadd.f32 %v1328_v35, %v1275_v59  ;;  %v1564_v27 = vpop.f32.mrf.mxu1 }
 0x363   : > { %v1277_v57 = vpop.f32.mrf.mxu0  ;;  %v1565_v30 = vadd.f32 %v1564_v27, %v1563_v60 }
 0x364   : > { %1444 = vst [vmem:[%s2938_s21 + $0x8] sm:$0xff] %v1329_v0  ;;  %v1331_v56 = vadd.f32 %v1330_v36, %v1277_v57  ;;  %v1582_v37 = vpop.f32.mrf.mxu1 }
 0x365   : > { %v1437_v5 = vadd.f32 %v1582_v37, %v1562_v3  ;;  %v1279_v54 = vpop.f32.mrf.mxu0 }
 0x366   : > { %1446 = vst [vmem:[%s2938_s21 + $0x18] sm:$0xff] %v1331_v56  ;;  %v1333_v55 = vadd.f32 %v1332_v40, %v1279_v54  ;;  %v1428_v16 = vpop.f32.mrf.mxu1 }
 0x367   : > { %1451 = vst.msk [vmem:[%s2938_s21 + $0x40] sm:$0xff] %vm308_vm1, %v1437_v5  ;;  %v1429_v38 = vadd.f32 %v1556_v20, %v1428_v16  ;;  %v1283_v24 = vpop.f32.mrf.mxu0 }
 0x368   : > { %1447 = vst [vmem:[%s2938_s21 + $0x20] sm:$0xff] %v1333_v55  ;;  %v1337_v23 = vadd.f32 %v1336_v2, %v1283_v24  ;;  %v1583_v26 = vpop.f32.mrf.mxu1 }
 0x369   : > { %1445 = vst.msk [vmem:[%s2938_s21 + $0x10] sm:$0xff] %vm308_vm1, %v1429_v38  ;;  %v1440_v43 = vadd.f32 %v1583_v26, %v1565_v30  ;;  %v1285_v58 = vpop.f32.mrf.mxu0 }
 0x36a   : > { %1449 = vst [vmem:[%s2938_s21 + $0x30] sm:$0xff] %v1337_v23  ;;  %v1339_v9 = vadd.f32 %v1338_v17, %v1285_v58  ;;  %v1431_v46 = vpop.f32.mrf.mxu1 }
 0x36b   : > { %1454 = vst.msk [vmem:[%s2938_s21 + $0x58] sm:$0xff] %vm308_vm1, %v1440_v43  ;;  %v1432_v13 = vadd.f32 %v1559_v44, %v1431_v46  ;;  %v1287_v45 = vpop.f32.mrf.mxu0 }
 0x36c   : > { %1450 = vst [vmem:[%s2938_s21 + $0x38] sm:$0xff] %v1339_v9  ;;  %v1341_v42 = vadd.f32 %v1340_v21, %v1287_v45 }
 0x36d   : > { %1448 = vst.msk [vmem:[%s2938_s21 + $0x28] sm:$0xff] %vm308_vm1, %v1432_v13  ;;  %v1289_v48 = vpop.f32.mrf.mxu0 }
 0x36e   : > { %1452 = vst [vmem:[%s2938_s21 + $0x48] sm:$0xff] %v1341_v42  ;;  %v1343_v25 = vadd.f32 %v1342_v15, %v1289_v48 }
 0x370   : > { %1453 = vst [vmem:[%s2938_s21 + $0x50] sm:$0xff] %v1343_v25 }
 0x371 PF: > { %s13_s12 = sadd.s32 1, %s1891_s12  }
 0x372   : > { %p10_p4 = scmp.ge.s32.totalorder %s13_s12, 4  }
 0x374   :  { %12 = sbr.rel (!%p10_p4) target bundleno = 1 (0x1), region = 62 }

// kernel: aa_kernel_forward.3
= control target key start
LH: loop header
LB: loop body
LE: loop exit
PB: predicated region body
PF: predicated region fallthrough
CT: control target
= control target key end

     0   :  { %s4449_s12 = smov 0   ;;  %s5741_s0 = inlined_call_operand.vmem [shape: f32[2,16,512], index: 0, kind: input, shape index: {}]   ;;  %s5742_s1 = inlined_call_operand.vmem [shape: bf16[512,768], index: 1, kind: input, shape index: {}]   ;;  %s5743_s2 = inlined_call_operand.vmem [shape: bf16[512,768], index: 2, kind: input, shape index: {}]   ;;  %s5744_s3 = inlined_call_operand.vmem [shape: f32[2,16,512], index: 3, kind: output, shape index: {}]  }
   0x1 LB: > { %s3390_s13 = sadd.s32 4294967295, %s4424_s12   ;;  %p3394_p0 = scmp.ge.s32.totalorder %s4424_s12, 1  ;;  %s4424_s12 = sphi %s4449_s12, %s13_s12  }
   0x2   : > { %p137_p1 = scmp.lt.s32.totalorder %s4424_s12, 3 }
   0x4   : > { %p138_p2 = pnand %p3394_p0, %p137_p1 }
   0x5   : > { %p161_p3 = scmp.lt.s32.totalorder (!%p138_p2), %s3390_s13, 1 }
   0x6   : > { %141 = sbr.rel (%p138_p2) target bundleno = 1925 (0x785), region = 32 }
   0xb   : > { %v3818_v0 = vld [vmem:[%s5742_s1 + $0x154] ss:$24 sps:$4 sm:$0xff]   ;;  %v3822_v2 = vld [vmem:[%s5742_s1 + $0x150] ss:$24 sps:$4 sm:$0xff]   ;;  %v3824_v4 = vld [vmem:[%s5742_s1 + $0x124] ss:$24 sps:$4 sm:$0xff]  }
   0xc   : > { %v3820_v1 = vld [vmem:[%s5742_s1 + $0x454] ss:$24 sps:$4 sm:$0xff]   ;;  %1336 = vmatprep.subr.bf16.mxu0 %v3818_v0  ;;  %v3823_v3 = vld [vmem:[%s5742_s1 + $0x450] ss:$24 sps:$4 sm:$0xff]   ;;  %v3826_v5 = vld [vmem:[%s5742_s1 + $0x424] ss:$24 sps:$4 sm:$0xff]  }
   0xd   : > { %1379 = vmatprep.subr.bf16.mxu1 %v3820_v1  ;;  %1337 = vmatpush1.bf16.msra.mxu0 %v3822_v2  ;;  %v3828_v6 = vld [vmem:[%s5742_s1 + $0x120] ss:$24 sps:$4 sm:$0xff]   ;;  %v3830_v8 = vld [vmem:[%s5742_s1 + $0xf4] ss:$24 sps:$4 sm:$0xff]   ;;  %v3834_v10 = vld [vmem:[%s5742_s1 + $0xf0] ss:$24 sps:$4 sm:$0xff]  }
   0xe   : > { %1380 = vmatpush1.bf16.msra.mxu1 %v3823_v3  ;;  %1338 = vmatprep.subr.bf16.mxu0 %v3824_v4  ;;  %v3829_v7 = vld [vmem:[%s5742_s1 + $0x420] ss:$24 sps:$4 sm:$0xff]   ;;  %v3832_v9 = vld [vmem:[%s5742_s1 + $0x3f4] ss:$24 sps:$4 sm:$0xff]   ;;  %v3835_v11 = vld [vmem:[%s5742_s1 + $0x3f0] ss:$24 sps:$4 sm:$0xff]  }
   0xf   : > { %1381 = vmatprep.subr.bf16.mxu1 %v3826_v5  ;;  %v3836_v12 = vld [vmem:[%s5742_s1 + $0xc4] ss:$24 sps:$4 sm:$0xff]   ;;  %v3840_v14 = vld [vmem:[%s5742_s1 + $0xc0] ss:$24 sps:$4 sm:$0xff]   ;;  %v3842_v16 = vld [vmem:[%s5742_s1 + $0x94] ss:$24 sps:$4 sm:$0xff]  }
  0x10   : > { %v3838_v13 = vld [vmem:[%s5742_s1 + $0x3c4] ss:$24 sps:$4 sm:$0xff]   ;;  %v3841_v15 = vld [vmem:[%s5742_s1 + $0x3c0] ss:$24 sps:$4 sm:$0xff]   ;;  %v3844_v17 = vld [vmem:[%s5742_s1 + $0x394] ss:$24 sps:$4 sm:$0xff]  }
  0x11   : > { %1339 = vmatpush1.bf16.msra.mxu0 %v3828_v6  ;;  %v3846_v18 = vld [vmem:[%s5742_s1 + $0x90] ss:$24 sps:$4 sm:$0xff]   ;;  %v3848_v20 = vld [vmem:[%s5742_s1 + $0x64] ss:$24 sps:$4 sm:$0xff]   ;;  %v3852_v22 = vld [vmem:[%s5742_s1 + $0x60] ss:$24 sps:$4 sm:$0xff]  }
  0x12   : > { %1382 = vmatpush1.bf16.msra.mxu1 %v3829_v7  ;;  %1340 = vmatprep.subr.bf16.mxu0 %v3830_v8  ;;  %v3847_v19 = vld [vmem:[%s5742_s1 + $0x390] ss:$24 sps:$4 sm:$0xff]   ;;  %v3850_v21 = vld [vmem:[%s5742_s1 + $0x364] ss:$24 sps:$4 sm:$0xff]   ;;  %v3853_v23 = vld [vmem:[%s5742_s1 + $0x360] ss:$24 sps:$4 sm:$0xff]  }
  0x13   : > { %1383 = vmatprep.subr.bf16.mxu1 %v3832_v9  ;;  %v3854_v24 = vld [vmem:[%s5742_s1 + $0x34] ss:$24 sps:$4 sm:$0xff]   ;;  %v3858_v26 = vld [vmem:[%s5742_s1 + $0x30] ss:$24 sps:$4 sm:$0xff]   ;;  %v3860_v28 = vld [vmem:[%s5742_s1 + $0x4] ss:$24 sps:$4 sm:$0xff]  }
  0x14   : > { %v3856_v25 = vld [vmem:[%s5742_s1 + $0x334] ss:$24 sps:$4 sm:$0xff]   ;;  %v3859_v27 = vld [vmem:[%s5742_s1 + $0x330] ss:$24 sps:$4 sm:$0xff]   ;;  %v3862_v29 = vld [vmem:[%s5742_s1 + $0x304] ss:$24 sps:$4 sm:$0xff]  }
  0x15   : > { %1341 = vmatpush1.bf16.msra.mxu0 %v3834_v10  ;;  %v3864_v30 = vld [vmem:[%s5742_s1] ss:$24 sps:$4 sm:$0xff]   ;;  %v3866_v32 = vld [vmem:[%s5742_s1 + $0x2d4] ss:$24 sps:$4 sm:$0xff]   ;;  %v3870_v34 = vld [vmem:[%s5742_s1 + $0x2d0] ss:$24 sps:$4 sm:$0xff]  }
  0x16   : > { %1384 = vmatpush1.bf16.msra.mxu1 %v3835_v11  ;;  %1342 = vmatprep.subr.bf16.mxu0 %v3836_v12  ;;  %v3865_v31 = vld [vmem:[%s5742_s1 + $0x300] ss:$24 sps:$4 sm:$0xff]   ;;  %v3868_v33 = vld [vmem:[%s5742_s1 + $0x5d4] ss:$24 sps:$4 sm:$0xff]   ;;  %v3871_v35 = vld [vmem:[%s5742_s1 + $0x5d0] ss:$24 sps:$4 sm:$0xff]  }
  0x17   : > { %1385 = vmatprep.subr.bf16.mxu1 %v3838_v13  ;;  %v3872_v36 = vld [vmem:[%s5742_s1 + $0x2a4] ss:$24 sps:$4 sm:$0xff]   ;;  %s5746_s13 = smov (!%p161_p3, %s3390_s13), 1  ;;  %v3876_v38 = vld [vmem:[%s5742_s1 + $0x2a0] ss:$24 sps:$4 sm:$0xff]   ;;  %vm4427_vm0 = vmmov 0  }
  0x18   : > { %v3874_v37 = vld [vmem:[%s5742_s1 + $0x5a4] ss:$24 sps:$4 sm:$0xff]   ;;  %v3877_v39 = vld [vmem:[%s5742_s1 + $0x5a0] ss:$24 sps:$4 sm:$0xff]   ;;  %v3878_v40 = vld [vmem:[%s5742_s1 + $0x274] ss:$24 sps:$4 sm:$0xff]  }
  0x19   : > { %1343 = vmatpush1.bf16.msra.mxu0 %v3840_v14  ;;  %s3789_s21 = sshll.u32 %s5746_s13, 6  ;;  %v3880_v41 = vld [vmem:[%s5742_s1 + $0x574] ss:$24 sps:$4 sm:$0xff]   ;;  %v3882_v42 = vld [vmem:[%s5742_s1 + $0x270] ss:$24 sps:$4 sm:$0xff]   ;;  %vm1637_vm1 = vcmask 130048  }
  0x1a   : > { %1386 = vmatpush1.bf16.msra.mxu1 %v3841_v15  ;;  %1344 = vmatprep.subr.bf16.mxu0 %v3842_v16  ;;  %v3883_v43 = vld [vmem:[%s5742_s1 + $0x570] ss:$24 sps:$4 sm:$0xff]   ;;  %s4601_s30 = scalar_lea.vmem %s5741_s0, %s3789_s21  ;;  %v3884_v44 = vld [vmem:[%s5742_s1 + $0x244] ss:$24 sps:$4 sm:$0xff]   ;;  %v3888_v50 = vld [vmem:[%s5742_s1 + $0x240] ss:$24 sps:$4 sm:$0xff]   ;;  %s170_s8 = scalar_lea.vmem %s5744_s3, %s3789_s21 }
  0x1b   : > { %1387 = vmatprep.subr.bf16.mxu1 %v3844_v17  ;;  %v3886_v45 = vld [vmem:[%s5742_s1 + $0x544] ss:$24 sps:$4 sm:$0xff]   ;;  %v173_v46 = vld [vmem:[%s4601_s30 + $0x8] sm:$0xff]  ;;  %v3889_v51 = vld [vmem:[%s5742_s1 + $0x540] ss:$24 sps:$4 sm:$0xff]  }
  0x1c   : > { %v177_v47 = vld [vmem:[%s4601_s30 + $0x28] sm:$0xff]  ;;  %v175_v48 = vld [vmem:[%s4601_s30 + $0x18] sm:$0xff]  ;;  %v172_v6 = vld [vmem:[%s4601_s30] sm:$0xff] }
  0x1d   : > { %1345 = vmatpush1.bf16.msra.mxu0 %v3846_v18  ;;  %v179_v49 = vld [vmem:[%s4601_s30 + $0x38] sm:$0xff]  ;;  %v3890_v52 = vld [vmem:[%s5742_s1 + $0x214] ss:$24 sps:$4 sm:$0xff]   ;;  %v4622_v53 = vpack.c.bf16 %v177_v47, %v173_v46  ;;  %v3894_v56 = vld [vmem:[%s5742_s1 + $0x210] ss:$24 sps:$4 sm:$0xff]  }
  0x1e   : > { %1388 = vmatpush1.bf16.msra.mxu1 %v3847_v19  ;;  %1346 = vmatprep.subr.bf16.mxu0 %v3848_v20  ;;  %v4624_v54 = vpack.c.bf16 %v179_v49, %v175_v48  ;;  %v3892_v55 = vld [vmem:[%s5742_s1 + $0x514] ss:$24 sps:$4 sm:$0xff]   ;;  %v3895_v57 = vld [vmem:[%s5742_s1 + $0x510] ss:$24 sps:$4 sm:$0xff]   ;;  %v3896_v58 = vld [vmem:[%s5742_s1 + $0x1e4] ss:$24 sps:$4 sm:$0xff]  }
  0x1f   : > { %1389 = vmatprep.subr.bf16.mxu1 %v3850_v21  ;;  %1368 = vmatprep.mubr.bf16.mxu0 %v4622_v53  ;;  %v3898_v59 = vld [vmem:[%s5742_s1 + $0x4e4] ss:$24 sps:$4 sm:$0xff]   ;;  %v3900_v60 = vld [vmem:[%s5742_s1 + $0x1e0] ss:$24 sps:$4 sm:$0xff]   ;;  %v3902_v62 = vld [vmem:[%s5742_s1 + $0x1b4] ss:$24 sps:$4 sm:$0xff]  }
  0x20   : > { %1411 = vmatprep.mubr.bf16.mxu1 %v4624_v54  ;;  %v3901_v61 = vld [vmem:[%s5742_s1 + $0x4e0] ss:$24 sps:$4 sm:$0xff]   ;;  %v3904_v63 = vld [vmem:[%s5742_s1 + $0x4b4] ss:$24 sps:$4 sm:$0xff]   ;;  %v3906_v0 = vld [vmem:[%s5742_s1 + $0x1b0] ss:$24 sps:$4 sm:$0xff]  }
  0x21   : > { %1347 = vmatpush1.bf16.msra.mxu0 %v3852_v22  ;;  %v3907_v1 = vld [vmem:[%s5742_s1 + $0x4b0] ss:$24 sps:$4 sm:$0xff]   ;;  %v3908_v2 = vld [vmem:[%s5742_s1 + $0x184] ss:$24 sps:$4 sm:$0xff]   ;;  %v3912_v4 = vld [vmem:[%s5742_s1 + $0x180] ss:$24 sps:$4 sm:$0xff]  }
  0x22   : > { %1390 = vmatpush1.bf16.msra.mxu1 %v3853_v23  ;;  %1348 = vmatprep.subr.bf16.mxu0 %v3854_v24  ;;  %v3910_v3 = vld [vmem:[%s5742_s1 + $0x484] ss:$24 sps:$4 sm:$0xff]   ;;  %v3913_v5 = vld [vmem:[%s5742_s1 + $0x480] ss:$24 sps:$4 sm:$0xff]   ;;  %v174_v8 = vld [vmem:[%s4601_s30 + $0x10] sm:$0xff] }
  0x23   : > { %1391 = vmatprep.subr.bf16.mxu1 %v3856_v25  ;;  %v176_v7 = vld [vmem:[%s4601_s30 + $0x20] sm:$0xff]  ;;  %v178_v9 = vld [vmem:[%s4601_s30 + $0x30] sm:$0xff] }
  0x24   : > { %v3916_v10 = vld [vmem:[%s5742_s1 + $0x15c] ss:$24 sps:$4 sm:$0xff]   ;;  %v4683_v12 = vpack.c.bf16 %v176_v7, %v172_v6  ;;  %v4685_v13 = vpack.c.bf16 %v178_v9, %v174_v8  ;;  %v3914_v14 = vld [vmem:[%s5742_s1 + $0x158] ss:$24 sps:$4 sm:$0xff]   ;;  %v3922_v16 = vld [vmem:[%s5742_s1 + $0x12c] ss:$24 sps:$4 sm:$0xff]  }
  0x25   : > { %1349 = vmatpush1.bf16.msra.mxu0 %v3858_v26  ;;  %v3919_v11 = vld [vmem:[%s5742_s1 + $0x45c] ss:$24 sps:$4 sm:$0xff]   ;;  %v3917_v15 = vld [vmem:[%s5742_s1 + $0x458] ss:$24 sps:$4 sm:$0xff]   ;;  %v3925_v17 = vld [vmem:[%s5742_s1 + $0x42c] ss:$24 sps:$4 sm:$0xff]  }
  0x26   : > { %1392 = vmatpush1.bf16.msra.mxu1 %v3859_v27  ;;  %1350 = vmatprep.subr.bf16.mxu0 %v3860_v28  ;;  %v3920_v18 = vld [vmem:[%s5742_s1 + $0x128] ss:$24 sps:$4 sm:$0xff]   ;;  %v3928_v20 = vld [vmem:[%s5742_s1 + $0xfc] ss:$24 sps:$4 sm:$0xff]   ;;  %v3926_v22 = vld [vmem:[%s5742_s1 + $0xf8] ss:$24 sps:$4 sm:$0xff]  }
  0x27   : > { %1393 = vmatprep.subr.bf16.mxu1 %v3862_v29  ;;  %v3923_v19 = vld [vmem:[%s5742_s1 + $0x428] ss:$24 sps:$4 sm:$0xff]   ;;  %v3931_v21 = vld [vmem:[%s5742_s1 + $0x3fc] ss:$24 sps:$4 sm:$0xff]   ;;  %v3929_v23 = vld [vmem:[%s5742_s1 + $0x3f8] ss:$24 sps:$4 sm:$0xff]  }
  0x28   : > { %v3934_v24 = vld [vmem:[%s5742_s1 + $0xcc] ss:$24 sps:$4 sm:$0xff]   ;;  %v3932_v26 = vld [vmem:[%s5742_s1 + $0xc8] ss:$24 sps:$4 sm:$0xff]   ;;  %v3940_v28 = vld [vmem:[%s5742_s1 + $0x9c] ss:$24 sps:$4 sm:$0xff]  }
  0x29   : > { %1351 = vmatpush1.bf16.msra.mxu0 %v3864_v30  ;;  %v3937_v25 = vld [vmem:[%s5742_s1 + $0x3cc] ss:$24 sps:$4 sm:$0xff]   ;;  %v3935_v27 = vld [vmem:[%s5742_s1 + $0x3c8] ss:$24 sps:$4 sm:$0xff]   ;;  %v3943_v29 = vld [vmem:[%s5742_s1 + $0x39c] ss:$24 sps:$4 sm:$0xff]  }
  0x2a   : > { %1394 = vmatpush1.bf16.msra.mxu1 %v3865_v31  ;;  %1352 = vmatprep.subr.bf16.mxu0 %v3866_v32  ;;  %v3938_v30 = vld [vmem:[%s5742_s1 + $0x98] ss:$24 sps:$4 sm:$0xff]   ;;  %v3946_v32 = vld [vmem:[%s5742_s1 + $0x6c] ss:$24 sps:$4 sm:$0xff]   ;;  %v4000_v6 = vld [vmem:[%s5742_s1 + $0x1bc] ss:$24 sps:$4 sm:$0xff]  }
  0x2b   : > { %1395 = vmatprep.subr.bf16.mxu1 %v3868_v33  ;;  %v3941_v31 = vld [vmem:[%s5742_s1 + $0x398] ss:$24 sps:$4 sm:$0xff]   ;;  %v3949_v33 = vld [vmem:[%s5742_s1 + $0x36c] ss:$24 sps:$4 sm:$0xff]   ;;  %v4003_v7 = vld [vmem:[%s5742_s1 + $0x4bc] ss:$24 sps:$4 sm:$0xff]  }
  0x2c   : > { %v3962_v46 = vld [vmem:[%s5742_s1 + $0x2d8] ss:$24 sps:$4 sm:$0xff]   ;;  %v3970_v48 = vld [vmem:[%s5742_s1 + $0x2ac] ss:$24 sps:$4 sm:$0xff]  }
  0x2d   : > { %1353 = vmatpush2.bf16.msra.mxu0 %v3870_v34  ;;  %v3944_v34 = vld [vmem:[%s5742_s1 + $0x68] ss:$24 sps:$4 sm:$0xff]   ;;  %v3965_v47 = vld [vmem:[%s5742_s1 + $0x5d8] ss:$24 sps:$4 sm:$0xff]   ;;  %v3973_v49 = vld [vmem:[%s5742_s1 + $0x5ac] ss:$24 sps:$4 sm:$0xff]  }
  0x2e   : > { %1396 = vmatpush2.bf16.msra.mxu1 %v3871_v35  ;;  %1354 = vmatprep.subr.bf16.mxu0 %v3872_v36  ;;  %v3947_v35 = vld [vmem:[%s5742_s1 + $0x368] ss:$24 sps:$4 sm:$0xff]   ;;  %v3952_v36 = vld [vmem:[%s5742_s1 + $0x3c] ss:$24 sps:$4 sm:$0xff]   ;;  %v3998_v8 = vld [vmem:[%s5742_s1 + $0x1b8] ss:$24 sps:$4 sm:$0xff]  }
  0x2f   : > { %1397 = vmatprep.subr.bf16.mxu1 %v3874_v37  ;;  %v3955_v37 = vld [vmem:[%s5742_s1 + $0x33c] ss:$24 sps:$4 sm:$0xff]   ;;  %v4001_v9 = vld [vmem:[%s5742_s1 + $0x4b8] ss:$24 sps:$4 sm:$0xff]  }
  0x31   : > { %1355 = vmatpush2.bf16.msra.mxu0 %v3876_v38  ;;  %v3950_v38 = vld [vmem:[%s5742_s1 + $0x38] ss:$24 sps:$4 sm:$0xff]  }
  0x32   : > { %1398 = vmatpush2.bf16.msra.mxu1 %v3877_v39  ;;  %1356 = vmatprep.subr.bf16.mxu0 %v3878_v40  ;;  %v3953_v39 = vld [vmem:[%s5742_s1 + $0x338] ss:$24 sps:$4 sm:$0xff]   ;;  %v3958_v40 = vld [vmem:[%s5742_s1 + $0xc] ss:$24 sps:$4 sm:$0xff]  }
  0x33   : > { %1399 = vmatprep.subr.bf16.mxu1 %v3880_v41  ;;  %v3961_v41 = vld [vmem:[%s5742_s1 + $0x30c] ss:$24 sps:$4 sm:$0xff]  }
  0x35   : > { %1357 = vmatpush2.bf16.msra.mxu0 %v3882_v42  ;;  %v3956_v42 = vld [vmem:[%s5742_s1 + $0x8] ss:$24 sps:$4 sm:$0xff]  }
  0x36   : > { %1400 = vmatpush2.bf16.msra.mxu1 %v3883_v43  ;;  %1358 = vmatprep.subr.bf16.mxu0 %v3884_v44  ;;  %v3959_v43 = vld [vmem:[%s5742_s1 + $0x308] ss:$24 sps:$4 sm:$0xff]   ;;  %v3964_v44 = vld [vmem:[%s5742_s1 + $0x2dc] ss:$24 sps:$4 sm:$0xff]  }
  0x37   : > { %1401 = vmatprep.subr.bf16.mxu1 %v3886_v45  ;;  %v3967_v45 = vld [vmem:[%s5742_s1 + $0x5dc] ss:$24 sps:$4 sm:$0xff]  }
  0x39   : > { %1359 = vmatpush2.bf16.msra.mxu0 %v3888_v50  ;;  %v3968_v50 = vld [vmem:[%s5742_s1 + $0x2a8] ss:$24 sps:$4 sm:$0xff]  }
  0x3a   : > { %1402 = vmatpush2.bf16.msra.mxu1 %v3889_v51  ;;  %1360 = vmatprep.subr.bf16.mxu0 %v3890_v52  ;;  %v3971_v51 = vld [vmem:[%s5742_s1 + $0x5a8] ss:$24 sps:$4 sm:$0xff]   ;;  %v3976_v52 = vld [vmem:[%s5742_s1 + $0x27c] ss:$24 sps:$4 sm:$0xff]  }
  0x3b   : > { %1403 = vmatprep.subr.bf16.mxu1 %v3892_v55  ;;  %v3979_v55 = vld [vmem:[%s5742_s1 + $0x57c] ss:$24 sps:$4 sm:$0xff]  }
  0x3d   : > { %1361 = vmatpush2.bf16.msra.mxu0 %v3894_v56  ;;  %v3974_v56 = vld [vmem:[%s5742_s1 + $0x278] ss:$24 sps:$4 sm:$0xff]  }
  0x3e   : > { %1404 = vmatpush2.bf16.msra.mxu1 %v3895_v57  ;;  %1362 = vmatprep.subr.bf16.mxu0 %v3896_v58  ;;  %v3977_v57 = vld [vmem:[%s5742_s1 + $0x578] ss:$24 sps:$4 sm:$0xff]   ;;  %v3982_v58 = vld [vmem:[%s5742_s1 + $0x24c] ss:$24 sps:$4 sm:$0xff]  }
  0x3f   : > { %1405 = vmatprep.subr.bf16.mxu1 %v3898_v59  ;;  %v3985_v59 = vld [vmem:[%s5742_s1 + $0x54c] ss:$24 sps:$4 sm:$0xff]  }
  0x41   : > { %1363 = vmatpush2.bf16.msra.mxu0 %v3900_v60  ;;  %v3980_v60 = vld [vmem:[%s5742_s1 + $0x248] ss:$24 sps:$4 sm:$0xff]  }
  0x42   : > { %1406 = vmatpush2.bf16.msra.mxu1 %v3901_v61  ;;  %1364 = vmatprep.subr.bf16.mxu0 %v3902_v62  ;;  %v3983_v61 = vld [vmem:[%s5742_s1 + $0x548] ss:$24 sps:$4 sm:$0xff]   ;;  %v3988_v62 = vld [vmem:[%s5742_s1 + $0x21c] ss:$24 sps:$4 sm:$0xff]  }
  0x43   : > { %1407 = vmatprep.subr.bf16.mxu1 %v3904_v63  ;;  %v3991_v63 = vld [vmem:[%s5742_s1 + $0x51c] ss:$24 sps:$4 sm:$0xff]  }
  0x45   : > { %1365 = vmatpush2.bf16.msra.mxu0 %v3906_v0  ;;  %v3986_v0 = vld [vmem:[%s5742_s1 + $0x218] ss:$24 sps:$4 sm:$0xff]  }
  0x46   : > { %1408 = vmatpush2.bf16.msra.mxu1 %v3907_v1  ;;  %1366 = vmatprep.subr.bf16.mxu0 %v3908_v2  ;;  %v3989_v1 = vld [vmem:[%s5742_s1 + $0x518] ss:$24 sps:$4 sm:$0xff]   ;;  %v3994_v2 = vld [vmem:[%s5742_s1 + $0x1ec] ss:$24 sps:$4 sm:$0xff]  }
  0x47   : > { %1409 = vmatprep.subr.bf16.mxu1 %v3910_v3  ;;  %v3997_v3 = vld [vmem:[%s5742_s1 + $0x4ec] ss:$24 sps:$4 sm:$0xff]  }
  0x49   : > { %1367 = vmatpush2.bf16.msra.mxu0 %v3912_v4  ;;  %v3992_v4 = vld [vmem:[%s5742_s1 + $0x1e8] ss:$24 sps:$4 sm:$0xff]  }
  0x4a   : > { %1410 = vmatpush2.bf16.msra.mxu1 %v3913_v5  ;;  %1422 = vmatprep.subr.bf16.mxu0 %v3916_v10  ;;  %v3995_v5 = vld [vmem:[%s5742_s1 + $0x4e8] ss:$24 sps:$4 sm:$0xff]   ;;  %v4006_v10 = vld [vmem:[%s5742_s1 + $0x18c] ss:$24 sps:$4 sm:$0xff]  }
  0x4b   : > { %1465 = vmatprep.subr.bf16.mxu1 %v3919_v11  ;;  %v4009_v11 = vld [vmem:[%s5742_s1 + $0x48c] ss:$24 sps:$4 sm:$0xff]  }
  0x4c   : > { %1369 = vmatmul.mubr.bf16.vlgmr.msra.gmra.mxu0 %v4683_v12 }
  0x4d   : > { %1412 = vmatmul.mubr.bf16.vlgmr.msra.gmra.mxu1 %v4685_v13  ;;  %1423 = vmatpush1.bf16.msra.mxu0 %v3914_v14  ;;  %v4004_v14 = vld [vmem:[%s5742_s1 + $0x188] ss:$24 sps:$4 sm:$0xff]  }
  0x4e   : > { %1466 = vmatpush1.bf16.msra.mxu1 %v3917_v15  ;;  %1424 = vmatprep.subr.bf16.mxu0 %v3922_v16  ;;  %v4007_v15 = vld [vmem:[%s5742_s1 + $0x488] ss:$24 sps:$4 sm:$0xff]   ;;  %v4012_v16 = vld [vmem:[%s5742_s1 + $0x164] ss:$24 sps:$4 sm:$0xff]  }
  0x4f   : > { %1467 = vmatprep.subr.bf16.mxu1 %v3925_v17  ;;  %1454 = vmatprep.mubr.bf16.mxu0 %v4622_v53  ;;  %v4015_v17 = vld [vmem:[%s5742_s1 + $0x464] ss:$24 sps:$4 sm:$0xff]  }
  0x50   : > { %1497 = vmatprep.mubr.bf16.mxu1 %v4624_v54 }
  0x51   : > { %1425 = vmatpush1.bf16.msra.mxu0 %v3920_v18  ;;  %v4010_v18 = vld [vmem:[%s5742_s1 + $0x160] ss:$24 sps:$4 sm:$0xff]  }
  0x52   : > { %1468 = vmatpush1.bf16.msra.mxu1 %v3923_v19  ;;  %1426 = vmatprep.subr.bf16.mxu0 %v3928_v20  ;;  %v4013_v19 = vld [vmem:[%s5742_s1 + $0x460] ss:$24 sps:$4 sm:$0xff]   ;;  %v4018_v20 = vld [vmem:[%s5742_s1 + $0x134] ss:$24 sps:$4 sm:$0xff]  }
  0x53   : > { %1469 = vmatprep.subr.bf16.mxu1 %v3931_v21  ;;  %v4021_v21 = vld [vmem:[%s5742_s1 + $0x434] ss:$24 sps:$4 sm:$0xff]  }
  0x55   : > { %1427 = vmatpush1.bf16.msra.mxu0 %v3926_v22  ;;  %v4016_v22 = vld [vmem:[%s5742_s1 + $0x130] ss:$24 sps:$4 sm:$0xff]  }
  0x56   : > { %1470 = vmatpush1.bf16.msra.mxu1 %v3929_v23  ;;  %1428 = vmatprep.subr.bf16.mxu0 %v3934_v24  ;;  %v4019_v23 = vld [vmem:[%s5742_s1 + $0x430] ss:$24 sps:$4 sm:$0xff]   ;;  %v4024_v24 = vld [vmem:[%s5742_s1 + $0x104] ss:$24 sps:$4 sm:$0xff]  }
  0x57   : > { %1471 = vmatprep.subr.bf16.mxu1 %v3937_v25  ;;  %v4027_v25 = vld [vmem:[%s5742_s1 + $0x404] ss:$24 sps:$4 sm:$0xff]  }
  0x59   : > { %1429 = vmatpush1.bf16.msra.mxu0 %v3932_v26  ;;  %v4022_v26 = vld [vmem:[%s5742_s1 + $0x100] ss:$24 sps:$4 sm:$0xff]  }
  0x5a   : > { %1472 = vmatpush1.bf16.msra.mxu1 %v3935_v27  ;;  %1430 = vmatprep.subr.bf16.mxu0 %v3940_v28  ;;  %v4025_v27 = vld [vmem:[%s5742_s1 + $0x400] ss:$24 sps:$4 sm:$0xff]   ;;  %v4030_v28 = vld [vmem:[%s5742_s1 + $0xd4] ss:$24 sps:$4 sm:$0xff]  }
  0x5b   : > { %1473 = vmatprep.subr.bf16.mxu1 %v3943_v29  ;;  %v4033_v29 = vld [vmem:[%s5742_s1 + $0x3d4] ss:$24 sps:$4 sm:$0xff]  }
  0x5d   : > { %1431 = vmatpush1.bf16.msra.mxu0 %v3938_v30  ;;  %v4028_v30 = vld [vmem:[%s5742_s1 + $0xd0] ss:$24 sps:$4 sm:$0xff]  }
  0x5e   : > { %1474 = vmatpush1.bf16.msra.mxu1 %v3941_v31  ;;  %1432 = vmatprep.subr.bf16.mxu0 %v3946_v32  ;;  %v4039_v31 = vld [vmem:[%s5742_s1 + $0x3a4] ss:$24 sps:$4 sm:$0xff]   ;;  %v4034_v32 = vld [vmem:[%s5742_s1 + $0xa0] ss:$24 sps:$4 sm:$0xff]  }
  0x5f   : > { %1475 = vmatprep.subr.bf16.mxu1 %v3949_v33  ;;  %v4037_v33 = vld [vmem:[%s5742_s1 + $0x3a0] ss:$24 sps:$4 sm:$0xff]  }
  0x61   : > { %1433 = vmatpush1.bf16.msra.mxu0 %v3944_v34  ;;  %v4042_v34 = vld [vmem:[%s5742_s1 + $0x74] ss:$24 sps:$4 sm:$0xff]  }
  0x62   : > { %1476 = vmatpush1.bf16.msra.mxu1 %v3947_v35  ;;  %1434 = vmatprep.subr.bf16.mxu0 %v3952_v36  ;;  %v4045_v35 = vld [vmem:[%s5742_s1 + $0x374] ss:$24 sps:$4 sm:$0xff]   ;;  %v4040_v36 = vld [vmem:[%s5742_s1 + $0x70] ss:$24 sps:$4 sm:$0xff]  }
  0x63   : > { %1477 = vmatprep.subr.bf16.mxu1 %v3955_v37  ;;  %v4043_v37 = vld [vmem:[%s5742_s1 + $0x370] ss:$24 sps:$4 sm:$0xff]  }
  0x65   : > { %1435 = vmatpush1.bf16.msra.mxu0 %v3950_v38  ;;  %v4048_v38 = vld [vmem:[%s5742_s1 + $0x44] ss:$24 sps:$4 sm:$0xff]  }
  0x66   : > { %1478 = vmatpush1.bf16.msra.mxu1 %v3953_v39  ;;  %1436 = vmatprep.subr.bf16.mxu0 %v3958_v40  ;;  %v4051_v39 = vld [vmem:[%s5742_s1 + $0x344] ss:$24 sps:$4 sm:$0xff]   ;;  %v4046_v40 = vld [vmem:[%s5742_s1 + $0x40] ss:$24 sps:$4 sm:$0xff]  }
  0x67   : > { %1479 = vmatprep.subr.bf16.mxu1 %v3961_v41  ;;  %v4049_v41 = vld [vmem:[%s5742_s1 + $0x340] ss:$24 sps:$4 sm:$0xff]  }
  0x69   : > { %1437 = vmatpush1.bf16.msra.mxu0 %v3956_v42  ;;  %v4054_v42 = vld [vmem:[%s5742_s1 + $0x14] ss:$24 sps:$4 sm:$0xff]  }
  0x6a   : > { %1480 = vmatpush1.bf16.msra.mxu1 %v3959_v43  ;;  %1438 = vmatprep.subr.bf16.mxu0 %v3964_v44  ;;  %v4057_v43 = vld [vmem:[%s5742_s1 + $0x314] ss:$24 sps:$4 sm:$0xff]   ;;  %v4052_v44 = vld [vmem:[%s5742_s1 + $0x10] ss:$24 sps:$4 sm:$0xff]  }
  0x6b   : > { %1481 = vmatprep.subr.bf16.mxu1 %v3967_v45  ;;  %v4055_v45 = vld [vmem:[%s5742_s1 + $0x310] ss:$24 sps:$4 sm:$0xff]  }
  0x6d   : > { %1439 = vmatpush2.bf16.msra.mxu0 %v3962_v46  ;;  %v4060_v46 = vld [vmem:[%s5742_s1 + $0x2e4] ss:$24 sps:$4 sm:$0xff]  }
  0x6e   : > { %1482 = vmatpush2.bf16.msra.mxu1 %v3965_v47  ;;  %1440 = vmatprep.subr.bf16.mxu0 %v3970_v48  ;;  %v4063_v47 = vld [vmem:[%s5742_s1 + $0x5e4] ss:$24 sps:$4 sm:$0xff]   ;;  %v4058_v48 = vld [vmem:[%s5742_s1 + $0x2e0] ss:$24 sps:$4 sm:$0xff]  }
  0x6f   : > { %1483 = vmatprep.subr.bf16.mxu1 %v3973_v49  ;;  %v4061_v49 = vld [vmem:[%s5742_s1 + $0x5e0] ss:$24 sps:$4 sm:$0xff]  }
  0x71   : > { %1441 = vmatpush2.bf16.msra.mxu0 %v3968_v50  ;;  %v4066_v50 = vld [vmem:[%s5742_s1 + $0x2b4] ss:$24 sps:$4 sm:$0xff]  }
  0x72   : > { %1484 = vmatpush2.bf16.msra.mxu1 %v3971_v51  ;;  %1442 = vmatprep.subr.bf16.mxu0 %v3976_v52  ;;  %v4069_v51 = vld [vmem:[%s5742_s1 + $0x5b4] ss:$24 sps:$4 sm:$0xff]   ;;  %v4064_v52 = vld [vmem:[%s5742_s1 + $0x2b0] ss:$24 sps:$4 sm:$0xff]  }
  0x73   : > { %1485 = vmatprep.subr.bf16.mxu1 %v3979_v55  ;;  %v4067_v55 = vld [vmem:[%s5742_s1 + $0x5b0] ss:$24 sps:$4 sm:$0xff]  }
  0x75   : > { %1443 = vmatpush2.bf16.msra.mxu0 %v3974_v56  ;;  %v4072_v56 = vld [vmem:[%s5742_s1 + $0x284] ss:$24 sps:$4 sm:$0xff]  }
  0x76   : > { %1486 = vmatpush2.bf16.msra.mxu1 %v3977_v57  ;;  %1444 = vmatprep.subr.bf16.mxu0 %v3982_v58  ;;  %v4075_v57 = vld [vmem:[%s5742_s1 + $0x584] ss:$24 sps:$4 sm:$0xff]   ;;  %v4070_v58 = vld [vmem:[%s5742_s1 + $0x280] ss:$24 sps:$4 sm:$0xff]  }
  0x77   : > { %1487 = vmatprep.subr.bf16.mxu1 %v3985_v59  ;;  %v4073_v59 = vld [vmem:[%s5742_s1 + $0x580] ss:$24 sps:$4 sm:$0xff]  }
  0x79   : > { %1445 = vmatpush2.bf16.msra.mxu0 %v3980_v60  ;;  %v4078_v60 = vld [vmem:[%s5742_s1 + $0x254] ss:$24 sps:$4 sm:$0xff]  }
  0x7a   : > { %1488 = vmatpush2.bf16.msra.mxu1 %v3983_v61  ;;  %1446 = vmatprep.subr.bf16.mxu0 %v3988_v62  ;;  %v4081_v61 = vld [vmem:[%s5742_s1 + $0x554] ss:$24 sps:$4 sm:$0xff]   ;;  %v4076_v62 = vld [vmem:[%s5742_s1 + $0x250] ss:$24 sps:$4 sm:$0xff]  }
  0x7b   : > { %1489 = vmatprep.subr.bf16.mxu1 %v3991_v63  ;;  %v4079_v63 = vld [vmem:[%s5742_s1 + $0x550] ss:$24 sps:$4 sm:$0xff]  }
  0x7d   : > { %1447 = vmatpush2.bf16.msra.mxu0 %v3986_v0  ;;  %v4084_v0 = vld [vmem:[%s5742_s1 + $0x224] ss:$24 sps:$4 sm:$0xff]  }
  0x7e   : > { %1490 = vmatpush2.bf16.msra.mxu1 %v3989_v1  ;;  %1448 = vmatprep.subr.bf16.mxu0 %v3994_v2  ;;  %v4087_v1 = vld [vmem:[%s5742_s1 + $0x524] ss:$24 sps:$4 sm:$0xff]   ;;  %v4082_v2 = vld [vmem:[%s5742_s1 + $0x220] ss:$24 sps:$4 sm:$0xff]  }
  0x7f   : > { %1491 = vmatprep.subr.bf16.mxu1 %v3997_v3  ;;  %v4085_v3 = vld [vmem:[%s5742_s1 + $0x520] ss:$24 sps:$4 sm:$0xff]  }
  0x81   : > { %1449 = vmatpush2.bf16.msra.mxu0 %v3992_v4  ;;  %v4090_v4 = vld [vmem:[%s5742_s1 + $0x1f4] ss:$24 sps:$4 sm:$0xff]  }
  0x82   : > { %1492 = vmatpush2.bf16.msra.mxu1 %v3995_v5  ;;  %1450 = vmatprep.subr.bf16.mxu0 %v4000_v6  ;;  %v4093_v5 = vld [vmem:[%s5742_s1 + $0x4f4] ss:$24 sps:$4 sm:$0xff]   ;;  %v4088_v6 = vld [vmem:[%s5742_s1 + $0x1f0] ss:$24 sps:$4 sm:$0xff]  }
  0x83   : > { %1493 = vmatprep.subr.bf16.mxu1 %v4003_v7  ;;  %v4091_v7 = vld [vmem:[%s5742_s1 + $0x4f0] ss:$24 sps:$4 sm:$0xff]  }
  0x85   : > { %1451 = vmatpush2.bf16.msra.mxu0 %v3998_v8  ;;  %v4096_v8 = vld [vmem:[%s5742_s1 + $0x1c4] ss:$24 sps:$4 sm:$0xff]  }
  0x86   : > { %1494 = vmatpush2.bf16.msra.mxu1 %v4001_v9  ;;  %1452 = vmatprep.subr.bf16.mxu0 %v4006_v10  ;;  %v4099_v9 = vld [vmem:[%s5742_s1 + $0x4c4] ss:$24 sps:$4 sm:$0xff]   ;;  %v4094_v10 = vld [vmem:[%s5742_s1 + $0x1c0] ss:$24 sps:$4 sm:$0xff]  }
  0x87   : > { %1495 = vmatprep.subr.bf16.mxu1 %v4009_v11  ;;  %v4097_v11 = vld [vmem:[%s5742_s1 + $0x4c0] ss:$24 sps:$4 sm:$0xff]  }
  0x89   : > { %1453 = vmatpush2.bf16.msra.mxu0 %v4004_v14  ;;  %v4102_v14 = vld [vmem:[%s5742_s1 + $0x194] ss:$24 sps:$4 sm:$0xff]  }
  0x8a   : > { %1496 = vmatpush2.bf16.msra.mxu1 %v4007_v15  ;;  %1508 = vmatprep.subr.bf16.mxu0 %v4012_v16  ;;  %v4105_v15 = vld [vmem:[%s5742_s1 + $0x494] ss:$24 sps:$4 sm:$0xff]   ;;  %v4100_v16 = vld [vmem:[%s5742_s1 + $0x190] ss:$24 sps:$4 sm:$0xff]  }
  0x8b   : > { %1551 = vmatprep.subr.bf16.mxu1 %v4015_v17  ;;  %v4103_v17 = vld [vmem:[%s5742_s1 + $0x490] ss:$24 sps:$4 sm:$0xff]  }
  0x8c   : > { %1455 = vmatmul.mubr.bf16.vlgmr.msra.gmra.mxu0 %v4683_v12 }
  0x8d   : > { %1498 = vmatmul.mubr.bf16.vlgmr.msra.gmra.mxu1 %v4685_v13  ;;  %1509 = vmatpush1.bf16.msra.mxu0 %v4010_v18  ;;  %v4426_v18 = vmov 0.0  }
  0x8e   : > { %1552 = vmatpush1.bf16.msra.mxu1 %v4013_v19  ;;  %1510 = vmatprep.subr.bf16.mxu0 %v4018_v20 }
  0x8f   : > { %1553 = vmatprep.subr.bf16.mxu1 %v4021_v21  ;;  %1540 = vmatprep.mubr.bf16.mxu0 %v4622_v53  ;;  %v4031_v53 = vld [vmem:[%s5742_s1 + $0x3d0] ss:$24 sps:$4 sm:$0xff]  }
  0x90   : > { %1583 = vmatprep.mubr.bf16.mxu1 %v4624_v54  ;;  %v4036_v54 = vld [vmem:[%s5742_s1 + $0xa4] ss:$24 sps:$4 sm:$0xff]  }
  0x91   : > { %1511 = vmatpush1.bf16.msra.mxu0 %v4016_v22 }
  0x92   : > { %1554 = vmatpush1.bf16.msra.mxu1 %v4019_v23  ;;  %1512 = vmatprep.subr.bf16.mxu0 %v4024_v24 }
  0x93   : > { %1555 = vmatprep.subr.bf16.mxu1 %v4027_v25 }
  0x95   : > { %1513 = vmatpush1.bf16.msra.mxu0 %v4022_v26 }
  0x96   : > { %1556 = vmatpush1.bf16.msra.mxu1 %v4025_v27  ;;  %1514 = vmatprep.subr.bf16.mxu0 %v4030_v28 }
  0x97   : > { %1557 = vmatprep.subr.bf16.mxu1 %v4033_v29 }
  0x99   : > { %1515 = vmatpush1.bf16.msra.mxu0 %v4028_v30 }
  0x9a   : > { %1558 = vmatpush1.bf16.msra.mxu1 %v4031_v53  ;;  %1516 = vmatprep.subr.bf16.mxu0 %v4036_v54 }
  0x9b   : > { %1559 = vmatprep.subr.bf16.mxu1 %v4039_v31 }
  0x9d   : > { %1517 = vmatpush1.bf16.msra.mxu0 %v4034_v32 }
  0x9e   : > { %1560 = vmatpush1.bf16.msra.mxu1 %v4037_v33  ;;  %1518 = vmatprep.subr.bf16.mxu0 %v4042_v34 }
  0x9f   : > { %1561 = vmatprep.subr.bf16.mxu1 %v4045_v35 }
  0xa1   : > { %1519 = vmatpush1.bf16.msra.mxu0 %v4040_v36 }
  0xa2   : > { %1562 = vmatpush1.bf16.msra.mxu1 %v4043_v37  ;;  %1520 = vmatprep.subr.bf16.mxu0 %v4048_v38 }
  0xa3   : > { %1563 = vmatprep.subr.bf16.mxu1 %v4051_v39 }
  0xa5   : > { %1521 = vmatpush1.bf16.msra.mxu0 %v4046_v40 }
  0xa6   : > { %1564 = vmatpush1.bf16.msra.mxu1 %v4049_v41  ;;  %1522 = vmatprep.subr.bf16.mxu0 %v4054_v42 }
  0xa7   : > { %1565 = vmatprep.subr.bf16.mxu1 %v4057_v43 }
  0xa9   : > { %1523 = vmatpush1.bf16.msra.mxu0 %v4052_v44 }
  0xaa   : > { %1566 = vmatpush1.bf16.msra.mxu1 %v4055_v45  ;;  %1524 = vmatprep.subr.bf16.mxu0 %v4060_v46 }
  0xab   : > { %1567 = vmatprep.subr.bf16.mxu1 %v4063_v47 }
  0xad   : > { %1525 = vmatpush2.bf16.msra.mxu0 %v4058_v48 }
  0xae   : > { %1568 = vmatpush2.bf16.msra.mxu1 %v4061_v49  ;;  %1526 = vmatprep.subr.bf16.mxu0 %v4066_v50 }
  0xaf   : > { %1569 = vmatprep.subr.bf16.mxu1 %v4069_v51 }
  0xb1   : > { %1527 = vmatpush2.bf16.msra.mxu0 %v4064_v52 }
  0xb2   : > { %1570 = vmatpush2.bf16.msra.mxu1 %v4067_v55  ;;  %1528 = vmatprep.subr.bf16.mxu0 %v4072_v56 }
  0xb3   : > { %1571 = vmatprep.subr.bf16.mxu1 %v4075_v57 }
  0xb5   : > { %1529 = vmatpush2.bf16.msra.mxu0 %v4070_v58 }
  0xb6   : > { %1572 = vmatpush2.bf16.msra.mxu1 %v4073_v59  ;;  %1530 = vmatprep.subr.bf16.mxu0 %v4078_v60 }
  0xb7   : > { %1573 = vmatprep.subr.bf16.mxu1 %v4081_v61 }
  0xb9   : > { %1531 = vmatpush2.bf16.msra.mxu0 %v4076_v62 }
  0xba   : > { %1574 = vmatpush2.bf16.msra.mxu1 %v4079_v63  ;;  %1532 = vmatprep.subr.bf16.mxu0 %v4084_v0 }
  0xbb   : > { %1575 = vmatprep.subr.bf16.mxu1 %v4087_v1 }
  0xbd   : > { %1533 = vmatpush2.bf16.msra.mxu0 %v4082_v2 }
  0xbe   : > { %1576 = vmatpush2.bf16.msra.mxu1 %v4085_v3  ;;  %1534 = vmatprep.subr.bf16.mxu0 %v4090_v4 }
  0xbf   : > { %1577 = vmatprep.subr.bf16.mxu1 %v4093_v5 }
  0xc1   : > { %1535 = vmatpush2.bf16.msra.mxu0 %v4088_v6 }
  0xc2   : > { %1578 = vmatpush2.bf16.msra.mxu1 %v4091_v7  ;;  %1536 = vmatprep.subr.bf16.mxu0 %v4096_v8 }
  0xc3   : > { %1579 = vmatprep.subr.bf16.mxu1 %v4099_v9 }
  0xc5   : > { %1537 = vmatpush2.bf16.msra.mxu0 %v4094_v10 }
  0xc6   : > { %1580 = vmatpush2.bf16.msra.mxu1 %v4097_v11  ;;  %1538 = vmatprep.subr.bf16.mxu0 %v4102_v14  ;;  %v4428_v11 = vmov 0   ;;  %v4108_v14 = vld [vmem:[%s5743_s2 + $0x154] ss:$24 sps:$4 sm:$0xff]  }
  0xc7   : > { %1581 = vmatprep.subr.bf16.mxu1 %v4105_v15  ;;  %v4111_v15 = vld [vmem:[%s5743_s2 + $0x454] ss:$24 sps:$4 sm:$0xff]  }
  0xc9   : > { %1539 = vmatpush2.bf16.msra.mxu0 %v4100_v16 }
  0xca   : > { %1582 = vmatpush2.bf16.msra.mxu1 %v4103_v17  ;;  %3795 = vmatprep.subr.bf16.mxu0 %v4426_v18 }
  0xcc   : > { %1541 = vmatmul.mubr.bf16.vlgmr.msra.gmra.mxu0 %v4683_v12 }
  0xcd   : > { %1584 = vmatmul.mubr.bf16.vlgmr.msra.gmra.mxu1 %v4685_v13  ;;  %3797 = vmatprep.mubr.msk.bf16.mxu0 %vm4427_vm0, %v4426_v18 }
  0xce   : > { %1700 = vmatprep.mubr.bf16.mxu1 %v4428_v11 }
 0x10c   : > { %v1370_v19 = vpop.f32.mrf.mxu0 }
 0x10d   : > { %v1413_v20 = vpop.f32.mrf.mxu1 }
 0x10e   : > { %v1372_v21 = vpop.f32.mrf.mxu0  ;;  %v1414_v12 = vadd.f32 %v1413_v20, %v1370_v19 }
 0x10f   : > { %v1415_v22 = vpop.f32.mrf.mxu1 }
 0x110   : > { %v1374_v23 = vpop.f32.mrf.mxu0  ;;  %v1416_v27 = vadd.f32 %v1415_v22, %v1372_v21 }
 0x111   : > { %v1417_v24 = vpop.f32.mrf.mxu1 }
 0x112   : > { %v1376_v25 = vpop.f32.mrf.mxu0  ;;  %v1418_v30 = vadd.f32 %v1417_v24, %v1374_v23  ;;  %v4106_v23 = vld [vmem:[%s5743_s2 + $0x150] ss:$24 sps:$4 sm:$0xff]  }
 0x113   : > { %v1419_v26 = vpop.f32.mrf.mxu1  ;;  %v4109_v24 = vld [vmem:[%s5743_s2 + $0x450] ss:$24 sps:$4 sm:$0xff]  }
 0x114   : > { %v1420_v28 = vadd.f32 %v1419_v26, %v1376_v25  ;;  %v1594_v53 = vpack.c.bf16 %v1418_v30, %v1414_v12  ;;  %v4114_v26 = vld [vmem:[%s5743_s2 + $0x124] ss:$24 sps:$4 sm:$0xff]   ;;  %v4120_v30 = vld [vmem:[%s5743_s2 + $0xf4] ss:$24 sps:$4 sm:$0xff]  }
 0x115   : > { %v4123_v12 = vld [vmem:[%s5743_s2 + $0x3f4] ss:$24 sps:$4 sm:$0xff]  }
 0x116   : > { %v1595_v29 = vpack.c.bf16 %v1420_v28, %v1416_v27  ;;  %v4117_v27 = vld [vmem:[%s5743_s2 + $0x424] ss:$24 sps:$4 sm:$0xff]   ;;  %v4112_v28 = vld [vmem:[%s5743_s2 + $0x120] ss:$24 sps:$4 sm:$0xff]  }
 0x118   : > { %3796 = vmatpush3.bf16.xpose.msra.mxu0 %v1595_v29  ;;  %v4115_v29 = vld [vmem:[%s5743_s2 + $0x420] ss:$24 sps:$4 sm:$0xff]  }
 0x11f   : > { %3798 = vmatmul.mubr.bf16.vlgmr.msra.gmra.mxu0 %v1594_v53  ;;  %v4118_v53 = vld [vmem:[%s5743_s2 + $0xf0] ss:$24 sps:$4 sm:$0xff]  }
 0x120   : > { %1743 = vmatprep.mubr.bf16.mxu0 %v4428_v11 }
 0x14c   : > { %v1456_v13 = vpop.f32.mrf.mxu0 }
 0x14d   : > { %v1499_v54 = vpop.f32.mrf.mxu1 }
 0x14e   : > { %v1458_v31 = vpop.f32.mrf.mxu0  ;;  %v1500_v33 = vadd.f32 %v1499_v54, %v1456_v13  ;;  %v4121_v13 = vld [vmem:[%s5743_s2 + $0x3f0] ss:$24 sps:$4 sm:$0xff]   ;;  %v4126_v54 = vld [vmem:[%s5743_s2 + $0xc4] ss:$24 sps:$4 sm:$0xff]  }
 0x14f   : > { %v1501_v32 = vpop.f32.mrf.mxu1 }
 0x150   : > { %v1460_v34 = vpop.f32.mrf.mxu0  ;;  %v1502_v36 = vadd.f32 %v1501_v32, %v1458_v31  ;;  %v4129_v31 = vld [vmem:[%s5743_s2 + $0x3c4] ss:$24 sps:$4 sm:$0xff]   ;;  %v4124_v32 = vld [vmem:[%s5743_s2 + $0xc0] ss:$24 sps:$4 sm:$0xff]  }
 0x151   : > { %v1503_v35 = vpop.f32.mrf.mxu1 }
 0x152   : > { %v1504_v37 = vadd.f32 %v1503_v35, %v1460_v34  ;;  %v1462_v38 = vpop.f32.mrf.mxu0  ;;  %v4132_v34 = vld [vmem:[%s5743_s2 + $0x94] ss:$24 sps:$4 sm:$0xff]  }
 0x153   : > { %v1505_v39 = vpop.f32.mrf.mxu1  ;;  %v4135_v35 = vld [vmem:[%s5743_s2 + $0x394] ss:$24 sps:$4 sm:$0xff]  }
 0x154   : > { %v1506_v40 = vadd.f32 %v1505_v39, %v1462_v38  ;;  %v1661_v41 = vpack.c.bf16 %v1504_v37, %v1500_v33  ;;  %v4127_v33 = vld [vmem:[%s5743_s2 + $0x3c0] ss:$24 sps:$4 sm:$0xff]   ;;  %v4133_v37 = vld [vmem:[%s5743_s2 + $0x390] ss:$24 sps:$4 sm:$0xff]   ;;  %v4138_v38 = vld [vmem:[%s5743_s2 + $0x64] ss:$24 sps:$4 sm:$0xff]  }
 0x155   : > { %v4141_v39 = vld [vmem:[%s5743_s2 + $0x364] ss:$24 sps:$4 sm:$0xff]  }
 0x156   : > { %v1662_v42 = vpack.c.bf16 %v1506_v40, %v1502_v36  ;;  %v4130_v36 = vld [vmem:[%s5743_s2 + $0x90] ss:$24 sps:$4 sm:$0xff]   ;;  %v4136_v40 = vld [vmem:[%s5743_s2 + $0x60] ss:$24 sps:$4 sm:$0xff]  }
 0x158   : > { %1682 = vmatprep.subr.bf16.mxu1 %v1662_v42  ;;  %v4144_v42 = vld [vmem:[%s5743_s2 + $0x34] ss:$24 sps:$4 sm:$0xff]  }
 0x159   : > { %1683 = vmatpush1.bf16.msra.mxu1 %v1661_v41  ;;  %v4139_v41 = vld [vmem:[%s5743_s2 + $0x360] ss:$24 sps:$4 sm:$0xff]  }
 0x15a   : > { %2910 = vmatprep.subr.bf16.mxu1 %v4108_v14  ;;  %v4187_v14 = vld [vmem:[%s5743_s2 + $0x4e0] ss:$24 sps:$4 sm:$0xff]  }
 0x18c   : > { %v1542_v43 = vpop.f32.mrf.mxu0 }
 0x18d   : > { %v1585_v44 = vpop.f32.mrf.mxu1 }
 0x18e   : > { %v1544_v45 = vpop.f32.mrf.mxu0  ;;  %v1586_v47 = vadd.f32 %v1585_v44, %v1542_v43  ;;  %v4147_v43 = vld [vmem:[%s5743_s2 + $0x334] ss:$24 sps:$4 sm:$0xff]   ;;  %v4142_v44 = vld [vmem:[%s5743_s2 + $0x30] ss:$24 sps:$4 sm:$0xff]  }
 0x18f   : > { %v1587_v46 = vpop.f32.mrf.mxu1 }
 0x190   : > { %v1546_v48 = vpop.f32.mrf.mxu0  ;;  %v1588_v50 = vadd.f32 %v1587_v46, %v1544_v45  ;;  %v4145_v45 = vld [vmem:[%s5743_s2 + $0x330] ss:$24 sps:$4 sm:$0xff]   ;;  %v4150_v46 = vld [vmem:[%s5743_s2 + $0x4] ss:$24 sps:$4 sm:$0xff]  }
 0x191   : > { %v1589_v49 = vpop.f32.mrf.mxu1 }
 0x192   : > { %v1590_v51 = vadd.f32 %v1589_v49, %v1546_v48  ;;  %v1548_v52 = vpop.f32.mrf.mxu0  ;;  %v4148_v48 = vld [vmem:[%s5743_s2] ss:$24 sps:$4 sm:$0xff]  }
 0x193   : > { %v1591_v55 = vpop.f32.mrf.mxu1  ;;  %v4151_v49 = vld [vmem:[%s5743_s2 + $0x300] ss:$24 sps:$4 sm:$0xff]  }
 0x194   : > { %v1592_v56 = vadd.f32 %v1591_v55, %v1548_v52  ;;  %v1663_v57 = vpack.c.bf16 %v1590_v51, %v1586_v47  ;;  %v4153_v47 = vld [vmem:[%s5743_s2 + $0x304] ss:$24 sps:$4 sm:$0xff]   ;;  %v4159_v51 = vld [vmem:[%s5743_s2 + $0x5d4] ss:$24 sps:$4 sm:$0xff]   ;;  %v4154_v52 = vld [vmem:[%s5743_s2 + $0x2d0] ss:$24 sps:$4 sm:$0xff]  }
 0x195   : > { %v4157_v55 = vld [vmem:[%s5743_s2 + $0x5d0] ss:$24 sps:$4 sm:$0xff]  }
 0x196   : > { %v1664_v58 = vpack.c.bf16 %v1592_v56, %v1588_v50  ;;  %v4156_v50 = vld [vmem:[%s5743_s2 + $0x2d4] ss:$24 sps:$4 sm:$0xff]   ;;  %v4162_v56 = vld [vmem:[%s5743_s2 + $0x2a4] ss:$24 sps:$4 sm:$0xff]  }
 0x198   : > { %1725 = vmatprep.subr.bf16.mxu0 %v1664_v58  ;;  %v4160_v58 = vld [vmem:[%s5743_s2 + $0x2a0] ss:$24 sps:$4 sm:$0xff]  }
 0x199   : > { %1726 = vmatpush1.bf16.msra.mxu0 %v1663_v57  ;;  %v4165_v57 = vld [vmem:[%s5743_s2 + $0x5a4] ss:$24 sps:$4 sm:$0xff]  }
 0x19a   : > { %2953 = vmatprep.subr.bf16.mxu0 %v4111_v15  ;;  %v4192_v15 = vld [vmem:[%s5743_s2 + $0x1b4] ss:$24 sps:$4 sm:$0xff]  }
 0x1df   : > { %v1630_v59 = vpop.f32.mrf.mxu0 }
 0x1e0   : > { %v1638_v60 = vsel %vm1637_vm1, %v1630_v59, -inf }
 0x1e1   : > { %1639 = vmax.xlane.f32.xlu0 %v1638_v60  ;;  %v3799_v61 = vpop.f32.mrf.mxu0  ;;  %v4168_v60 = vld [vmem:[%s5743_s2 + $0x274] ss:$24 sps:$4 sm:$0xff]  }
 0x1e2   : > { %v4171_v61 = vld [vmem:[%s5743_s2 + $0x574] ss:$24 sps:$4 sm:$0xff]  }
 0x1e3   : > { %v1633_v62 = vpop.f32.mrf.mxu0 }
 0x1e4   : > { %v1641_v63 = vsel %vm1637_vm1, %v1633_v62, -inf }
 0x1e5   : > { %1642 = vmax.xlane.f32.xlu0 %v1641_v63  ;;  %v3800_v0 = vpop.f32.mrf.mxu0  ;;  %v4169_v63 = vld [vmem:[%s5743_s2 + $0x570] ss:$24 sps:$4 sm:$0xff]  }
 0x1e6   : > { %v4174_v0 = vld [vmem:[%s5743_s2 + $0x244] ss:$24 sps:$4 sm:$0xff]  }
 0x26a   : > { %v1640_v1 = vpop.xlane.xlu0 %1639 }
 0x26b   : > { %v1644_v2 = vsub.f32 %v1630_v59, %v1640_v1  ;;  %v4163_v59 = vld [vmem:[%s5743_s2 + $0x5a0] ss:$24 sps:$4 sm:$0xff]   ;;  %v4177_v1 = vld [vmem:[%s5743_s2 + $0x544] ss:$24 sps:$4 sm:$0xff]  }
 0x26d   : > { %v1646_v3 = vmul.f32 1.442695, %v1644_v2  ;;  %v4172_v2 = vld [vmem:[%s5743_s2 + $0x240] ss:$24 sps:$4 sm:$0xff]  }
 0x26e   : > { %v1643_v4 = vpop.xlane.xlu0 %1642 }
 0x26f   : > { %4394 = vpow2.f32 %v1646_v3  ;;  %v1645_v5 = vsub.f32 %v1633_v62, %v1643_v4  ;;  %v4166_v62 = vld [vmem:[%s5743_s2 + $0x270] ss:$24 sps:$4 sm:$0xff]   ;;  %v4175_v3 = vld [vmem:[%s5743_s2 + $0x540] ss:$24 sps:$4 sm:$0xff]   ;;  %v4180_v4 = vld [vmem:[%s5743_s2 + $0x214] ss:$24 sps:$4 sm:$0xff]  }
 0x271   : > { %v1648_v6 = vmul.f32 1.442695, %v1645_v5  ;;  %v4183_v5 = vld [vmem:[%s5743_s2 + $0x514] ss:$24 sps:$4 sm:$0xff]  }
 0x273   : > { %4396 = vpow2.f32 %v1648_v6  ;;  %v4178_v6 = vld [vmem:[%s5743_s2 + $0x210] ss:$24 sps:$4 sm:$0xff]  }
 0x27c   : > { %v4395_v7 = vpop.eup %4394 }
 0x27d   : > { %v1650_v8 = vsel %vm1637_vm1, %v4395_v7, 0.0 }
 0x27e   : > { %1651 = vadd.xlane.f32.xlu1 %v1650_v8  ;;  %v4186_v8 = vld [vmem:[%s5743_s2 + $0x1e4] ss:$24 sps:$4 sm:$0xff]  }
 0x280   : > { %v4397_v9 = vpop.eup %4396 }
 0x281   : > { %v1653_v10 = vsel %vm1637_vm1, %v4397_v9, 0.0 }
 0x282   : > { %1654 = vadd.xlane.f32.xlu1 %v1653_v10  ;;  %v4184_v10 = vld [vmem:[%s5743_s2 + $0x1e0] ss:$24 sps:$4 sm:$0xff]  }
 0x307   : > { %v1652_v16 = vpop.xlane.xlu1 %1651 }
 0x308   : > { %4398 = vrcp.f32 %v1652_v16  ;;  %v4195_v16 = vld [vmem:[%s5743_s2 + $0x4b4] ss:$24 sps:$4 sm:$0xff]  }
 0x30b   : > { %v1655_v17 = vpop.xlane.xlu1 %1654 }
 0x30c   : > { %4400 = vrcp.f32 %v1655_v17  ;;  %v4190_v17 = vld [vmem:[%s5743_s2 + $0x1b0] ss:$24 sps:$4 sm:$0xff]  }
 0x315   : > { %v4399_v19 = vpop.eup %4398 }
 0x316   : > { %v1658_v21 = vmul.f32 %v4399_v19, %v4395_v7  ;;  %v4181_v7 = vld [vmem:[%s5743_s2 + $0x510] ss:$24 sps:$4 sm:$0xff]  }
 0x317   : > { %v4193_v19 = vld [vmem:[%s5743_s2 + $0x4b0] ss:$24 sps:$4 sm:$0xff]  }
 0x319   : > { %v4401_v20 = vpop.eup %4400 }
 0x31a   : > { %v1659_v22 = vmul.f32 %v4401_v20, %v4397_v9  ;;  %v4189_v9 = vld [vmem:[%s5743_s2 + $0x4e4] ss:$24 sps:$4 sm:$0xff]  }
 0x31b   : > { %v4198_v20 = vld [vmem:[%s5743_s2 + $0x184] ss:$24 sps:$4 sm:$0xff]  }
 0x31c   : > { %v1660_v25 = vpack.c.bf16 %v1659_v22, %v1658_v21  ;;  %v4201_v21 = vld [vmem:[%s5743_s2 + $0x484] ss:$24 sps:$4 sm:$0xff]   ;;  %v4196_v22 = vld [vmem:[%s5743_s2 + $0x180] ss:$24 sps:$4 sm:$0xff]  }
 0x31e   : > { %3591 = vmatmul.mubr.msk.bf16.vlgmr.msra.gmra.mxu1 %vm1637_vm1, %v1660_v25  ;;  %3592 = vmatmul.mubr.msk.bf16.vlgmr.msra.gmra.mxu0 %vm1637_vm1, %v1660_v25  ;;  %v4207_v25 = vld [vmem:[%s5743_s2 + $0x45c] ss:$24 sps:$4 sm:$0xff]  }
 0x31f   : > { %2911 = vmatpush1.bf16.msra.mxu1 %v4106_v23  ;;  %2954 = vmatpush1.bf16.msra.mxu0 %v4109_v24  ;;  %v4199_v23 = vld [vmem:[%s5743_s2 + $0x480] ss:$24 sps:$4 sm:$0xff]   ;;  %v4204_v24 = vld [vmem:[%s5743_s2 + $0x15c] ss:$24 sps:$4 sm:$0xff]  }
 0x320   : > { %2912 = vmatprep.subr.bf16.mxu1 %v4114_v26  ;;  %2955 = vmatprep.subr.bf16.mxu0 %v4117_v27 }
 0x323   : > { %2913 = vmatpush1.bf16.msra.mxu1 %v4112_v28  ;;  %2956 = vmatpush1.bf16.msra.mxu0 %v4115_v29 }
 0x324   : > { %2914 = vmatprep.subr.bf16.mxu1 %v4120_v30  ;;  %2957 = vmatprep.subr.bf16.mxu0 %v4123_v12 }
 0x327   : > { %2915 = vmatpush1.bf16.msra.mxu1 %v4118_v53  ;;  %2958 = vmatpush1.bf16.msra.mxu0 %v4121_v13  ;;  %v4410_v53 = vld [vmem:[%s4601_s30 + $0x20] sm:$0xff] }
 0x328   : > { %2916 = vmatprep.subr.bf16.mxu1 %v4126_v54  ;;  %2959 = vmatprep.subr.bf16.mxu0 %v4129_v31  ;;  %v4411_v54 = vld [vmem:[%s4601_s30 + $0x30] sm:$0xff] }
 0x32b   : > { %2917 = vmatpush1.bf16.msra.mxu1 %v4124_v32  ;;  %2960 = vmatpush1.bf16.msra.mxu0 %v4127_v33 }
 0x32c   : > { %2918 = vmatprep.subr.bf16.mxu1 %v4132_v34  ;;  %2961 = vmatprep.subr.bf16.mxu0 %v4135_v35  ;;  %v4412_v34 = vld [vmem:[%s4601_s30 + $0x8] sm:$0xff] }
 0x32f   : > { %2919 = vmatpush1.bf16.msra.mxu1 %v4130_v36  ;;  %2962 = vmatpush1.bf16.msra.mxu0 %v4133_v37  ;;  %v4413_v36 = vld [vmem:[%s4601_s30 + $0x18] sm:$0xff] }
 0x330   : > { %2920 = vmatprep.subr.bf16.mxu1 %v4138_v38  ;;  %2963 = vmatprep.subr.bf16.mxu0 %v4141_v39  ;;  %v4414_v38 = vld [vmem:[%s4601_s30 + $0x28] sm:$0xff] }
 0x333   : > { %2921 = vmatpush1.bf16.msra.mxu1 %v4136_v40  ;;  %2964 = vmatpush1.bf16.msra.mxu0 %v4139_v41  ;;  %v4415_v40 = vld [vmem:[%s4601_s30 + $0x38] sm:$0xff] }
 0x334   : > { %2922 = vmatprep.subr.bf16.mxu1 %v4144_v42  ;;  %2965 = vmatprep.subr.bf16.mxu0 %v4147_v43  ;;  %v4416_v42 = vld [vmem:[%s4601_s30] sm:$0xff] }
 0x337   : > { %2923 = vmatpush1.bf16.msra.mxu1 %v4142_v44  ;;  %2966 = vmatpush1.bf16.msra.mxu0 %v4145_v45  ;;  %v4417_v44 = vld [vmem:[%s4601_s30 + $0x10] sm:$0xff] }
 0x338   : > { %2924 = vmatprep.subr.bf16.mxu1 %v4150_v46  ;;  %2967 = vmatprep.subr.bf16.mxu0 %v4153_v47 }
 0x33b   : > { %2925 = vmatpush1.bf16.msra.mxu1 %v4148_v48  ;;  %2968 = vmatpush1.bf16.msra.mxu0 %v4151_v49  ;;  %v4202_v48 = vld [vmem:[%s5743_s2 + $0x158] ss:$24 sps:$4 sm:$0xff]  }
 0x33c   : > { %2926 = vmatprep.subr.bf16.mxu1 %v4156_v50  ;;  %2969 = vmatprep.subr.bf16.mxu0 %v4159_v51  ;;  %v4205_v49 = vld [vmem:[%s5743_s2 + $0x458] ss:$24 sps:$4 sm:$0xff]  }
 0x33f   : > { %2927 = vmatpush2.bf16.msra.mxu1 %v4154_v52  ;;  %2970 = vmatpush2.bf16.msra.mxu0 %v4157_v55  ;;  %v4210_v52 = vld [vmem:[%s5743_s2 + $0x12c] ss:$24 sps:$4 sm:$0xff]  }
 0x340   : > { %2928 = vmatprep.subr.bf16.mxu1 %v4162_v56  ;;  %2971 = vmatprep.subr.bf16.mxu0 %v4165_v57  ;;  %v4213_v55 = vld [vmem:[%s5743_s2 + $0x42c] ss:$24 sps:$4 sm:$0xff]   ;;  %v4208_v56 = vld [vmem:[%s5743_s2 + $0x128] ss:$24 sps:$4 sm:$0xff]  }
 0x341   : > { %v4211_v57 = vld [vmem:[%s5743_s2 + $0x428] ss:$24 sps:$4 sm:$0xff]  }
 0x343   : > { %2929 = vmatpush2.bf16.msra.mxu1 %v4160_v58  ;;  %2972 = vmatpush2.bf16.msra.mxu0 %v4163_v59  ;;  %v4216_v58 = vld [vmem:[%s5743_s2 + $0xfc] ss:$24 sps:$4 sm:$0xff]  }
 0x344   : > { %2930 = vmatprep.subr.bf16.mxu1 %v4168_v60  ;;  %2973 = vmatprep.subr.bf16.mxu0 %v4171_v61  ;;  %v4219_v59 = vld [vmem:[%s5743_s2 + $0x3fc] ss:$24 sps:$4 sm:$0xff]   ;;  %v4214_v60 = vld [vmem:[%s5743_s2 + $0xf8] ss:$24 sps:$4 sm:$0xff]  }
 0x345   : > { %v4217_v61 = vld [vmem:[%s5743_s2 + $0x3f8] ss:$24 sps:$4 sm:$0xff]  }
 0x347   : > { %2931 = vmatpush2.bf16.msra.mxu1 %v4166_v62  ;;  %2974 = vmatpush2.bf16.msra.mxu0 %v4169_v63  ;;  %v4222_v62 = vld [vmem:[%s5743_s2 + $0xcc] ss:$24 sps:$4 sm:$0xff]  }
 0x348   : > { %2932 = vmatprep.subr.bf16.mxu1 %v4174_v0  ;;  %2975 = vmatprep.subr.bf16.mxu0 %v4177_v1  ;;  %v4225_v63 = vld [vmem:[%s5743_s2 + $0x3cc] ss:$24 sps:$4 sm:$0xff]   ;;  %v4220_v0 = vld [vmem:[%s5743_s2 + $0xc8] ss:$24 sps:$4 sm:$0xff]  }
 0x349   : > { %v4223_v1 = vld [vmem:[%s5743_s2 + $0x3c8] ss:$24 sps:$4 sm:$0xff]  }
 0x34b   : > { %2933 = vmatpush2.bf16.msra.mxu1 %v4172_v2  ;;  %2976 = vmatpush2.bf16.msra.mxu0 %v4175_v3  ;;  %v4228_v2 = vld [vmem:[%s5743_s2 + $0x9c] ss:$24 sps:$4 sm:$0xff]  }
 0x34c   : > { %2934 = vmatprep.subr.bf16.mxu1 %v4180_v4  ;;  %2977 = vmatprep.subr.bf16.mxu0 %v4183_v5  ;;  %v4231_v3 = vld [vmem:[%s5743_s2 + $0x39c] ss:$24 sps:$4 sm:$0xff]   ;;  %v4226_v4 = vld [vmem:[%s5743_s2 + $0x98] ss:$24 sps:$4 sm:$0xff]  }
 0x34d   : > { %v4229_v5 = vld [vmem:[%s5743_s2 + $0x398] ss:$24 sps:$4 sm:$0xff]  }
 0x34f   : > { %2935 = vmatpush2.bf16.msra.mxu1 %v4178_v6  ;;  %2978 = vmatpush2.bf16.msra.mxu0 %v4181_v7  ;;  %v4234_v6 = vld [vmem:[%s5743_s2 + $0x6c] ss:$24 sps:$4 sm:$0xff]  }
 0x350   : > { %2936 = vmatprep.subr.bf16.mxu1 %v4186_v8  ;;  %2979 = vmatprep.subr.bf16.mxu0 %v4189_v9  ;;  %v4237_v7 = vld [vmem:[%s5743_s2 + $0x36c] ss:$24 sps:$4 sm:$0xff]   ;;  %v4232_v8 = vld [vmem:[%s5743_s2 + $0x68] ss:$24 sps:$4 sm:$0xff]  }
 0x351   : > { %v4235_v9 = vld [vmem:[%s5743_s2 + $0x368] ss:$24 sps:$4 sm:$0xff]  }
 0x353   : > { %2937 = vmatpush2.bf16.msra.mxu1 %v4184_v10  ;;  %2980 = vmatpush2.bf16.msra.mxu0 %v4187_v14  ;;  %v4240_v10 = vld [vmem:[%s5743_s2 + $0x3c] ss:$24 sps:$4 sm:$0xff]  }
 0x354   : > { %2938 = vmatprep.subr.bf16.mxu1 %v4192_v15  ;;  %2981 = vmatprep.subr.bf16.mxu0 %v4195_v16  ;;  %v4243_v14 = vld [vmem:[%s5743_s2 + $0x33c] ss:$24 sps:$4 sm:$0xff]   ;;  %v4238_v15 = vld [vmem:[%s5743_s2 + $0x38] ss:$24 sps:$4 sm:$0xff]  }
 0x355   : > { %v4241_v16 = vld [vmem:[%s5743_s2 + $0x338] ss:$24 sps:$4 sm:$0xff]  }
 0x357   : > { %2939 = vmatpush2.bf16.msra.mxu1 %v4190_v17  ;;  %2982 = vmatpush2.bf16.msra.mxu0 %v4193_v19  ;;  %v4246_v17 = vld [vmem:[%s5743_s2 + $0xc] ss:$24 sps:$4 sm:$0xff]  }
 0x358   : > { %2940 = vmatprep.subr.bf16.mxu1 %v4198_v20  ;;  %2983 = vmatprep.subr.bf16.mxu0 %v4201_v21  ;;  %v4249_v19 = vld [vmem:[%s5743_s2 + $0x30c] ss:$24 sps:$4 sm:$0xff]   ;;  %v4244_v20 = vld [vmem:[%s5743_s2 + $0x8] ss:$24 sps:$4 sm:$0xff]  }
 0x359   : > { %v4247_v21 = vld [vmem:[%s5743_s2 + $0x308] ss:$24 sps:$4 sm:$0xff]  }
 0x35b   : > { %2941 = vmatpush2.bf16.msra.mxu1 %v4196_v22  ;;  %2984 = vmatpush2.bf16.msra.mxu0 %v4199_v23  ;;  %v4252_v22 = vld [vmem:[%s5743_s2 + $0x2dc] ss:$24 sps:$4 sm:$0xff]  }
 0x35c   : > { %2996 = vmatprep.subr.bf16.mxu1 %v4204_v24  ;;  %3039 = vmatprep.subr.bf16.mxu0 %v4207_v25  ;;  %v4255_v23 = vld [vmem:[%s5743_s2 + $0x5dc] ss:$24 sps:$4 sm:$0xff]   ;;  %v4250_v24 = vld [vmem:[%s5743_s2 + $0x2d8] ss:$24 sps:$4 sm:$0xff]  }
 0x35d   : > { %v4253_v25 = vld [vmem:[%s5743_s2 + $0x5d8] ss:$24 sps:$4 sm:$0xff]  }
 0x3de   : > { %v1702_v26 = vpop.f32.mrf.mxu1  ;;  %v1745_v27 = vpop.f32.mrf.mxu0 }
 0x3df   : > { %v5303_v43 = vadd.f32 %v4416_v42, %v1702_v26  ;;  %v5306_v45 = vadd.f32 %v4417_v44, %v1745_v27  ;;  %v4258_v26 = vld [vmem:[%s5743_s2 + $0x2ac] ss:$24 sps:$4 sm:$0xff]   ;;  %v4274_v42 = vld [vmem:[%s5743_s2 + $0x218] ss:$24 sps:$4 sm:$0xff]  }
 0x3e0   : > { %v1704_v28 = vpop.f32.mrf.mxu1  ;;  %v1747_v29 = vpop.f32.mrf.mxu0  ;;  %v4261_v27 = vld [vmem:[%s5743_s2 + $0x5ac] ss:$24 sps:$4 sm:$0xff]   ;;  %v4277_v44 = vld [vmem:[%s5743_s2 + $0x518] ss:$24 sps:$4 sm:$0xff]  }
 0x3e1   : > { %v5291_v35 = vadd.f32 %v4412_v34, %v1704_v28  ;;  %v5294_v37 = vadd.f32 %v4413_v36, %v1747_v29  ;;  %v4256_v28 = vld [vmem:[%s5743_s2 + $0x2a8] ss:$24 sps:$4 sm:$0xff]  }
 0x3e2   : > { %v1706_v30 = vpop.f32.mrf.mxu1  ;;  %v1749_v12 = vpop.f32.mrf.mxu0  ;;  %v4259_v29 = vld [vmem:[%s5743_s2 + $0x5a8] ss:$24 sps:$4 sm:$0xff]  }
 0x3e3   : > { %v5285_v13 = vadd.f32 %v4410_v53, %v1706_v30  ;;  %v5288_v31 = vadd.f32 %v4411_v54, %v1749_v12  ;;  %v4264_v30 = vld [vmem:[%s5743_s2 + $0x27c] ss:$24 sps:$4 sm:$0xff]   ;;  %v4262_v53 = vld [vmem:[%s5743_s2 + $0x278] ss:$24 sps:$4 sm:$0xff]   ;;  %v4268_v34 = vld [vmem:[%s5743_s2 + $0x248] ss:$24 sps:$4 sm:$0xff]  }
 0x3e4   : > { %v1708_v32 = vpop.f32.mrf.mxu1  ;;  %v1751_v33 = vpop.f32.mrf.mxu0  ;;  %v4267_v12 = vld [vmem:[%s5743_s2 + $0x57c] ss:$24 sps:$4 sm:$0xff]   ;;  %v4265_v54 = vld [vmem:[%s5743_s2 + $0x578] ss:$24 sps:$4 sm:$0xff]   ;;  %v4271_v36 = vld [vmem:[%s5743_s2 + $0x548] ss:$24 sps:$4 sm:$0xff]  }
 0x3e5   : > { %v5297_v39 = vadd.f32 %v4414_v38, %v1708_v32  ;;  %v5300_v41 = vadd.f32 %v4415_v40, %v1751_v33  ;;  %v5324_v50 = vpack.c.bf16 %v5285_v13, %v5303_v43  ;;  %v5328_v51 = vpack.c.bf16 %v5288_v31, %v5306_v45  ;;  %v4270_v32 = vld [vmem:[%s5743_s2 + $0x24c] ss:$24 sps:$4 sm:$0xff]   ;;  %v4276_v38 = vld [vmem:[%s5743_s2 + $0x21c] ss:$24 sps:$4 sm:$0xff]  }
 0x3e6   : > { %v4273_v33 = vld [vmem:[%s5743_s2 + $0x54c] ss:$24 sps:$4 sm:$0xff]   ;;  %v4279_v40 = vld [vmem:[%s5743_s2 + $0x51c] ss:$24 sps:$4 sm:$0xff]  }
 0x3e7   : > { %v5310_v46 = vpack.c.bf16 %v5297_v39, %v5291_v35  ;;  %v5314_v47 = vpack.c.bf16 %v5300_v41, %v5294_v37 }
 0x3e9   : > { %2942 = vmatprep.mubr.bf16.mxu1 %v5310_v46  ;;  %2985 = vmatprep.mubr.bf16.mxu0 %v5314_v47 }
 0x3ea   : > { %2943 = vmatmul.mubr.bf16.vlgmr.msra.gmra.mxu1 %v5324_v50  ;;  %2986 = vmatmul.mubr.bf16.vlgmr.msra.gmra.mxu0 %v5328_v51 }
 0x3eb   : > { %2997 = vmatpush1.bf16.msra.mxu1 %v4202_v48  ;;  %3040 = vmatpush1.bf16.msra.mxu0 %v4205_v49  ;;  %v4282_v48 = vld [vmem:[%s5743_s2 + $0x1ec] ss:$24 sps:$4 sm:$0xff]  }
 0x3ec   : > { %3028 = vmatprep.mubr.bf16.mxu1 %v5310_v46  ;;  %3071 = vmatprep.mubr.bf16.mxu0 %v5314_v47  ;;  %v4285_v49 = vld [vmem:[%s5743_s2 + $0x4ec] ss:$24 sps:$4 sm:$0xff]  }
 0x3ed   : > { %2998 = vmatprep.subr.bf16.mxu1 %v4210_v52  ;;  %3041 = vmatprep.subr.bf16.mxu0 %v4213_v55  ;;  %v4280_v52 = vld [vmem:[%s5743_s2 + $0x1e8] ss:$24 sps:$4 sm:$0xff]  }
 0x3ee   : > { %v4283_v55 = vld [vmem:[%s5743_s2 + $0x4e8] ss:$24 sps:$4 sm:$0xff]  }
 0x3ef   : > { %2999 = vmatpush1.bf16.msra.mxu1 %v4208_v56  ;;  %3042 = vmatpush1.bf16.msra.mxu0 %v4211_v57  ;;  %v4288_v56 = vld [vmem:[%s5743_s2 + $0x1bc] ss:$24 sps:$4 sm:$0xff]  }
 0x3f0   : > { %3000 = vmatprep.subr.bf16.mxu1 %v4216_v58  ;;  %3043 = vmatprep.subr.bf16.mxu0 %v4219_v59  ;;  %v4291_v57 = vld [vmem:[%s5743_s2 + $0x4bc] ss:$24 sps:$4 sm:$0xff]   ;;  %v4286_v58 = vld [vmem:[%s5743_s2 + $0x1b8] ss:$24 sps:$4 sm:$0xff]  }
 0x3f1   : > { %v4289_v59 = vld [vmem:[%s5743_s2 + $0x4b8] ss:$24 sps:$4 sm:$0xff]  }
 0x3f3   : > { %3001 = vmatpush1.bf16.msra.mxu1 %v4214_v60  ;;  %3044 = vmatpush1.bf16.msra.mxu0 %v4217_v61  ;;  %v4294_v60 = vld [vmem:[%s5743_s2 + $0x18c] ss:$24 sps:$4 sm:$0xff]  }
 0x3f4   : > { %3002 = vmatprep.subr.bf16.mxu1 %v4222_v62  ;;  %3045 = vmatprep.subr.bf16.mxu0 %v4225_v63  ;;  %v4297_v61 = vld [vmem:[%s5743_s2 + $0x48c] ss:$24 sps:$4 sm:$0xff]   ;;  %v4292_v62 = vld [vmem:[%s5743_s2 + $0x188] ss:$24 sps:$4 sm:$0xff]  }
 0x3f5   : > { %v4295_v63 = vld [vmem:[%s5743_s2 + $0x488] ss:$24 sps:$4 sm:$0xff]  }
 0x3f7   : > { %3003 = vmatpush1.bf16.msra.mxu1 %v4220_v0  ;;  %3046 = vmatpush1.bf16.msra.mxu0 %v4223_v1  ;;  %v4300_v0 = vld [vmem:[%s5743_s2 + $0x164] ss:$24 sps:$4 sm:$0xff]  }
 0x3f8   : > { %3004 = vmatprep.subr.bf16.mxu1 %v4228_v2  ;;  %3047 = vmatprep.subr.bf16.mxu0 %v4231_v3  ;;  %v4303_v1 = vld [vmem:[%s5743_s2 + $0x464] ss:$24 sps:$4 sm:$0xff]   ;;  %v4298_v2 = vld [vmem:[%s5743_s2 + $0x160] ss:$24 sps:$4 sm:$0xff]  }
 0x3f9   : > { %v4301_v3 = vld [vmem:[%s5743_s2 + $0x460] ss:$24 sps:$4 sm:$0xff]  }
 0x3fb   : > { %3005 = vmatpush1.bf16.msra.mxu1 %v4226_v4  ;;  %3048 = vmatpush1.bf16.msra.mxu0 %v4229_v5  ;;  %v4306_v4 = vld [vmem:[%s5743_s2 + $0x134] ss:$24 sps:$4 sm:$0xff]  }
 0x3fc   : > { %3006 = vmatprep.subr.bf16.mxu1 %v4234_v6  ;;  %3049 = vmatprep.subr.bf16.mxu0 %v4237_v7  ;;  %v4309_v5 = vld [vmem:[%s5743_s2 + $0x434] ss:$24 sps:$4 sm:$0xff]   ;;  %v4304_v6 = vld [vmem:[%s5743_s2 + $0x130] ss:$24 sps:$4 sm:$0xff]  }
 0x3fd   : > { %v4307_v7 = vld [vmem:[%s5743_s2 + $0x430] ss:$24 sps:$4 sm:$0xff]  }
 0x3ff   : > { %3007 = vmatpush1.bf16.msra.mxu1 %v4232_v8  ;;  %3050 = vmatpush1.bf16.msra.mxu0 %v4235_v9  ;;  %v4312_v8 = vld [vmem:[%s5743_s2 + $0x104] ss:$24 sps:$4 sm:$0xff]   ;;  %v4310_v9 = vld [vmem:[%s5743_s2 + $0x100] ss:$24 sps:$4 sm:$0xff]  }
 0x400   : > { %3008 = vmatprep.subr.bf16.mxu1 %v4240_v10  ;;  %3051 = vmatprep.subr.bf16.mxu0 %v4243_v14  ;;  %v4318_v10 = vld [vmem:[%s5743_s2 + $0xd4] ss:$24 sps:$4 sm:$0xff]  }
 0x401   : > { %v4321_v14 = vld [vmem:[%s5743_s2 + $0x3d4] ss:$24 sps:$4 sm:$0xff]  }
 0x403   : > { %3009 = vmatpush1.bf16.msra.mxu1 %v4238_v15  ;;  %3052 = vmatpush1.bf16.msra.mxu0 %v4241_v16  ;;  %v4316_v15 = vld [vmem:[%s5743_s2 + $0xd0] ss:$24 sps:$4 sm:$0xff]  }
 0x404   : > { %3010 = vmatprep.subr.bf16.mxu1 %v4246_v17  ;;  %3053 = vmatprep.subr.bf16.mxu0 %v4249_v19  ;;  %v4319_v16 = vld [vmem:[%s5743_s2 + $0x3d0] ss:$24 sps:$4 sm:$0xff]   ;;  %v4324_v17 = vld [vmem:[%s5743_s2 + $0xa4] ss:$24 sps:$4 sm:$0xff]  }
 0x405   : > { %v4327_v19 = vld [vmem:[%s5743_s2 + $0x3a4] ss:$24 sps:$4 sm:$0xff]  }
 0x407   : > { %3011 = vmatpush1.bf16.msra.mxu1 %v4244_v20  ;;  %3054 = vmatpush1.bf16.msra.mxu0 %v4247_v21  ;;  %v4322_v20 = vld [vmem:[%s5743_s2 + $0xa0] ss:$24 sps:$4 sm:$0xff]  }
 0x408   : > { %3012 = vmatprep.subr.bf16.mxu1 %v4252_v22  ;;  %3055 = vmatprep.subr.bf16.mxu0 %v4255_v23  ;;  %v4325_v21 = vld [vmem:[%s5743_s2 + $0x3a0] ss:$24 sps:$4 sm:$0xff]   ;;  %v4330_v22 = vld [vmem:[%s5743_s2 + $0x74] ss:$24 sps:$4 sm:$0xff]  }
 0x409   : > { %v4333_v23 = vld [vmem:[%s5743_s2 + $0x374] ss:$24 sps:$4 sm:$0xff]  }
 0x40b   : > { %3013 = vmatpush2.bf16.msra.mxu1 %v4250_v24  ;;  %3056 = vmatpush2.bf16.msra.mxu0 %v4253_v25  ;;  %v4328_v24 = vld [vmem:[%s5743_s2 + $0x70] ss:$24 sps:$4 sm:$0xff]  }
 0x40c   : > { %3014 = vmatprep.subr.bf16.mxu1 %v4258_v26  ;;  %3057 = vmatprep.subr.bf16.mxu0 %v4261_v27  ;;  %v4331_v25 = vld [vmem:[%s5743_s2 + $0x370] ss:$24 sps:$4 sm:$0xff]   ;;  %v4336_v26 = vld [vmem:[%s5743_s2 + $0x44] ss:$24 sps:$4 sm:$0xff]  }
 0x40d   : > { %v4339_v27 = vld [vmem:[%s5743_s2 + $0x344] ss:$24 sps:$4 sm:$0xff]  }
 0x40f   : > { %3015 = vmatpush2.bf16.msra.mxu1 %v4256_v28  ;;  %3058 = vmatpush2.bf16.msra.mxu0 %v4259_v29  ;;  %v4334_v28 = vld [vmem:[%s5743_s2 + $0x40] ss:$24 sps:$4 sm:$0xff]  }
 0x410   : > { %3016 = vmatprep.subr.bf16.mxu1 %v4264_v30  ;;  %3059 = vmatprep.subr.bf16.mxu0 %v4267_v12  ;;  %v4337_v29 = vld [vmem:[%s5743_s2 + $0x340] ss:$24 sps:$4 sm:$0xff]   ;;  %v4342_v30 = vld [vmem:[%s5743_s2 + $0x14] ss:$24 sps:$4 sm:$0xff]  }
 0x411   : > { %v4345_v12 = vld [vmem:[%s5743_s2 + $0x314] ss:$24 sps:$4 sm:$0xff]  }
 0x413   : > { %3017 = vmatpush2.bf16.msra.mxu1 %v4262_v53  ;;  %3060 = vmatpush2.bf16.msra.mxu0 %v4265_v54  ;;  %v4340_v53 = vld [vmem:[%s5743_s2 + $0x10] ss:$24 sps:$4 sm:$0xff]  }
 0x414   : > { %3018 = vmatprep.subr.bf16.mxu1 %v4270_v32  ;;  %3061 = vmatprep.subr.bf16.mxu0 %v4273_v33  ;;  %v4343_v54 = vld [vmem:[%s5743_s2 + $0x310] ss:$24 sps:$4 sm:$0xff]   ;;  %v4348_v32 = vld [vmem:[%s5743_s2 + $0x2e4] ss:$24 sps:$4 sm:$0xff]  }
 0x415   : > { %v4351_v33 = vld [vmem:[%s5743_s2 + $0x5e4] ss:$24 sps:$4 sm:$0xff]  }
 0x417   : > { %3019 = vmatpush2.bf16.msra.mxu1 %v4268_v34  ;;  %3062 = vmatpush2.bf16.msra.mxu0 %v4271_v36  ;;  %v4346_v34 = vld [vmem:[%s5743_s2 + $0x2e0] ss:$24 sps:$4 sm:$0xff]  }
 0x418   : > { %3020 = vmatprep.subr.bf16.mxu1 %v4276_v38  ;;  %3063 = vmatprep.subr.bf16.mxu0 %v4279_v40  ;;  %v4349_v36 = vld [vmem:[%s5743_s2 + $0x5e0] ss:$24 sps:$4 sm:$0xff]   ;;  %v4354_v38 = vld [vmem:[%s5743_s2 + $0x2b4] ss:$24 sps:$4 sm:$0xff]  }
 0x419   : > { %v4357_v40 = vld [vmem:[%s5743_s2 + $0x5b4] ss:$24 sps:$4 sm:$0xff]  }
 0x41b   : > { %3021 = vmatpush2.bf16.msra.mxu1 %v4274_v42  ;;  %3064 = vmatpush2.bf16.msra.mxu0 %v4277_v44  ;;  %v4352_v42 = vld [vmem:[%s5743_s2 + $0x2b0] ss:$24 sps:$4 sm:$0xff]  }
 0x41c   : > { %3022 = vmatprep.subr.bf16.mxu1 %v4282_v48  ;;  %3065 = vmatprep.subr.bf16.mxu0 %v4285_v49  ;;  %v4355_v44 = vld [vmem:[%s5743_s2 + $0x5b0] ss:$24 sps:$4 sm:$0xff]   ;;  %v4360_v48 = vld [vmem:[%s5743_s2 + $0x284] ss:$24 sps:$4 sm:$0xff]  }
 0x41d   : > { %v4363_v49 = vld [vmem:[%s5743_s2 + $0x584] ss:$24 sps:$4 sm:$0xff]  }
 0x41f   : > { %3023 = vmatpush2.bf16.msra.mxu1 %v4280_v52  ;;  %3066 = vmatpush2.bf16.msra.mxu0 %v4283_v55  ;;  %v4358_v52 = vld [vmem:[%s5743_s2 + $0x280] ss:$24 sps:$4 sm:$0xff]  }
 0x420   : > { %3024 = vmatprep.subr.bf16.mxu1 %v4288_v56  ;;  %3067 = vmatprep.subr.bf16.mxu0 %v4291_v57  ;;  %v4361_v55 = vld [vmem:[%s5743_s2 + $0x580] ss:$24 sps:$4 sm:$0xff]   ;;  %v4366_v56 = vld [vmem:[%s5743_s2 + $0x254] ss:$24 sps:$4 sm:$0xff]  }
 0x421   : > { %v4369_v57 = vld [vmem:[%s5743_s2 + $0x554] ss:$24 sps:$4 sm:$0xff]  }
 0x423   : > { %3025 = vmatpush2.bf16.msra.mxu1 %v4286_v58  ;;  %3068 = vmatpush2.bf16.msra.mxu0 %v4289_v59  ;;  %v4364_v58 = vld [vmem:[%s5743_s2 + $0x250] ss:$24 sps:$4 sm:$0xff]  }
 0x424   : > { %3026 = vmatprep.subr.bf16.mxu1 %v4294_v60  ;;  %3069 = vmatprep.subr.bf16.mxu0 %v4297_v61  ;;  %v4367_v59 = vld [vmem:[%s5743_s2 + $0x550] ss:$24 sps:$4 sm:$0xff]   ;;  %v4372_v60 = vld [vmem:[%s5743_s2 + $0x224] ss:$24 sps:$4 sm:$0xff]  }
 0x425   : > { %v4375_v61 = vld [vmem:[%s5743_s2 + $0x524] ss:$24 sps:$4 sm:$0xff]  }
 0x427   : > { %3027 = vmatpush2.bf16.msra.mxu1 %v4292_v62  ;;  %3070 = vmatpush2.bf16.msra.mxu0 %v4295_v63  ;;  %v4370_v62 = vld [vmem:[%s5743_s2 + $0x220] ss:$24 sps:$4 sm:$0xff]  }
 0x428   : > { %3082 = vmatprep.subr.bf16.mxu1 %v4300_v0  ;;  %3125 = vmatprep.subr.bf16.mxu0 %v4303_v1  ;;  %v4373_v63 = vld [vmem:[%s5743_s2 + $0x520] ss:$24 sps:$4 sm:$0xff]   ;;  %v4378_v0 = vld [vmem:[%s5743_s2 + $0x1f4] ss:$24 sps:$4 sm:$0xff]  }
 0x429   : > { %v4381_v1 = vld [vmem:[%s5743_s2 + $0x4f4] ss:$24 sps:$4 sm:$0xff]  }
 0x42a   : > { %3029 = vmatmul.mubr.bf16.vlgmr.msra.gmra.mxu1 %v5324_v50  ;;  %3072 = vmatmul.mubr.bf16.vlgmr.msra.gmra.mxu0 %v5328_v51 }
 0x42b   : > { %3083 = vmatpush1.bf16.msra.mxu1 %v4298_v2  ;;  %3114 = vmatprep.mubr.bf16.mxu1 %v5310_v46  ;;  %v4315_v46 = vld [vmem:[%s5743_s2 + $0x404] ss:$24 sps:$4 sm:$0xff]   ;;  %v4376_v2 = vld [vmem:[%s5743_s2 + $0x1f0] ss:$24 sps:$4 sm:$0xff]  }
 0x42c   : > { %3126 = vmatpush1.bf16.msra.mxu0 %v4301_v3  ;;  %3157 = vmatprep.mubr.bf16.mxu0 %v5314_v47  ;;  %v4313_v47 = vld [vmem:[%s5743_s2 + $0x400] ss:$24 sps:$4 sm:$0xff]   ;;  %v4379_v3 = vld [vmem:[%s5743_s2 + $0x4f0] ss:$24 sps:$4 sm:$0xff]  }
 0x42d   : > { %3084 = vmatprep.subr.bf16.mxu1 %v4306_v4  ;;  %3127 = vmatprep.subr.bf16.mxu0 %v4309_v5  ;;  %v4384_v4 = vld [vmem:[%s5743_s2 + $0x1c4] ss:$24 sps:$4 sm:$0xff]  }
 0x42e   : > { %v4387_v5 = vld [vmem:[%s5743_s2 + $0x4c4] ss:$24 sps:$4 sm:$0xff]  }
 0x42f   : > { %3085 = vmatpush1.bf16.msra.mxu1 %v4304_v6  ;;  %v4382_v6 = vld [vmem:[%s5743_s2 + $0x1c0] ss:$24 sps:$4 sm:$0xff]  }
 0x430   : > { %3128 = vmatpush1.bf16.msra.mxu0 %v4307_v7  ;;  %3086 = vmatprep.subr.bf16.mxu1 %v4312_v8  ;;  %v4385_v7 = vld [vmem:[%s5743_s2 + $0x4c0] ss:$24 sps:$4 sm:$0xff]   ;;  %v4390_v8 = vld [vmem:[%s5743_s2 + $0x194] ss:$24 sps:$4 sm:$0xff]  }
 0x431   : > { %3129 = vmatprep.subr.bf16.mxu0 %v4315_v46  ;;  %v4393_v46 = vld [vmem:[%s5743_s2 + $0x494] ss:$24 sps:$4 sm:$0xff]  }
 0x433   : > { %3087 = vmatpush1.bf16.msra.mxu1 %v4310_v9  ;;  %v4388_v9 = vld [vmem:[%s5743_s2 + $0x190] ss:$24 sps:$4 sm:$0xff]  }
 0x434   : > { %3130 = vmatpush1.bf16.msra.mxu0 %v4313_v47  ;;  %3088 = vmatprep.subr.bf16.mxu1 %v4318_v10  ;;  %v4391_v47 = vld [vmem:[%s5743_s2 + $0x490] ss:$24 sps:$4 sm:$0xff]  }
 0x435   : > { %3131 = vmatprep.subr.bf16.mxu0 %v4321_v14 }
 0x437   : > { %3089 = vmatpush1.bf16.msra.mxu1 %v4316_v15 }
 0x438   : > { %3132 = vmatpush1.bf16.msra.mxu0 %v4319_v16  ;;  %3090 = vmatprep.subr.bf16.mxu1 %v4324_v17 }
 0x439   : > { %3133 = vmatprep.subr.bf16.mxu0 %v4327_v19 }
 0x43b   : > { %3091 = vmatpush1.bf16.msra.mxu1 %v4322_v20 }
 0x43c   : > { %3134 = vmatpush1.bf16.msra.mxu0 %v4325_v21  ;;  %3092 = vmatprep.subr.bf16.mxu1 %v4330_v22 }
 0x43d   : > { %3135 = vmatprep.subr.bf16.mxu0 %v4333_v23 }
 0x43f   : > { %3093 = vmatpush1.bf16.msra.mxu1 %v4328_v24 }
 0x440   : > { %3136 = vmatpush1.bf16.msra.mxu0 %v4331_v25  ;;  %3094 = vmatprep.subr.bf16.mxu1 %v4336_v26 }
 0x441   : > { %3137 = vmatprep.subr.bf16.mxu0 %v4339_v27 }
 0x443   : > { %3095 = vmatpush1.bf16.msra.mxu1 %v4334_v28 }
 0x444   : > { %3138 = vmatpush1.bf16.msra.mxu0 %v4337_v29  ;;  %3096 = vmatprep.subr.bf16.mxu1 %v4342_v30 }
 0x445   : > { %3139 = vmatprep.subr.bf16.mxu0 %v4345_v12 }
 0x447   : > { %3097 = vmatpush1.bf16.msra.mxu1 %v4340_v53 }
 0x448   : > { %3140 = vmatpush1.bf16.msra.mxu0 %v4343_v54  ;;  %3098 = vmatprep.subr.bf16.mxu1 %v4348_v32 }
 0x449   : > { %3141 = vmatprep.subr.bf16.mxu0 %v4351_v33 }
 0x44b   : > { %3099 = vmatpush2.bf16.msra.mxu1 %v4346_v34 }
 0x44c   : > { %3142 = vmatpush2.bf16.msra.mxu0 %v4349_v36  ;;  %3100 = vmatprep.subr.bf16.mxu1 %v4354_v38 }
 0x44d   : > { %3143 = vmatprep.subr.bf16.mxu0 %v4357_v40 }
 0x44f   : > { %3101 = vmatpush2.bf16.msra.mxu1 %v4352_v42 }
 0x450   : > { %3144 = vmatpush2.bf16.msra.mxu0 %v4355_v44  ;;  %3102 = vmatprep.subr.bf16.mxu1 %v4360_v48 }
 0x451   : > { %3145 = vmatprep.subr.bf16.mxu0 %v4363_v49 }
 0x453   : > { %3103 = vmatpush2.bf16.msra.mxu1 %v4358_v52 }
 0x454   : > { %3146 = vmatpush2.bf16.msra.mxu0 %v4361_v55  ;;  %3104 = vmatprep.subr.bf16.mxu1 %v4366_v56 }
 0x455   : > { %3147 = vmatprep.subr.bf16.mxu0 %v4369_v57 }
 0x457   : > { %3105 = vmatpush2.bf16.msra.mxu1 %v4364_v58 }
 0x458   : > { %3148 = vmatpush2.bf16.msra.mxu0 %v4367_v59  ;;  %3106 = vmatprep.subr.bf16.mxu1 %v4372_v60 }
 0x459   : > { %3149 = vmatprep.subr.bf16.mxu0 %v4375_v61 }
 0x45b   : > { %3107 = vmatpush2.bf16.msra.mxu1 %v4370_v62 }
 0x45c   : > { %3150 = vmatpush2.bf16.msra.mxu0 %v4373_v63  ;;  %3108 = vmatprep.subr.bf16.mxu1 %v4378_v0 }
 0x45d   : > { %3151 = vmatprep.subr.bf16.mxu0 %v4381_v1 }
 0x45f   : > { %3109 = vmatpush2.bf16.msra.mxu1 %v4376_v2 }
 0x460   : > { %3152 = vmatpush2.bf16.msra.mxu0 %v4379_v3  ;;  %3110 = vmatprep.subr.bf16.mxu1 %v4384_v4 }
 0x461   : > { %3153 = vmatprep.subr.bf16.mxu0 %v4387_v5 }
 0x463   : > { %3111 = vmatpush2.bf16.msra.mxu1 %v4382_v6 }
 0x464   : > { %3154 = vmatpush2.bf16.msra.mxu0 %v4385_v7  ;;  %3112 = vmatprep.subr.bf16.mxu1 %v4390_v8 }
 0x465   : > { %3155 = vmatprep.subr.bf16.mxu0 %v4393_v46 }
 0x467   : > { %3113 = vmatpush2.bf16.msra.mxu1 %v4388_v9 }
 0x468   : > { %3156 = vmatpush2.bf16.msra.mxu0 %v4391_v47  ;;  %3801 = vmatprep.subr.bf16.mxu1 %v4426_v18 }
 0x46a   : > { %3115 = vmatmul.mubr.bf16.vlgmr.msra.gmra.mxu1 %v5324_v50 }
 0x46b   : > { %3158 = vmatmul.mubr.bf16.vlgmr.msra.gmra.mxu0 %v5328_v51  ;;  %3803 = vmatprep.mubr.msk.bf16.mxu1 %vm4427_vm0, %v4426_v18 }
 0x46c   : > { %3273 = vmatprep.mubr.bf16.mxu0 %v4428_v11 }
 0x4aa   : > { %v2944_v10 = vpop.f32.mrf.mxu1  ;;  %v2987_v14 = vpop.f32.mrf.mxu0 }
 0x4ab   : > { %v2988_v25 = vadd.f32 %v2987_v14, %v2944_v10 }
 0x4ac   : > { %v2946_v15 = vpop.f32.mrf.mxu1  ;;  %v2989_v16 = vpop.f32.mrf.mxu0 }
 0x4ad   : > { %v2990_v22 = vadd.f32 %v2989_v16, %v2946_v15 }
 0x4ae   : > { %v2948_v17 = vpop.f32.mrf.mxu1  ;;  %v2991_v19 = vpop.f32.mrf.mxu0 }
 0x4af   : > { %v2992_v50 = vadd.f32 %v2991_v19, %v2948_v17 }
 0x4b0   : > { %v2950_v20 = vpop.f32.mrf.mxu1  ;;  %v2993_v21 = vpop.f32.mrf.mxu0 }
 0x4b1   : > { %v2994_v23 = vadd.f32 %v2993_v21, %v2950_v20  ;;  %v3168_v51 = vpack.c.bf16 %v2992_v50, %v2988_v25 }
 0x4b3   : > { %v3169_v24 = vpack.c.bf16 %v2994_v23, %v2990_v22 }
 0x4b5   : > { %3802 = vmatpush3.bf16.xpose.msra.mxu1 %v3169_v24 }
 0x4bc   : > { %3804 = vmatmul.mubr.bf16.vlgmr.msra.gmra.mxu1 %v3168_v51 }
 0x4bd   : > { %3316 = vmatprep.mubr.bf16.mxu1 %v4428_v11 }
 0x4ea   : > { %v3030_v18 = vpop.f32.mrf.mxu1  ;;  %v3073_v26 = vpop.f32.mrf.mxu0 }
 0x4eb   : > { %v3074_v34 = vadd.f32 %v3073_v26, %v3030_v18 }
 0x4ec   : > { %v3032_v27 = vpop.f32.mrf.mxu1  ;;  %v3075_v28 = vpop.f32.mrf.mxu0 }
 0x4ed   : > { %v3076_v32 = vadd.f32 %v3075_v28, %v3032_v27 }
 0x4ee   : > { %v3034_v29 = vpop.f32.mrf.mxu1  ;;  %v3077_v30 = vpop.f32.mrf.mxu0 }
 0x4ef   : > { %v3078_v12 = vadd.f32 %v3077_v30, %v3034_v29 }
 0x4f0   : > { %v3036_v53 = vpop.f32.mrf.mxu1  ;;  %v3079_v54 = vpop.f32.mrf.mxu0 }
 0x4f1   : > { %v3080_v33 = vadd.f32 %v3079_v54, %v3036_v53  ;;  %v3234_v38 = vpack.c.bf16 %v3078_v12, %v3074_v34 }
 0x4f3   : > { %v3235_v36 = vpack.c.bf16 %v3080_v33, %v3076_v32 }
 0x4f5   : > { %3255 = vmatprep.subr.bf16.mxu0 %v3235_v36 }
 0x4f6   : > { %3256 = vmatpush1.bf16.msra.mxu0 %v3234_v38 }
 0x52a   : > { %v3116_v40 = vpop.f32.mrf.mxu1 }
 0x52b   : > { %v3159_v42 = vpop.f32.mrf.mxu0 }
 0x52c   : > { %v3118_v44 = vpop.f32.mrf.mxu1  ;;  %v3160_v59 = vadd.f32 %v3159_v42, %v3116_v40 }
 0x52d   : > { %v3161_v11 = vpop.f32.mrf.mxu0 }
 0x52e   : > { %v3120_v48 = vpop.f32.mrf.mxu1  ;;  %v3162_v57 = vadd.f32 %v3161_v11, %v3118_v44 }
 0x52f   : > { %v3163_v49 = vpop.f32.mrf.mxu0 }
 0x530   : > { %v3122_v52 = vpop.f32.mrf.mxu1  ;;  %v3164_v55 = vadd.f32 %v3163_v49, %v3120_v48 }
 0x531   : > { %v3165_v56 = vpop.f32.mrf.mxu0 }
 0x532   : > { %v3166_v58 = vadd.f32 %v3165_v56, %v3122_v52  ;;  %v3236_v61 = vpack.c.bf16 %v3164_v55, %v3160_v59 }
 0x534   : > { %v3237_v60 = vpack.c.bf16 %v3166_v58, %v3162_v57 }
 0x536   : > { %3298 = vmatprep.subr.bf16.mxu1 %v3237_v60 }
 0x537   : > { %3299 = vmatpush1.bf16.msra.mxu1 %v3236_v61 }
 0x57c   : > { %v3204_v62 = vpop.f32.mrf.mxu1 }
 0x57d   : > { %v3211_v63 = vsel %vm1637_vm1, %v3204_v62, -inf }
 0x57e   : > { %3212 = vmax.xlane.f32.xlu0 %v3211_v63  ;;  %v3805_v0 = vpop.f32.mrf.mxu1 }
 0x580   : > { %v3207_v1 = vpop.f32.mrf.mxu1 }
 0x581   : > { %v3214_v2 = vsel %vm1637_vm1, %v3207_v1, -inf }
 0x582   : > { %3215 = vmax.xlane.f32.xlu1 %v3214_v2  ;;  %v3806_v3 = vpop.f32.mrf.mxu1 }
 0x607   : > { %v3213_v4 = vpop.xlane.xlu0 %3212 }
 0x608   : > { %v3217_v5 = vsub.f32 %v3204_v62, %v3213_v4 }
 0x60a   : > { %v3219_v6 = vmul.f32 1.442695, %v3217_v5 }
 0x60b   : > { %v3216_v7 = vpop.xlane.xlu1 %3215 }
 0x60c   : > { %4402 = vpow2.f32 %v3219_v6  ;;  %v3218_v8 = vsub.f32 %v3207_v1, %v3216_v7 }
 0x60e   : > { %v3221_v46 = vmul.f32 1.442695, %v3218_v8 }
 0x610   : > { %4404 = vpow2.f32 %v3221_v46 }
 0x619   : > { %v4403_v9 = vpop.eup %4402 }
 0x61a   : > { %v3223_v47 = vsel %vm1637_vm1, %v4403_v9, 0.0 }
 0x61b   : > { %3224 = vadd.xlane.f32.xlu0 %v3223_v47 }
 0x61d   : > { %v4405_v10 = vpop.eup %4404 }
 0x61e   : > { %v3226_v14 = vsel %vm1637_vm1, %v4405_v10, 0.0 }
 0x61f   : > { %3227 = vadd.xlane.f32.xlu1 %v3226_v14 }
 0x6a4   : > { %v3225_v15 = vpop.xlane.xlu0 %3224 }
 0x6a5   : > { %4406 = vrcp.f32 %v3225_v15 }
 0x6a8   : > { %v3228_v16 = vpop.xlane.xlu1 %3227 }
 0x6a9   : > { %4408 = vrcp.f32 %v3228_v16 }
 0x6b2   : > { %v4407_v17 = vpop.eup %4406 }
 0x6b3   : > { %v3231_v20 = vmul.f32 %v4407_v17, %v4403_v9 }
 0x6b6   : > { %v4409_v19 = vpop.eup %4408 }
 0x6b7   : > { %v3232_v21 = vmul.f32 %v4409_v19, %v4405_v10 }
 0x6b9   : > { %v3233_v22 = vpack.c.bf16 %v3232_v21, %v3231_v20 }
 0x6bb   : > { %3785 = vmatmul.mubr.msk.bf16.vlgmr.msra.gmra.mxu0 %vm1637_vm1, %v3233_v22  ;;  %3786 = vmatmul.mubr.msk.bf16.vlgmr.msra.gmra.mxu1 %vm1637_vm1, %v3233_v22 }
 0x77b   : > { %v3275_v23 = vpop.f32.mrf.mxu0  ;;  %v3318_v24 = vpop.f32.mrf.mxu1 }
 0x77c   : > { %v3276_v50 = vadd.f32 %v3275_v23, %v5303_v43  ;;  %v3319_v25 = vadd.f32 %v3318_v24, %v5306_v45 }
 0x77d   : > { %v3277_v51 = vpop.f32.mrf.mxu0  ;;  %v3320_v18 = vpop.f32.mrf.mxu1 }
 0x77e   : > { %3327 = vst [vmem:[%s170_s8] sm:$0xff] %v3276_v50  ;;  %3329 = vst [vmem:[%s170_s8 + $0x10] sm:$0xff] %v3319_v25  ;;  %v3278_v26 = vadd.f32 %v3277_v51, %v5291_v35  ;;  %v3321_v27 = vadd.f32 %v3320_v18, %v5294_v37 }
 0x77f   : > { %v3279_v28 = vpop.f32.mrf.mxu0  ;;  %v3322_v29 = vpop.f32.mrf.mxu1 }
 0x780   : > { %3328 = vst [vmem:[%s170_s8 + $0x8] sm:$0xff] %v3278_v26  ;;  %3330 = vst [vmem:[%s170_s8 + $0x18] sm:$0xff] %v3321_v27  ;;  %v3280_v30 = vadd.f32 %v3279_v28, %v5285_v13  ;;  %v3323_v12 = vadd.f32 %v3322_v29, %v5288_v31 }
 0x781   : > { %v3281_v53 = vpop.f32.mrf.mxu0  ;;  %v3324_v43 = vpop.f32.mrf.mxu1 }
 0x782   : > { %3331 = vst [vmem:[%s170_s8 + $0x20] sm:$0xff] %v3280_v30  ;;  %3333 = vst [vmem:[%s170_s8 + $0x30] sm:$0xff] %v3323_v12  ;;  %v3282_v45 = vadd.f32 %v3281_v53, %v5297_v39  ;;  %v3325_v54 = vadd.f32 %v3324_v43, %v5300_v41 }
 0x784   : > { %3332 = vst [vmem:[%s170_s8 + $0x28] sm:$0xff] %v3282_v45  ;;  %3334 = vst [vmem:[%s170_s8 + $0x38] sm:$0xff] %v3325_v54 }
 0x785 PF: > { %s13_s12 = sadd.s32 1, %s4424_s12  }
 0x786   : > { %p10_p4 = scmp.ge.s32.totalorder %s13_s12, 4  }
 0x788   :  { %12 = sbr.rel (!%p10_p4) target bundleno = 1 (0x1), region = 62 }

</bundles_post_ra>
